<compile_context>
chip_gen: v7x
topology: tpu7x:2x2x1
jax: 0.10.0
libtpu: 0.0.40
codegen_flags: <defaults>
</compile_context>

<pallas_src>
import math
import functools

import numpy as np
import jax
import jax.numpy as jnp
from jax import lax
from jax.experimental import pallas as pl
from jax.experimental.pallas import tpu as pltpu

# slots inside the (num_blocks, 12, TB) per-lane partial-sum output
(S_PRE, S_NEXT, S_ALL, S_SIM,
 T_NUM, T_PRE, T_NEXT, T_UNION,
 C_PRE, M_PRE, C_NEXT, M_NEXT) = range(12)


def _round_up(a, b):
    return ((a + b - 1) // b) * b


def _pad_last(a, target):
    pad = target - a.shape[-1]
    if pad == 0:
        return a
    cfg = [(0, 0)] * (a.ndim - 1) + [(0, pad)]
    return jnp.pad(a, cfg)   # zero padding: padded batch lanes contribute nothing


def _lead_sum(v):
    """Sum all axes except the last two (plain per-vreg VPU adds, no XLU)."""
    lead = tuple(range(v.ndim - 2))
    return jnp.sum(v, axis=lead) if lead else v


def _lane_sum(v):
    """Per-lane sum: leading axes first (VPU), one small cross-sublane reduce last."""
    return jnp.sum(_lead_sum(v), axis=0)


def _sst_loss_kernel(max_object, x_ref, t_ref, m0_ref, m1_ref, scal_ref, idx_ref):
    N = max_object
    C, P, Q, TB = x_ref.shape            # P = pre dim, Q = next dim (= N+1), TB lanes

    x = x_ref[...]                        # (C,P,Q,TB) f32
    t = t_ref[...].astype(jnp.float32)    # int8 -> f32 in-kernel (4x smaller DMA stream)
    m0 = m0_ref[...]                      # (C,P,1,TB) pre-object mask
    m1 = m1_ref[...]                      # (C,1,Q,TB) next-object mask

    # mask_region and its products with input / target.  A single masked-logit
    # tensor feeds both softmaxes: the PyTorch row-N / col-N zeroing only alters
    # row N of input_pre / col N of input_next, which never contribute to any
    # output (targets are zero there and the index outputs drop them).
    base = m0 * m1                        # (C,P,Q,TB)
    z = base * x
    bt = base * t                         # mask_region * target
    bt_rows = bt[:, :N]                   # rows < N (leading-dim slice: free)

    # ---- softmax over the "next" axis (axis 2, sublanes) -> input_pre -------
    # only rows < N are ever consumed, so compute it on the restricted rows.
    zr = z[:, :N]                                             # (C,N,Q,TB)
    zm_pre = jnp.max(zr, axis=2, keepdims=True)
    zs_pre = zr - zm_pre
    e_pre = jnp.exp(zs_pre)
    den_pre = jnp.sum(e_pre, axis=2, keepdims=True)           # (C,N,1,TB)
    inv_pre = pl.reciprocal(den_pre, approx=True)
    inv_pre = inv_pre * (2.0 - den_pre * inv_pre)              # one Newton step
    p_pre = e_pre * inv_pre
    logp_pre = zs_pre - jnp.log(den_pre)

    # ---- softmax over the "pre" axis (axis 1, leading dim) -> input_next ----
    zm_next = jnp.max(z, axis=1, keepdims=True)
    zs_next = z - zm_next
    e_next = jnp.exp(zs_next)
    den_next = jnp.sum(e_next, axis=1, keepdims=True)          # (C,1,Q,TB)
    inv_next = pl.reciprocal(den_next, approx=True)
    inv_next = inv_next * (2.0 - den_next * inv_next)
    p_next = e_next * inv_next
    logp_next = zs_next - jnp.log(den_next)

    p_next_r = p_next[:, :N]
    logp_next_r = logp_next[:, :N]

    # column (q < N) restriction of input_all via a tiny broadcast mask
    ids_col = lax.broadcasted_iota(jnp.int32, (1, 1, Q, TB), 2)
    col_keep = (ids_col < N).astype(jnp.float32)                # 1 for q<N, 0 at q=N
    col_neg = (col_keep - 1.0) * jnp.float32(1e30)               # 0 / -1e30

    p_all = jnp.maximum(p_pre, p_next_r * col_keep)              # (C,N,Q,TB)
    logp_all = jnp.maximum(logp_pre, logp_next_r + col_neg)
    absd = jnp.abs(p_next_r - p_pre)                             # |input_next - input_pre|

    # ---- first-occurrence argmaxes -------------------------------------------
    big_i = jnp.int32(2 ** 30)

    def argmax_q(v):                       # argmax over axis 2, keepdims -> (C,N,1,TB)
        vm = jnp.max(v, axis=2, keepdims=True)
        return jnp.min(jnp.where(v == vm, ids_col, big_i), axis=2, keepdims=True)

    def argmax_p(v):                       # argmax over axis 1 (unrolled) -> (C,Q,TB)
        best_v = v[:, 0]
        best_i = jnp.zeros(best_v.shape, jnp.int32)
        for p in range(1, v.shape[1]):
            cur = v[:, p]
            upd = cur > best_v
            best_v = jnp.where(upd, cur, best_v)
            best_i = jnp.where(upd, jnp.int32(p), best_i)
        return best_i

    idx_t_pre = argmax_q(bt_rows)          # == argmax(target_pre) on rows < N
    idx_p_pre = argmax_q(p_all)
    hit_pre = (idx_p_pre == idx_t_pre) & (m0[:, :N] > 0.0)      # (C,N,1,TB)

    idx_t_next = argmax_p(bt)              # == argmax(target_next) on cols < N
    idx_p_next = argmax_p(p_next)
    m1_sq = m1[:, 0]                       # (C,Q,TB)
    hit_next = (idx_p_next[:, :N] == idx_t_next[:, :N]) & (m1_sq[:, :N] > 0.0)

    # indexes_pre output: sublane- and lane-dense int32 block (C, N, TB),
    # written one lane-vector per (c, row) -- unmasked dense HBM writeback.
    for c in range(C):
        for p in range(N):
            idx_ref[c, p, :] = idx_p_pre[c, p, 0, :]

    # ---- per-lane partial sums ------------------------------------------------
    part_bt_rows = _lead_sum(bt_rows)                            # (Q,TB)

    s_pre = _lane_sum(bt_rows * logp_pre)
    s_next = jnp.sum(_lead_sum(bt * logp_next)[:N], axis=0)      # cols < N
    s_all = _lane_sum(bt_rows * logp_all)
    s_sim = jnp.sum(_lead_sum(bt_rows * absd)[:N], axis=0)       # rows < N, cols < N

    t_num = _lane_sum(t)                                         # raw target sum
    t_pre = jnp.sum(part_bt_rows, axis=0)
    t_next = jnp.sum(_lead_sum(bt)[:N], axis=0)
    t_union = jnp.sum(part_bt_rows[:N], axis=0)

    c_pre = _lane_sum(hit_pre.astype(jnp.float32))
    m_pre = _lane_sum(m0[:, :N])
    c_next = _lane_sum(hit_next.astype(jnp.float32))
    m_next = _lane_sum(m1_sq[:, :N])

    vals = (s_pre, s_next, s_all, s_sim,
            t_num, t_pre, t_next, t_union,
            c_pre, m_pre, c_next, m_next)
    for i, v in enumerate(vals):
        scal_ref[0, i, :] = v


@functools.partial(jax.jit, static_argnames=("max_object", "batch_tile"))
def sst_loss_forward(inp, target, mask0, mask1, *, max_object, batch_tile=1024):
    B, C, N1, N1b = inp.shape
    N = max_object
    assert N1 == N + 1 and N1b == N1

    x = inp.astype(jnp.float32)
    # target.byte().float() in the original; SST assignment targets are {0,1},
    # so int8 is an exact carrier and cuts the target DMA stream 4x.
    t8 = target.astype(jnp.uint8).astype(jnp.int8)
    m0 = mask0.astype(jnp.float32)
    m1 = mask1.astype(jnp.float32)

    # Batch tile: lanes in multiples of 128.  Aim for >= 2 grid blocks so both
    # v7x TensorCores get work; cap the tile so v5e/v6e amortize the per-step
    # overhead while staying far under any generation's VMEM budget.
    cap = max(128, _round_up(batch_tile, 128))
    TB = min(cap, max(128, _round_up(pl.cdiv(B, 2), 128)))
    B_pad = _round_up(B, TB)
    num_blocks = B_pad // TB

    # batch-last, lane-dense relayout (zero-padded lanes contribute nothing).
    # TODO(synk): produce these tensors batch-last upstream to avoid this
    # HBM->HBM relayout; under jit it at least fuses cast+transpose+pad.
    x_t = _pad_last(jnp.transpose(x, (1, 2, 3, 0)), B_pad)                  # (C,N1,N1,Bp) f32
    t_t = _pad_last(jnp.transpose(t8, (1, 2, 3, 0)), B_pad)                 # (C,N1,N1,Bp) i8
    m0_t = _pad_last(jnp.transpose(m0, (1, 2, 0)), B_pad)[:, :, None, :]    # (C,N1,1,Bp)
    m1_t = _pad_last(jnp.transpose(m1, (1, 2, 0)), B_pad)[:, None, :, :]    # (C,1,N1,Bp)

    kernel = functools.partial(_sst_loss_kernel, N)
    scal, idx = pl.pallas_call(
        kernel,
        out_shape=(jax.ShapeDtypeStruct((num_blocks, 12, TB), jnp.float32),
                   jax.ShapeDtypeStruct((C, N, B_pad), jnp.int32)),
        grid_spec=pltpu.PrefetchScalarGridSpec(
            num_scalar_prefetch=0,
            grid=(num_blocks,),
            in_specs=[
                # TODO(synk): on v5e add pipeline_mode=pl.Buffered(3) to the two
                # big streams if a trace shows exposed DMA.
                pl.BlockSpec((C, N1, N1, TB), lambda g: (0, 0, 0, g)),   # input  (f32)
                pl.BlockSpec((C, N1, N1, TB), lambda g: (0, 0, 0, g)),   # target (int8)
                pl.BlockSpec((C, N1, 1, TB), lambda g: (0, 0, 0, g)),    # mask0
                pl.BlockSpec((C, 1, N1, TB), lambda g: (0, 0, 0, g)),    # mask1
            ],
            out_specs=[
                pl.BlockSpec((1, 12, TB), lambda g: (g, 0, 0)),          # per-lane partials
                pl.BlockSpec((C, N, TB), lambda g: (0, 0, g)),           # indexes_pre
            ],
        ),
        compiler_params=pltpu.CompilerParams(
            dimension_semantics=("parallel",),          # blocks independent -> megacore OK
            vmem_limit_bytes=32 * 1024 * 1024,
        ),
    )(x_t, t_t, m0_t, m1_t)

    sums = jnp.sum(scal, axis=(0, 2))   # (12,) tiny finishing reduction in XLA
    s_pre, s_next, s_all, s_sim = sums[S_PRE], sums[S_NEXT], sums[S_ALL], sums[S_SIM]
    t_num, t_pre, t_next, t_union = sums[T_NUM], sums[T_PRE], sums[T_NEXT], sums[T_UNION]
    c_pre, mp_num, c_next, mn_num = sums[C_PRE], sums[M_PRE], sums[C_NEXT], sums[M_NEXT]

    # "if int(x.item()):" scalar control flow -> jnp.where on kernel-produced sums
    pre_nz = jnp.floor(t_pre) >= 1.0
    next_nz = jnp.floor(t_next) >= 1.0
    union_nz = jnp.floor(t_union) >= 1.0

    loss_pre = jnp.where(pre_nz, -s_pre / jnp.maximum(t_pre, 1.0), -s_pre)
    loss_next = jnp.where(next_nz, -s_next / jnp.maximum(t_next, 1.0), -s_next)
    loss = jnp.where(pre_nz & next_nz, -s_all / jnp.maximum(t_pre, 1.0), -s_all)
    loss_similarity = jnp.where(union_nz, s_sim / jnp.maximum(t_num, 1.0), s_sim)

    accuracy_pre = jnp.where(mp_num > 0, c_pre / jnp.maximum(mp_num, 1.0), c_pre + 1.0)
    accuracy_next = jnp.where(mn_num > 0, c_next / jnp.maximum(mn_num, 1.0), c_next + 1.0)

    # (B, C, N) int32  (PyTorch returns int64 indices)
    indexes_pre = jnp.transpose(idx[:, :, :B], (2, 0, 1))

    return (loss_pre, loss_next, loss_similarity,
            (loss_pre + loss_next + loss + loss_similarity) / 4.0,
            accuracy_pre, accuracy_next,
            (accuracy_pre + accuracy_next) / 2.0,
            indexes_pre)


def sst_loss_forward_ref(inp, target, mask0, mask1, max_object):
    # pure-JAX reference (mirrors the PyTorch code) used only to verify the kernel
    N = max_object
    x = inp.astype(jnp.float32)
    t = target.astype(jnp.uint8).astype(jnp.float32)
    m0 = mask0.astype(jnp.float32)[:, :, :, None]
    m1 = mask1.astype(jnp.float32)[:, :, None, :]
    mask_region = jnp.broadcast_to(m0, x.shape) * jnp.broadcast_to(m1, x.shape)
    mask_region_pre = mask_region.at[:, :, N, :].set(0.0)
    mask_region_next = mask_region.at[:, :, :, N].set(0.0)
    mask_region_union = mask_region_pre * mask_region_next
    input_pre = jax.nn.softmax(mask_region_pre * x, axis=3)
    input_next = jax.nn.softmax(mask_region_next * x, axis=2)
    input_all = input_pre.at[:, :, :N, :N].set(
        jnp.maximum(input_pre, input_next)[:, :, :N, :N])
    target_pre = mask_region_pre * t
    target_next = mask_region_next * t
    target_union = mask_region_union * t
    t_num, t_pre, t_next, t_union = t.sum(), target_pre.sum(), target_next.sum(), target_union.sum()
    s_pre = (target_pre * jnp.log(input_pre)).sum()
    s_next = (target_next * jnp.log(input_next)).sum()
    s_all = (target_pre * jnp.log(input_all)).sum()
    s_sim = (target_union * jnp.abs(1.0 - input_pre - (1.0 - input_next))).sum()
    loss_pre = jnp.where(jnp.floor(t_pre) >= 1, -s_pre / t_pre, -s_pre)
    loss_next = jnp.where(jnp.floor(t_next) >= 1, -s_next / t_next, -s_next)
    loss = jnp.where((jnp.floor(t_pre) >= 1) & (jnp.floor(t_next) >= 1), -s_all / t_pre, -s_all)
    loss_similarity = jnp.where(jnp.floor(t_union) >= 1, s_sim / t_num, s_sim)
    idx_t_pre = jnp.argmax(target_pre, axis=3)[:, :, :-1]
    idx_p_pre = jnp.argmax(input_all, axis=3)[:, :, :-1]
    mp = mask0.astype(jnp.float32)[:, :, :-1]
    c_pre = ((idx_p_pre == idx_t_pre) & (mp > 0)).astype(jnp.float32).sum()
    accuracy_pre = jnp.where(mp.sum() > 0, c_pre / mp.sum(), c_pre + 1.0)
    idx_t_next = jnp.argmax(target_next, axis=2)[:, :, :-1]
    idx_p_next = jnp.argmax(input_next, axis=2)[:, :, :-1]
    mn = mask1.astype(jnp.float32)[:, :, :-1]
    c_next = ((idx_p_next == idx_t_next) & (mn > 0)).astype(jnp.float32).sum()
    accuracy_next = jnp.where(mn.sum() > 0, c_next / mn.sum(), c_next + 1.0)
    return (loss_pre, loss_next, loss_similarity,
            (loss_pre + loss_next + loss + loss_similarity) / 4.0,
            accuracy_pre, accuracy_next, (accuracy_pre + accuracy_next) / 2.0,
            idx_p_pre.astype(jnp.int32))


if __name__ == "__main__":
    B, C = 2, 1
    max_object = 8
    N1 = max_object + 1

    key = jax.random.PRNGKey(0)
    k_in, k_tgt, k_m0, k_m1, k_w = jax.random.split(key, 5)

    x = jax.random.normal(k_in, (B, C, N1, N1), dtype=jnp.float32)
    target = (jax.random.uniform(k_tgt, (B, C, N1, N1)) < 0.35).astype(jnp.float32)
    mask0 = (jax.random.uniform(k_m0, (B, C, N1)) < 0.8).astype(jnp.float32)
    mask1 = (jax.random.uniform(k_m1, (B, C, N1)) < 0.8).astype(jnp.float32)
    # the "dummy object" slot is always valid in SST
    mask0 = mask0.at[:, :, max_object].set(1.0)
    mask1 = mask1.at[:, :, max_object].set(1.0)

    # Parameters declared in SSTLoss.__init__ (deterministic init; only used by
    # lossf(), not by forward(), so they do not enter the kernel).
    emb_dim, nID = 32, 10
    classifier_w = 0.02 * jax.random.normal(k_w, (nID, emb_dim), dtype=jnp.float32)
    classifier_b = jnp.zeros((nID,), jnp.float32)
    s_det = jnp.full((1,), -1.85, jnp.float32)
    s_id = jnp.full((1,), -1.05, jnp.float32)
    emb_scale = math.sqrt(2) * math.log(nID - 1)
    # TODO(synk): lossf() (FairMOT detection/ID losses) and forward()'s unused
    # args (outputs, current_fair_labels, next_fair_labels) are not part of the
    # tensor forward pass and are not kernelized.

    out = jax.block_until_ready(
        sst_loss_forward(x, target, mask0, mask1,
                         max_object=max_object, batch_tile=1024))
    ref = sst_loss_forward_ref(x, target, mask0, mask1, max_object)

    for o, r in zip(out[:7], ref[:7]):
        np.testing.assert_allclose(np.asarray(o), np.asarray(r), rtol=1e-4, atol=1e-4)
    np.testing.assert_array_equal(np.asarray(out[7]), np.asarray(ref[7]))

    print("KERNEL_OK")
</pallas_src>

<mosaic_0001>
module attributes {stable_mosaic.version = 11 : i64} {
  func.func @_sst_loss_kernel(%arg0: i32, %arg1: memref<1x9x9x128xf32, #tpu.memory_space<vmem>>, %arg2: memref<1x9x9x128xi8, #tpu.memory_space<vmem>>, %arg3: memref<1x9x1x128xf32, #tpu.memory_space<vmem>>, %arg4: memref<1x1x9x128xf32, #tpu.memory_space<vmem>>, %arg5: memref<1x12x128xf32, #tpu.memory_space<vmem>>, %arg6: memref<1x8x128xi32, #tpu.memory_space<vmem>>) attributes {dimension_semantics = [#tpu.dimension_semantics<parallel>], iteration_bounds = array<i64: 1>, scalar_prefetch = 0 : i64, scratch_operands = 0 : i64, tpu.core_type = #tpu.core_type<tc>, window_params = [{transform_indices = @transform_0, window_bounds = array<i64: 1, 9, 9, 128>}, {transform_indices = @transform_1, window_bounds = array<i64: 1, 9, 9, 128>}, {transform_indices = @transform_2, window_bounds = array<i64: 1, 9, 1, 128>}, {transform_indices = @transform_3, window_bounds = array<i64: 1, 1, 9, 128>}, {transform_indices = @transform_4, window_bounds = array<i64: 1, 12, 128>}, {transform_indices = @transform_5, window_bounds = array<i64: 1, 8, 128>}]} {
    %c0 = arith.constant 0 : index
    %c0_0 = arith.constant 0 : index
    %c0_1 = arith.constant 0 : index
    %c0_2 = arith.constant 0 : index
    %0 = vector.load %arg1[%c0, %c0_0, %c0_1, %c0_2] : memref<1x9x9x128xf32, #tpu.memory_space<vmem>>, vector<1x9x9x128xf32>
    %c0_3 = arith.constant 0 : index
    %c0_4 = arith.constant 0 : index
    %c0_5 = arith.constant 0 : index
    %c0_6 = arith.constant 0 : index
    %1 = vector.load %arg2[%c0_3, %c0_4, %c0_5, %c0_6] : memref<1x9x9x128xi8, #tpu.memory_space<vmem>>, vector<1x9x9x128xi8>
    %2 = arith.sitofp %1 : vector<1x9x9x128xi8> to vector<1x9x9x128xf32>
    %c0_7 = arith.constant 0 : index
    %c0_8 = arith.constant 0 : index
    %c0_9 = arith.constant 0 : index
    %c0_10 = arith.constant 0 : index
    %3 = vector.load %arg3[%c0_7, %c0_8, %c0_9, %c0_10] : memref<1x9x1x128xf32, #tpu.memory_space<vmem>>, vector<1x9x1x128xf32>
    %c0_11 = arith.constant 0 : index
    %c0_12 = arith.constant 0 : index
    %c0_13 = arith.constant 0 : index
    %c0_14 = arith.constant 0 : index
    %4 = vector.load %arg4[%c0_11, %c0_12, %c0_13, %c0_14] : memref<1x1x9x128xf32, #tpu.memory_space<vmem>>, vector<1x1x9x128xf32>
    %5 = vector.broadcast %3 : vector<1x9x1x128xf32> to vector<1x9x9x128xf32>
    %6 = vector.broadcast %4 : vector<1x1x9x128xf32> to vector<1x9x9x128xf32>
    %7 = arith.mulf %5, %6 : vector<1x9x9x128xf32>
    %8 = arith.mulf %7, %0 : vector<1x9x9x128xf32>
    %9 = arith.mulf %7, %2 : vector<1x9x9x128xf32>
    %10 = vector.extract_strided_slice %9 {offsets = [0, 0, 0, 0], sizes = [1, 8, 9, 128], strides = [1, 1, 1, 1]} : vector<1x9x9x128xf32> to vector<1x8x9x128xf32>
    %11 = vector.extract_strided_slice %8 {offsets = [0, 0, 0, 0], sizes = [1, 8, 9, 128], strides = [1, 1, 1, 1]} : vector<1x9x9x128xf32> to vector<1x8x9x128xf32>
    %cst = arith.constant dense<0xFF800000> : vector<1x8x128xf32>
    %12 = vector.multi_reduction <maximumf>, %11, %cst [2] : vector<1x8x9x128xf32> to vector<1x8x128xf32>
    %13 = vector.shape_cast %12 : vector<1x8x128xf32> to vector<1x8x1x128xf32>
    %14 = vector.broadcast %13 : vector<1x8x1x128xf32> to vector<1x8x9x128xf32>
    %15 = arith.subf %11, %14 : vector<1x8x9x128xf32>
    %16 = math.exp %15 : vector<1x8x9x128xf32>
    %cst_15 = arith.constant dense<0.000000e+00> : vector<1x8x128xf32>
    %17 = vector.multi_reduction <add>, %16, %cst_15 [2] : vector<1x8x9x128xf32> to vector<1x8x128xf32>
    %18 = vector.shape_cast %17 : vector<1x8x128xf32> to vector<1x8x1x128xf32>
    %19 = tpu.reciprocal %18 {approx = true} : vector<1x8x1x128xf32> -> vector<1x8x1x128xf32>
    %20 = arith.mulf %18, %19 : vector<1x8x1x128xf32>
    %cst_16 = arith.constant 2.000000e+00 : f32
    %21 = vector.broadcast %cst_16 : f32 to vector<1x8x1x128xf32>
    %22 = arith.subf %21, %20 : vector<1x8x1x128xf32>
    %23 = arith.mulf %19, %22 : vector<1x8x1x128xf32>
    %24 = vector.broadcast %23 : vector<1x8x1x128xf32> to vector<1x8x9x128xf32>
    %25 = arith.mulf %16, %24 : vector<1x8x9x128xf32>
    %26 = math.log %18 : vector<1x8x1x128xf32>
    %27 = vector.broadcast %26 : vector<1x8x1x128xf32> to vector<1x8x9x128xf32>
    %28 = arith.subf %15, %27 : vector<1x8x9x128xf32>
    %cst_17 = arith.constant dense<0xFF800000> : vector<1x9x128xf32>
    %29 = vector.multi_reduction <maximumf>, %8, %cst_17 [1] : vector<1x9x9x128xf32> to vector<1x9x128xf32>
    %30 = vector.shape_cast %29 : vector<1x9x128xf32> to vector<1x1x9x128xf32>
    %31 = vector.broadcast %30 : vector<1x1x9x128xf32> to vector<1x9x9x128xf32>
    %32 = arith.subf %8, %31 : vector<1x9x9x128xf32>
    %33 = math.exp %32 : vector<1x9x9x128xf32>
    %cst_18 = arith.constant dense<0.000000e+00> : vector<1x9x128xf32>
    %34 = vector.multi_reduction <add>, %33, %cst_18 [1] : vector<1x9x9x128xf32> to vector<1x9x128xf32>
    %35 = vector.shape_cast %34 : vector<1x9x128xf32> to vector<1x1x9x128xf32>
    %36 = tpu.reciprocal %35 {approx = true} : vector<1x1x9x128xf32> -> vector<1x1x9x128xf32>
    %37 = arith.mulf %35, %36 : vector<1x1x9x128xf32>
    %cst_19 = arith.constant 2.000000e+00 : f32
    %38 = vector.broadcast %cst_19 : f32 to vector<1x1x9x128xf32>
    %39 = arith.subf %38, %37 : vector<1x1x9x128xf32>
    %40 = arith.mulf %36, %39 : vector<1x1x9x128xf32>
    %41 = vector.broadcast %40 : vector<1x1x9x128xf32> to vector<1x9x9x128xf32>
    %42 = arith.mulf %33, %41 : vector<1x9x9x128xf32>
    %43 = math.log %35 : vector<1x1x9x128xf32>
    %44 = vector.broadcast %43 : vector<1x1x9x128xf32> to vector<1x9x9x128xf32>
    %45 = arith.subf %32, %44 : vector<1x9x9x128xf32>
    %46 = vector.extract_strided_slice %42 {offsets = [0, 0, 0, 0], sizes = [1, 8, 9, 128], strides = [1, 1, 1, 1]} : vector<1x9x9x128xf32> to vector<1x8x9x128xf32>
    %47 = vector.extract_strided_slice %45 {offsets = [0, 0, 0, 0], sizes = [1, 8, 9, 128], strides = [1, 1, 1, 1]} : vector<1x9x9x128xf32> to vector<1x8x9x128xf32>
    %48 = tpu.iota {dimensions = array<i32: 2>} : vector<1x1x9x128xi32>
    %c8_i32 = arith.constant 8 : i32
    %49 = vector.broadcast %c8_i32 : i32 to vector<1x1x9x128xi32>
    %50 = arith.cmpi slt, %48, %49 : vector<1x1x9x128xi32>
    %51 = arith.extui %50 : vector<1x1x9x128xi1> to vector<1x1x9x128xi32>
    %52 = arith.sitofp %51 : vector<1x1x9x128xi32> to vector<1x1x9x128xf32>
    %cst_20 = arith.constant 1.000000e+00 : f32
    %53 = vector.broadcast %cst_20 : f32 to vector<1x1x9x128xf32>
    %54 = arith.subf %52, %53 : vector<1x1x9x128xf32>
    %cst_21 = arith.constant 1.000000e+30 : f32
    %55 = vector.broadcast %cst_21 : f32 to vector<1x1x9x128xf32>
    %56 = arith.mulf %54, %55 : vector<1x1x9x128xf32>
    %57 = vector.broadcast %52 : vector<1x1x9x128xf32> to vector<1x8x9x128xf32>
    %58 = arith.mulf %46, %57 : vector<1x8x9x128xf32>
    %59 = arith.maximumf %25, %58 : vector<1x8x9x128xf32>
    %60 = vector.broadcast %56 : vector<1x1x9x128xf32> to vector<1x8x9x128xf32>
    %61 = arith.addf %47, %60 : vector<1x8x9x128xf32>
    %62 = arith.maximumf %28, %61 : vector<1x8x9x128xf32>
    %63 = arith.subf %46, %25 : vector<1x8x9x128xf32>
    %64 = math.absf %63 : vector<1x8x9x128xf32>
    %cst_22 = arith.constant dense<0xFF800000> : vector<1x8x128xf32>
    %65 = vector.multi_reduction <maximumf>, %10, %cst_22 [2] : vector<1x8x9x128xf32> to vector<1x8x128xf32>
    %66 = vector.shape_cast %65 : vector<1x8x128xf32> to vector<1x8x1x128xf32>
    %67 = vector.broadcast %66 : vector<1x8x1x128xf32> to vector<1x8x9x128xf32>
    %68 = arith.cmpf oeq, %10, %67 : vector<1x8x9x128xf32>
    %c1073741824_i32 = arith.constant 1073741824 : i32
    %69 = vector.shape_cast %48 : vector<1x1x9x128xi32> to vector<1x1x9x128xi32>
    %70 = vector.broadcast %69 : vector<1x1x9x128xi32> to vector<1x8x9x128xi32>
    %71 = vector.broadcast %c1073741824_i32 : i32 to vector<1x8x9x128xi32>
    %72 = arith.select %68, %70, %71 : vector<1x8x9x128xi1>, vector<1x8x9x128xi32>
    %cst_23 = arith.constant dense<2147483647> : vector<1x8x128xi32>
    %73 = vector.multi_reduction <minsi>, %72, %cst_23 [2] : vector<1x8x9x128xi32> to vector<1x8x128xi32>
    %74 = vector.shape_cast %73 : vector<1x8x128xi32> to vector<1x8x1x128xi32>
    %cst_24 = arith.constant dense<0xFF800000> : vector<1x8x128xf32>
    %75 = vector.multi_reduction <maximumf>, %59, %cst_24 [2] : vector<1x8x9x128xf32> to vector<1x8x128xf32>
    %76 = vector.shape_cast %75 : vector<1x8x128xf32> to vector<1x8x1x128xf32>
    %77 = vector.broadcast %76 : vector<1x8x1x128xf32> to vector<1x8x9x128xf32>
    %78 = arith.cmpf oeq, %59, %77 : vector<1x8x9x128xf32>
    %c1073741824_i32_25 = arith.constant 1073741824 : i32
    %79 = vector.shape_cast %48 : vector<1x1x9x128xi32> to vector<1x1x9x128xi32>
    %80 = vector.broadcast %79 : vector<1x1x9x128xi32> to vector<1x8x9x128xi32>
    %81 = vector.broadcast %c1073741824_i32_25 : i32 to vector<1x8x9x128xi32>
    %82 = arith.select %78, %80, %81 : vector<1x8x9x128xi1>, vector<1x8x9x128xi32>
    %cst_26 = arith.constant dense<2147483647> : vector<1x8x128xi32>
    %83 = vector.multi_reduction <minsi>, %82, %cst_26 [2] : vector<1x8x9x128xi32> to vector<1x8x128xi32>
    %84 = vector.shape_cast %83 : vector<1x8x128xi32> to vector<1x8x1x128xi32>
    %85 = arith.cmpi eq, %84, %74 : vector<1x8x1x128xi32>
    %86 = vector.extract_strided_slice %3 {offsets = [0, 0, 0, 0], sizes = [1, 8, 1, 128], strides = [1, 1, 1, 1]} : vector<1x9x1x128xf32> to vector<1x8x1x128xf32>
    %cst_27 = arith.constant 0.000000e+00 : f32
    %87 = vector.broadcast %cst_27 : f32 to vector<1x8x1x128xf32>
    %88 = arith.cmpf ogt, %86, %87 : vector<1x8x1x128xf32>
    %89 = arith.andi %85, %88 : vector<1x8x1x128xi1>
    %90 = vector.extract_strided_slice %9 {offsets = [0, 0, 0, 0], sizes = [1, 1, 9, 128], strides = [1, 1, 1, 1]} : vector<1x9x9x128xf32> to vector<1x1x9x128xf32>
    %91 = vector.shape_cast %90 : vector<1x1x9x128xf32> to vector<1x9x128xf32>
    %c0_i32 = arith.constant 0 : i32
    %92 = vector.broadcast %c0_i32 : i32 to vector<1x9x128xi32>
    %93 = vector.extract_strided_slice %9 {offsets = [0, 1, 0, 0], sizes = [1, 1, 9, 128], strides = [1, 1, 1, 1]} : vector<1x9x9x128xf32> to vector<1x1x9x128xf32>
    %94 = vector.shape_cast %93 : vector<1x1x9x128xf32> to vector<1x9x128xf32>
    %95 = arith.cmpf ogt, %94, %91 : vector<1x9x128xf32>
    %96 = arith.select %95, %94, %91 : vector<1x9x128xi1>, vector<1x9x128xf32>
    %c1_i32 = arith.constant 1 : i32
    %97 = vector.broadcast %c1_i32 : i32 to vector<1x9x128xi32>
    %98 = arith.select %95, %97, %92 : vector<1x9x128xi1>, vector<1x9x128xi32>
    %99 = vector.extract_strided_slice %9 {offsets = [0, 2, 0, 0], sizes = [1, 1, 9, 128], strides = [1, 1, 1, 1]} : vector<1x9x9x128xf32> to vector<1x1x9x128xf32>
    %100 = vector.shape_cast %99 : vector<1x1x9x128xf32> to vector<1x9x128xf32>
    %101 = arith.cmpf ogt, %100, %96 : vector<1x9x128xf32>
    %102 = arith.select %101, %100, %96 : vector<1x9x128xi1>, vector<1x9x128xf32>
    %c2_i32 = arith.constant 2 : i32
    %103 = vector.broadcast %c2_i32 : i32 to vector<1x9x128xi32>
    %104 = arith.select %101, %103, %98 : vector<1x9x128xi1>, vector<1x9x128xi32>
    %105 = vector.extract_strided_slice %9 {offsets = [0, 3, 0, 0], sizes = [1, 1, 9, 128], strides = [1, 1, 1, 1]} : vector<1x9x9x128xf32> to vector<1x1x9x128xf32>
    %106 = vector.shape_cast %105 : vector<1x1x9x128xf32> to vector<1x9x128xf32>
    %107 = arith.cmpf ogt, %106, %102 : vector<1x9x128xf32>
    %108 = arith.select %107, %106, %102 : vector<1x9x128xi1>, vector<1x9x128xf32>
    %c3_i32 = arith.constant 3 : i32
    %109 = vector.broadcast %c3_i32 : i32 to vector<1x9x128xi32>
    %110 = arith.select %107, %109, %104 : vector<1x9x128xi1>, vector<1x9x128xi32>
    %111 = vector.extract_strided_slice %9 {offsets = [0, 4, 0, 0], sizes = [1, 1, 9, 128], strides = [1, 1, 1, 1]} : vector<1x9x9x128xf32> to vector<1x1x9x128xf32>
    %112 = vector.shape_cast %111 : vector<1x1x9x128xf32> to vector<1x9x128xf32>
    %113 = arith.cmpf ogt, %112, %108 : vector<1x9x128xf32>
    %114 = arith.select %113, %112, %108 : vector<1x9x128xi1>, vector<1x9x128xf32>
    %c4_i32 = arith.constant 4 : i32
    %115 = vector.broadcast %c4_i32 : i32 to vector<1x9x128xi32>
    %116 = arith.select %113, %115, %110 : vector<1x9x128xi1>, vector<1x9x128xi32>
    %117 = vector.extract_strided_slice %9 {offsets = [0, 5, 0, 0], sizes = [1, 1, 9, 128], strides = [1, 1, 1, 1]} : vector<1x9x9x128xf32> to vector<1x1x9x128xf32>
    %118 = vector.shape_cast %117 : vector<1x1x9x128xf32> to vector<1x9x128xf32>
    %119 = arith.cmpf ogt, %118, %114 : vector<1x9x128xf32>
    %120 = arith.select %119, %118, %114 : vector<1x9x128xi1>, vector<1x9x128xf32>
    %c5_i32 = arith.constant 5 : i32
    %121 = vector.broadcast %c5_i32 : i32 to vector<1x9x128xi32>
    %122 = arith.select %119, %121, %116 : vector<1x9x128xi1>, vector<1x9x128xi32>
    %123 = vector.extract_strided_slice %9 {offsets = [0, 6, 0, 0], sizes = [1, 1, 9, 128], strides = [1, 1, 1, 1]} : vector<1x9x9x128xf32> to vector<1x1x9x128xf32>
    %124 = vector.shape_cast %123 : vector<1x1x9x128xf32> to vector<1x9x128xf32>
    %125 = arith.cmpf ogt, %124, %120 : vector<1x9x128xf32>
    %126 = arith.select %125, %124, %120 : vector<1x9x128xi1>, vector<1x9x128xf32>
    %c6_i32 = arith.constant 6 : i32
    %127 = vector.broadcast %c6_i32 : i32 to vector<1x9x128xi32>
    %128 = arith.select %125, %127, %122 : vector<1x9x128xi1>, vector<1x9x128xi32>
    %129 = vector.extract_strided_slice %9 {offsets = [0, 7, 0, 0], sizes = [1, 1, 9, 128], strides = [1, 1, 1, 1]} : vector<1x9x9x128xf32> to vector<1x1x9x128xf32>
    %130 = vector.shape_cast %129 : vector<1x1x9x128xf32> to vector<1x9x128xf32>
    %131 = arith.cmpf ogt, %130, %126 : vector<1x9x128xf32>
    %132 = arith.select %131, %130, %126 : vector<1x9x128xi1>, vector<1x9x128xf32>
    %c7_i32 = arith.constant 7 : i32
    %133 = vector.broadcast %c7_i32 : i32 to vector<1x9x128xi32>
    %134 = arith.select %131, %133, %128 : vector<1x9x128xi1>, vector<1x9x128xi32>
    %135 = vector.extract_strided_slice %9 {offsets = [0, 8, 0, 0], sizes = [1, 1, 9, 128], strides = [1, 1, 1, 1]} : vector<1x9x9x128xf32> to vector<1x1x9x128xf32>
    %136 = vector.shape_cast %135 : vector<1x1x9x128xf32> to vector<1x9x128xf32>
    %137 = arith.cmpf ogt, %136, %132 : vector<1x9x128xf32>
    %c8_i32_28 = arith.constant 8 : i32
    %138 = vector.broadcast %c8_i32_28 : i32 to vector<1x9x128xi32>
    %139 = arith.select %137, %138, %134 : vector<1x9x128xi1>, vector<1x9x128xi32>
    %140 = vector.extract_strided_slice %42 {offsets = [0, 0, 0, 0], sizes = [1, 1, 9, 128], strides = [1, 1, 1, 1]} : vector<1x9x9x128xf32> to vector<1x1x9x128xf32>
    %141 = vector.shape_cast %140 : vector<1x1x9x128xf32> to vector<1x9x128xf32>
    %c0_i32_29 = arith.constant 0 : i32
    %142 = vector.broadcast %c0_i32_29 : i32 to vector<1x9x128xi32>
    %143 = vector.extract_strided_slice %42 {offsets = [0, 1, 0, 0], sizes = [1, 1, 9, 128], strides = [1, 1, 1, 1]} : vector<1x9x9x128xf32> to vector<1x1x9x128xf32>
    %144 = vector.shape_cast %143 : vector<1x1x9x128xf32> to vector<1x9x128xf32>
    %145 = arith.cmpf ogt, %144, %141 : vector<1x9x128xf32>
    %146 = arith.select %145, %144, %141 : vector<1x9x128xi1>, vector<1x9x128xf32>
    %c1_i32_30 = arith.constant 1 : i32
    %147 = vector.broadcast %c1_i32_30 : i32 to vector<1x9x128xi32>
    %148 = arith.select %145, %147, %142 : vector<1x9x128xi1>, vector<1x9x128xi32>
    %149 = vector.extract_strided_slice %42 {offsets = [0, 2, 0, 0], sizes = [1, 1, 9, 128], strides = [1, 1, 1, 1]} : vector<1x9x9x128xf32> to vector<1x1x9x128xf32>
    %150 = vector.shape_cast %149 : vector<1x1x9x128xf32> to vector<1x9x128xf32>
    %151 = arith.cmpf ogt, %150, %146 : vector<1x9x128xf32>
    %152 = arith.select %151, %150, %146 : vector<1x9x128xi1>, vector<1x9x128xf32>
    %c2_i32_31 = arith.constant 2 : i32
    %153 = vector.broadcast %c2_i32_31 : i32 to vector<1x9x128xi32>
    %154 = arith.select %151, %153, %148 : vector<1x9x128xi1>, vector<1x9x128xi32>
    %155 = vector.extract_strided_slice %42 {offsets = [0, 3, 0, 0], sizes = [1, 1, 9, 128], strides = [1, 1, 1, 1]} : vector<1x9x9x128xf32> to vector<1x1x9x128xf32>
    %156 = vector.shape_cast %155 : vector<1x1x9x128xf32> to vector<1x9x128xf32>
    %157 = arith.cmpf ogt, %156, %152 : vector<1x9x128xf32>
    %158 = arith.select %157, %156, %152 : vector<1x9x128xi1>, vector<1x9x128xf32>
    %c3_i32_32 = arith.constant 3 : i32
    %159 = vector.broadcast %c3_i32_32 : i32 to vector<1x9x128xi32>
    %160 = arith.select %157, %159, %154 : vector<1x9x128xi1>, vector<1x9x128xi32>
    %161 = vector.extract_strided_slice %42 {offsets = [0, 4, 0, 0], sizes = [1, 1, 9, 128], strides = [1, 1, 1, 1]} : vector<1x9x9x128xf32> to vector<1x1x9x128xf32>
    %162 = vector.shape_cast %161 : vector<1x1x9x128xf32> to vector<1x9x128xf32>
    %163 = arith.cmpf ogt, %162, %158 : vector<1x9x128xf32>
    %164 = arith.select %163, %162, %158 : vector<1x9x128xi1>, vector<1x9x128xf32>
    %c4_i32_33 = arith.constant 4 : i32
    %165 = vector.broadcast %c4_i32_33 : i32 to vector<1x9x128xi32>
    %166 = arith.select %163, %165, %160 : vector<1x9x128xi1>, vector<1x9x128xi32>
    %167 = vector.extract_strided_slice %42 {offsets = [0, 5, 0, 0], sizes = [1, 1, 9, 128], strides = [1, 1, 1, 1]} : vector<1x9x9x128xf32> to vector<1x1x9x128xf32>
    %168 = vector.shape_cast %167 : vector<1x1x9x128xf32> to vector<1x9x128xf32>
    %169 = arith.cmpf ogt, %168, %164 : vector<1x9x128xf32>
    %170 = arith.select %169, %168, %164 : vector<1x9x128xi1>, vector<1x9x128xf32>
    %c5_i32_34 = arith.constant 5 : i32
    %171 = vector.broadcast %c5_i32_34 : i32 to vector<1x9x128xi32>
    %172 = arith.select %169, %171, %166 : vector<1x9x128xi1>, vector<1x9x128xi32>
    %173 = vector.extract_strided_slice %42 {offsets = [0, 6, 0, 0], sizes = [1, 1, 9, 128], strides = [1, 1, 1, 1]} : vector<1x9x9x128xf32> to vector<1x1x9x128xf32>
    %174 = vector.shape_cast %173 : vector<1x1x9x128xf32> to vector<1x9x128xf32>
    %175 = arith.cmpf ogt, %174, %170 : vector<1x9x128xf32>
    %176 = arith.select %175, %174, %170 : vector<1x9x128xi1>, vector<1x9x128xf32>
    %c6_i32_35 = arith.constant 6 : i32
    %177 = vector.broadcast %c6_i32_35 : i32 to vector<1x9x128xi32>
    %178 = arith.select %175, %177, %172 : vector<1x9x128xi1>, vector<1x9x128xi32>
    %179 = vector.extract_strided_slice %42 {offsets = [0, 7, 0, 0], sizes = [1, 1, 9, 128], strides = [1, 1, 1, 1]} : vector<1x9x9x128xf32> to vector<1x1x9x128xf32>
    %180 = vector.shape_cast %179 : vector<1x1x9x128xf32> to vector<1x9x128xf32>
    %181 = arith.cmpf ogt, %180, %176 : vector<1x9x128xf32>
    %182 = arith.select %181, %180, %176 : vector<1x9x128xi1>, vector<1x9x128xf32>
    %c7_i32_36 = arith.constant 7 : i32
    %183 = vector.broadcast %c7_i32_36 : i32 to vector<1x9x128xi32>
    %184 = arith.select %181, %183, %178 : vector<1x9x128xi1>, vector<1x9x128xi32>
    %185 = vector.extract_strided_slice %42 {offsets = [0, 8, 0, 0], sizes = [1, 1, 9, 128], strides = [1, 1, 1, 1]} : vector<1x9x9x128xf32> to vector<1x1x9x128xf32>
    %186 = vector.shape_cast %185 : vector<1x1x9x128xf32> to vector<1x9x128xf32>
    %187 = arith.cmpf ogt, %186, %182 : vector<1x9x128xf32>
    %c8_i32_37 = arith.constant 8 : i32
    %188 = vector.broadcast %c8_i32_37 : i32 to vector<1x9x128xi32>
    %189 = arith.select %187, %188, %184 : vector<1x9x128xi1>, vector<1x9x128xi32>
    %190 = vector.shape_cast %4 : vector<1x1x9x128xf32> to vector<1x9x128xf32>
    %191 = vector.extract_strided_slice %189 {offsets = [0, 0, 0], sizes = [1, 8, 128], strides = [1, 1, 1]} : vector<1x9x128xi32> to vector<1x8x128xi32>
    %192 = vector.extract_strided_slice %139 {offsets = [0, 0, 0], sizes = [1, 8, 128], strides = [1, 1, 1]} : vector<1x9x128xi32> to vector<1x8x128xi32>
    %193 = arith.cmpi eq, %191, %192 : vector<1x8x128xi32>
    %194 = vector.extract_strided_slice %190 {offsets = [0, 0, 0], sizes = [1, 8, 128], strides = [1, 1, 1]} : vector<1x9x128xf32> to vector<1x8x128xf32>
    %cst_38 = arith.constant 0.000000e+00 : f32
    %195 = vector.broadcast %cst_38 : f32 to vector<1x8x128xf32>
    %196 = arith.cmpf ogt, %194, %195 : vector<1x8x128xf32>
    %197 = arith.andi %193, %196 : vector<1x8x128xi1>
    %198 = vector.extract_strided_slice %84 {offsets = [0, 0, 0, 0], sizes = [1, 1, 1, 128], strides = [1, 1, 1, 1]} : vector<1x8x1x128xi32> to vector<1x1x1x128xi32>
    %199 = vector.shape_cast %198 : vector<1x1x1x128xi32> to vector<128xi32>
    %c0_39 = arith.constant 0 : index
    %c0_40 = arith.constant 0 : index
    %c0_41 = arith.constant 0 : index
    %200 = vector.load %arg6[%c0_39, %c0_40, %c0_41] : memref<1x8x128xi32, #tpu.memory_space<vmem>>, vector<1x1x128xi32>
    %201 = vector.shape_cast %200 : vector<1x1x128xi32> to vector<128xi32>
    %202 = vector.shape_cast %199 : vector<128xi32> to vector<1x1x128xi32>
    tpu.vector_store %arg6[%c0_39, %c0_40, %c0_41], %202 {strides = array<i32>} : memref<1x8x128xi32, #tpu.memory_space<vmem>>, vector<1x1x128xi32>,
    %203 = vector.extract_strided_slice %84 {offsets = [0, 1, 0, 0], sizes = [1, 1, 1, 128], strides = [1, 1, 1, 1]} : vector<1x8x1x128xi32> to vector<1x1x1x128xi32>
    %204 = vector.shape_cast %203 : vector<1x1x1x128xi32> to vector<128xi32>
    %c0_42 = arith.constant 0 : index
    %c1 = arith.constant 1 : index
    %c0_43 = arith.constant 0 : index
    %205 = vector.load %arg6[%c0_42, %c1, %c0_43] : memref<1x8x128xi32, #tpu.memory_space<vmem>>, vector<1x1x128xi32>
    %206 = vector.shape_cast %205 : vector<1x1x128xi32> to vector<128xi32>
    %207 = vector.shape_cast %204 : vector<128xi32> to vector<1x1x128xi32>
    tpu.vector_store %arg6[%c0_42, %c1, %c0_43], %207 {strides = array<i32>} : memref<1x8x128xi32, #tpu.memory_space<vmem>>, vector<1x1x128xi32>,
    %208 = vector.extract_strided_slice %84 {offsets = [0, 2, 0, 0], sizes = [1, 1, 1, 128], strides = [1, 1, 1, 1]} : vector<1x8x1x128xi32> to vector<1x1x1x128xi32>
    %209 = vector.shape_cast %208 : vector<1x1x1x128xi32> to vector<128xi32>
    %c0_44 = arith.constant 0 : index
    %c2 = arith.constant 2 : index
    %c0_45 = arith.constant 0 : index
    %210 = vector.load %arg6[%c0_44, %c2, %c0_45] : memref<1x8x128xi32, #tpu.memory_space<vmem>>, vector<1x1x128xi32>
    %211 = vector.shape_cast %210 : vector<1x1x128xi32> to vector<128xi32>
    %212 = vector.shape_cast %209 : vector<128xi32> to vector<1x1x128xi32>
    tpu.vector_store %arg6[%c0_44, %c2, %c0_45], %212 {strides = array<i32>} : memref<1x8x128xi32, #tpu.memory_space<vmem>>, vector<1x1x128xi32>,
    %213 = vector.extract_strided_slice %84 {offsets = [0, 3, 0, 0], sizes = [1, 1, 1, 128], strides = [1, 1, 1, 1]} : vector<1x8x1x128xi32> to vector<1x1x1x128xi32>
    %214 = vector.shape_cast %213 : vector<1x1x1x128xi32> to vector<128xi32>
    %c0_46 = arith.constant 0 : index
    %c3 = arith.constant 3 : index
    %c0_47 = arith.constant 0 : index
    %215 = vector.load %arg6[%c0_46, %c3, %c0_47] : memref<1x8x128xi32, #tpu.memory_space<vmem>>, vector<1x1x128xi32>
    %216 = vector.shape_cast %215 : vector<1x1x128xi32> to vector<128xi32>
    %217 = vector.shape_cast %214 : vector<128xi32> to vector<1x1x128xi32>
    tpu.vector_store %arg6[%c0_46, %c3, %c0_47], %217 {strides = array<i32>} : memref<1x8x128xi32, #tpu.memory_space<vmem>>, vector<1x1x128xi32>,
    %218 = vector.extract_strided_slice %84 {offsets = [0, 4, 0, 0], sizes = [1, 1, 1, 128], strides = [1, 1, 1, 1]} : vector<1x8x1x128xi32> to vector<1x1x1x128xi32>
    %219 = vector.shape_cast %218 : vector<1x1x1x128xi32> to vector<128xi32>
    %c0_48 = arith.constant 0 : index
    %c4 = arith.constant 4 : index
    %c0_49 = arith.constant 0 : index
    %220 = vector.load %arg6[%c0_48, %c4, %c0_49] : memref<1x8x128xi32, #tpu.memory_space<vmem>>, vector<1x1x128xi32>
    %221 = vector.shape_cast %220 : vector<1x1x128xi32> to vector<128xi32>
    %222 = vector.shape_cast %219 : vector<128xi32> to vector<1x1x128xi32>
    tpu.vector_store %arg6[%c0_48, %c4, %c0_49], %222 {strides = array<i32>} : memref<1x8x128xi32, #tpu.memory_space<vmem>>, vector<1x1x128xi32>,
    %223 = vector.extract_strided_slice %84 {offsets = [0, 5, 0, 0], sizes = [1, 1, 1, 128], strides = [1, 1, 1, 1]} : vector<1x8x1x128xi32> to vector<1x1x1x128xi32>
    %224 = vector.shape_cast %223 : vector<1x1x1x128xi32> to vector<128xi32>
    %c0_50 = arith.constant 0 : index
    %c5 = arith.constant 5 : index
    %c0_51 = arith.constant 0 : index
    %225 = vector.load %arg6[%c0_50, %c5, %c0_51] : memref<1x8x128xi32, #tpu.memory_space<vmem>>, vector<1x1x128xi32>
    %226 = vector.shape_cast %225 : vector<1x1x128xi32> to vector<128xi32>
    %227 = vector.shape_cast %224 : vector<128xi32> to vector<1x1x128xi32>
    tpu.vector_store %arg6[%c0_50, %c5, %c0_51], %227 {strides = array<i32>} : memref<1x8x128xi32, #tpu.memory_space<vmem>>, vector<1x1x128xi32>,
    %228 = vector.extract_strided_slice %84 {offsets = [0, 6, 0, 0], sizes = [1, 1, 1, 128], strides = [1, 1, 1, 1]} : vector<1x8x1x128xi32> to vector<1x1x1x128xi32>
    %229 = vector.shape_cast %228 : vector<1x1x1x128xi32> to vector<128xi32>
    %c0_52 = arith.constant 0 : index
    %c6 = arith.constant 6 : index
    %c0_53 = arith.constant 0 : index
    %230 = vector.load %arg6[%c0_52, %c6, %c0_53] : memref<1x8x128xi32, #tpu.memory_space<vmem>>, vector<1x1x128xi32>
    %231 = vector.shape_cast %230 : vector<1x1x128xi32> to vector<128xi32>
    %232 = vector.shape_cast %229 : vector<128xi32> to vector<1x1x128xi32>
    tpu.vector_store %arg6[%c0_52, %c6, %c0_53], %232 {strides = array<i32>} : memref<1x8x128xi32, #tpu.memory_space<vmem>>, vector<1x1x128xi32>,
    %233 = vector.extract_strided_slice %84 {offsets = [0, 7, 0, 0], sizes = [1, 1, 1, 128], strides = [1, 1, 1, 1]} : vector<1x8x1x128xi32> to vector<1x1x1x128xi32>
    %234 = vector.shape_cast %233 : vector<1x1x1x128xi32> to vector<128xi32>
    %c0_54 = arith.constant 0 : index
    %c7 = arith.constant 7 : index
    %c0_55 = arith.constant 0 : index
    %235 = vector.load %arg6[%c0_54, %c7, %c0_55] : memref<1x8x128xi32, #tpu.memory_space<vmem>>, vector<1x1x128xi32>
    %236 = vector.shape_cast %235 : vector<1x1x128xi32> to vector<128xi32>
    %237 = vector.shape_cast %234 : vector<128xi32> to vector<1x1x128xi32>
    tpu.vector_store %arg6[%c0_54, %c7, %c0_55], %237 {strides = array<i32>} : memref<1x8x128xi32, #tpu.memory_space<vmem>>, vector<1x1x128xi32>,
    %cst_56 = arith.constant dense<0.000000e+00> : vector<9x128xf32>
    %238 = vector.multi_reduction <add>, %10, %cst_56 [0, 1] : vector<1x8x9x128xf32> to vector<9x128xf32>
    %239 = arith.mulf %10, %28 : vector<1x8x9x128xf32>
    %cst_57 = arith.constant dense<0.000000e+00> : vector<9x128xf32>
    %240 = vector.multi_reduction <add>, %239, %cst_57 [0, 1] : vector<1x8x9x128xf32> to vector<9x128xf32>
    %cst_58 = arith.constant dense<0.000000e+00> : vector<128xf32>
    %241 = vector.multi_reduction <add>, %240, %cst_58 [0] : vector<9x128xf32> to vector<128xf32>
    %242 = arith.mulf %9, %45 : vector<1x9x9x128xf32>
    %cst_59 = arith.constant dense<0.000000e+00> : vector<9x128xf32>
    %243 = vector.multi_reduction <add>, %242, %cst_59 [0, 1] : vector<1x9x9x128xf32> to vector<9x128xf32>
    %244 = vector.extract_strided_slice %243 {offsets = [0, 0], sizes = [8, 128], strides = [1, 1]} : vector<9x128xf32> to vector<8x128xf32>
    %cst_60 = arith.constant dense<0.000000e+00> : vector<128xf32>
    %245 = vector.multi_reduction <add>, %244, %cst_60 [0] : vector<8x128xf32> to vector<128xf32>
    %246 = arith.mulf %10, %62 : vector<1x8x9x128xf32>
    %cst_61 = arith.constant dense<0.000000e+00> : vector<9x128xf32>
    %247 = vector.multi_reduction <add>, %246, %cst_61 [0, 1] : vector<1x8x9x128xf32> to vector<9x128xf32>
    %cst_62 = arith.constant dense<0.000000e+00> : vector<128xf32>
    %248 = vector.multi_reduction <add>, %247, %cst_62 [0] : vector<9x128xf32> to vector<128xf32>
    %249 = arith.mulf %10, %64 : vector<1x8x9x128xf32>
    %cst_63 = arith.constant dense<0.000000e+00> : vector<9x128xf32>
    %250 = vector.multi_reduction <add>, %249, %cst_63 [0, 1] : vector<1x8x9x128xf32> to vector<9x128xf32>
    %251 = vector.extract_strided_slice %250 {offsets = [0, 0], sizes = [8, 128], strides = [1, 1]} : vector<9x128xf32> to vector<8x128xf32>
    %cst_64 = arith.constant dense<0.000000e+00> : vector<128xf32>
    %252 = vector.multi_reduction <add>, %251, %cst_64 [0] : vector<8x128xf32> to vector<128xf32>
    %cst_65 = arith.constant dense<0.000000e+00> : vector<9x128xf32>
    %253 = vector.multi_reduction <add>, %2, %cst_65 [0, 1] : vector<1x9x9x128xf32> to vector<9x128xf32>
    %cst_66 = arith.constant dense<0.000000e+00> : vector<128xf32>
    %254 = vector.multi_reduction <add>, %253, %cst_66 [0] : vector<9x128xf32> to vector<128xf32>
    %cst_67 = arith.constant dense<0.000000e+00> : vector<128xf32>
    %255 = vector.multi_reduction <add>, %238, %cst_67 [0] : vector<9x128xf32> to vector<128xf32>
    %cst_68 = arith.constant dense<0.000000e+00> : vector<9x128xf32>
    %256 = vector.multi_reduction <add>, %9, %cst_68 [0, 1] : vector<1x9x9x128xf32> to vector<9x128xf32>
    %257 = vector.extract_strided_slice %256 {offsets = [0, 0], sizes = [8, 128], strides = [1, 1]} : vector<9x128xf32> to vector<8x128xf32>
    %cst_69 = arith.constant dense<0.000000e+00> : vector<128xf32>
    %258 = vector.multi_reduction <add>, %257, %cst_69 [0] : vector<8x128xf32> to vector<128xf32>
    %259 = vector.extract_strided_slice %238 {offsets = [0, 0], sizes = [8, 128], strides = [1, 1]} : vector<9x128xf32> to vector<8x128xf32>
    %cst_70 = arith.constant dense<0.000000e+00> : vector<128xf32>
    %260 = vector.multi_reduction <add>, %259, %cst_70 [0] : vector<8x128xf32> to vector<128xf32>
    %261 = arith.extui %89 : vector<1x8x1x128xi1> to vector<1x8x1x128xi32>
    %262 = arith.sitofp %261 : vector<1x8x1x128xi32> to vector<1x8x1x128xf32>
    %cst_71 = arith.constant dense<0.000000e+00> : vector<1x128xf32>
    %263 = vector.multi_reduction <add>, %262, %cst_71 [0, 1] : vector<1x8x1x128xf32> to vector<1x128xf32>
    %cst_72 = arith.constant dense<0.000000e+00> : vector<128xf32>
    %264 = vector.multi_reduction <add>, %263, %cst_72 [0] : vector<1x128xf32> to vector<128xf32>
    %265 = vector.extract_strided_slice %3 {offsets = [0, 0, 0, 0], sizes = [1, 8, 1, 128], strides = [1, 1, 1, 1]} : vector<1x9x1x128xf32> to vector<1x8x1x128xf32>
    %cst_73 = arith.constant dense<0.000000e+00> : vector<1x128xf32>
    %266 = vector.multi_reduction <add>, %265, %cst_73 [0, 1] : vector<1x8x1x128xf32> to vector<1x128xf32>
    %cst_74 = arith.constant dense<0.000000e+00> : vector<128xf32>
    %267 = vector.multi_reduction <add>, %266, %cst_74 [0] : vector<1x128xf32> to vector<128xf32>
    %268 = arith.extui %197 : vector<1x8x128xi1> to vector<1x8x128xi32>
    %269 = arith.sitofp %268 : vector<1x8x128xi32> to vector<1x8x128xf32>
    %cst_75 = arith.constant dense<0.000000e+00> : vector<8x128xf32>
    %270 = vector.multi_reduction <add>, %269, %cst_75 [0] : vector<1x8x128xf32> to vector<8x128xf32>
    %cst_76 = arith.constant dense<0.000000e+00> : vector<128xf32>
    %271 = vector.multi_reduction <add>, %270, %cst_76 [0] : vector<8x128xf32> to vector<128xf32>
    %272 = vector.extract_strided_slice %190 {offsets = [0, 0, 0], sizes = [1, 8, 128], strides = [1, 1, 1]} : vector<1x9x128xf32> to vector<1x8x128xf32>
    %cst_77 = arith.constant dense<0.000000e+00> : vector<8x128xf32>
    %273 = vector.multi_reduction <add>, %272, %cst_77 [0] : vector<1x8x128xf32> to vector<8x128xf32>
    %cst_78 = arith.constant dense<0.000000e+00> : vector<128xf32>
    %274 = vector.multi_reduction <add>, %273, %cst_78 [0] : vector<8x128xf32> to vector<128xf32>
    %c0_79 = arith.constant 0 : index
    %c0_80 = arith.constant 0 : index
    %c0_81 = arith.constant 0 : index
    %275 = vector.load %arg5[%c0_79, %c0_80, %c0_81] : memref<1x12x128xf32, #tpu.memory_space<vmem>>, vector<1x1x128xf32>
    %276 = vector.shape_cast %275 : vector<1x1x128xf32> to vector<128xf32>
    %277 = vector.shape_cast %241 : vector<128xf32> to vector<1x1x128xf32>
    tpu.vector_store %arg5[%c0_79, %c0_80, %c0_81], %277 {strides = array<i32>} : memref<1x12x128xf32, #tpu.memory_space<vmem>>, vector<1x1x128xf32>,
    %c0_82 = arith.constant 0 : index
    %c1_83 = arith.constant 1 : index
    %c0_84 = arith.constant 0 : index
    %278 = vector.load %arg5[%c0_82, %c1_83, %c0_84] : memref<1x12x128xf32, #tpu.memory_space<vmem>>, vector<1x1x128xf32>
    %279 = vector.shape_cast %278 : vector<1x1x128xf32> to vector<128xf32>
    %280 = vector.shape_cast %245 : vector<128xf32> to vector<1x1x128xf32>
    tpu.vector_store %arg5[%c0_82, %c1_83, %c0_84], %280 {strides = array<i32>} : memref<1x12x128xf32, #tpu.memory_space<vmem>>, vector<1x1x128xf32>,
    %c0_85 = arith.constant 0 : index
    %c2_86 = arith.constant 2 : index
    %c0_87 = arith.constant 0 : index
    %281 = vector.load %arg5[%c0_85, %c2_86, %c0_87] : memref<1x12x128xf32, #tpu.memory_space<vmem>>, vector<1x1x128xf32>
    %282 = vector.shape_cast %281 : vector<1x1x128xf32> to vector<128xf32>
    %283 = vector.shape_cast %248 : vector<128xf32> to vector<1x1x128xf32>
    tpu.vector_store %arg5[%c0_85, %c2_86, %c0_87], %283 {strides = array<i32>} : memref<1x12x128xf32, #tpu.memory_space<vmem>>, vector<1x1x128xf32>,
    %c0_88 = arith.constant 0 : index
    %c3_89 = arith.constant 3 : index
    %c0_90 = arith.constant 0 : index
    %284 = vector.load %arg5[%c0_88, %c3_89, %c0_90] : memref<1x12x128xf32, #tpu.memory_space<vmem>>, vector<1x1x128xf32>
    %285 = vector.shape_cast %284 : vector<1x1x128xf32> to vector<128xf32>
    %286 = vector.shape_cast %252 : vector<128xf32> to vector<1x1x128xf32>
    tpu.vector_store %arg5[%c0_88, %c3_89, %c0_90], %286 {strides = array<i32>} : memref<1x12x128xf32, #tpu.memory_space<vmem>>, vector<1x1x128xf32>,
    %c0_91 = arith.constant 0 : index
    %c4_92 = arith.constant 4 : index
    %c0_93 = arith.constant 0 : index
    %287 = vector.load %arg5[%c0_91, %c4_92, %c0_93] : memref<1x12x128xf32, #tpu.memory_space<vmem>>, vector<1x1x128xf32>
    %288 = vector.shape_cast %287 : vector<1x1x128xf32> to vector<128xf32>
    %289 = vector.shape_cast %254 : vector<128xf32> to vector<1x1x128xf32>
    tpu.vector_store %arg5[%c0_91, %c4_92, %c0_93], %289 {strides = array<i32>} : memref<1x12x128xf32, #tpu.memory_space<vmem>>, vector<1x1x128xf32>,
    %c0_94 = arith.constant 0 : index
    %c5_95 = arith.constant 5 : index
    %c0_96 = arith.constant 0 : index
    %290 = vector.load %arg5[%c0_94, %c5_95, %c0_96] : memref<1x12x128xf32, #tpu.memory_space<vmem>>, vector<1x1x128xf32>
    %291 = vector.shape_cast %290 : vector<1x1x128xf32> to vector<128xf32>
    %292 = vector.shape_cast %255 : vector<128xf32> to vector<1x1x128xf32>
    tpu.vector_store %arg5[%c0_94, %c5_95, %c0_96], %292 {strides = array<i32>} : memref<1x12x128xf32, #tpu.memory_space<vmem>>, vector<1x1x128xf32>,
    %c0_97 = arith.constant 0 : index
    %c6_98 = arith.constant 6 : index
    %c0_99 = arith.constant 0 : index
    %293 = vector.load %arg5[%c0_97, %c6_98, %c0_99] : memref<1x12x128xf32, #tpu.memory_space<vmem>>, vector<1x1x128xf32>
    %294 = vector.shape_cast %293 : vector<1x1x128xf32> to vector<128xf32>
    %295 = vector.shape_cast %258 : vector<128xf32> to vector<1x1x128xf32>
    tpu.vector_store %arg5[%c0_97, %c6_98, %c0_99], %295 {strides = array<i32>} : memref<1x12x128xf32, #tpu.memory_space<vmem>>, vector<1x1x128xf32>,
    %c0_100 = arith.constant 0 : index
    %c7_101 = arith.constant 7 : index
    %c0_102 = arith.constant 0 : index
    %296 = vector.load %arg5[%c0_100, %c7_101, %c0_102] : memref<1x12x128xf32, #tpu.memory_space<vmem>>, vector<1x1x128xf32>
    %297 = vector.shape_cast %296 : vector<1x1x128xf32> to vector<128xf32>
    %298 = vector.shape_cast %260 : vector<128xf32> to vector<1x1x128xf32>
    tpu.vector_store %arg5[%c0_100, %c7_101, %c0_102], %298 {strides = array<i32>} : memref<1x12x128xf32, #tpu.memory_space<vmem>>, vector<1x1x128xf32>,
    %c0_103 = arith.constant 0 : index
    %c8 = arith.constant 8 : index
    %c0_104 = arith.constant 0 : index
    %299 = vector.load %arg5[%c0_103, %c8, %c0_104] : memref<1x12x128xf32, #tpu.memory_space<vmem>>, vector<1x1x128xf32>
    %300 = vector.shape_cast %299 : vector<1x1x128xf32> to vector<128xf32>
    %301 = vector.shape_cast %264 : vector<128xf32> to vector<1x1x128xf32>
    tpu.vector_store %arg5[%c0_103, %c8, %c0_104], %301 {strides = array<i32>} : memref<1x12x128xf32, #tpu.memory_space<vmem>>, vector<1x1x128xf32>,
    %c0_105 = arith.constant 0 : index
    %c9 = arith.constant 9 : index
    %c0_106 = arith.constant 0 : index
    %302 = vector.load %arg5[%c0_105, %c9, %c0_106] : memref<1x12x128xf32, #tpu.memory_space<vmem>>, vector<1x1x128xf32>
    %303 = vector.shape_cast %302 : vector<1x1x128xf32> to vector<128xf32>
    %304 = vector.shape_cast %267 : vector<128xf32> to vector<1x1x128xf32>
    tpu.vector_store %arg5[%c0_105, %c9, %c0_106], %304 {strides = array<i32>} : memref<1x12x128xf32, #tpu.memory_space<vmem>>, vector<1x1x128xf32>,
    %c0_107 = arith.constant 0 : index
    %c10 = arith.constant 10 : index
    %c0_108 = arith.constant 0 : index
    %305 = vector.load %arg5[%c0_107, %c10, %c0_108] : memref<1x12x128xf32, #tpu.memory_space<vmem>>, vector<1x1x128xf32>
    %306 = vector.shape_cast %305 : vector<1x1x128xf32> to vector<128xf32>
    %307 = vector.shape_cast %271 : vector<128xf32> to vector<1x1x128xf32>
    tpu.vector_store %arg5[%c0_107, %c10, %c0_108], %307 {strides = array<i32>} : memref<1x12x128xf32, #tpu.memory_space<vmem>>, vector<1x1x128xf32>,
    %c0_109 = arith.constant 0 : index
    %c11 = arith.constant 11 : index
    %c0_110 = arith.constant 0 : index
    %308 = vector.load %arg5[%c0_109, %c11, %c0_110] : memref<1x12x128xf32, #tpu.memory_space<vmem>>, vector<1x1x128xf32>
    %309 = vector.shape_cast %308 : vector<1x1x128xf32> to vector<128xf32>
    %310 = vector.shape_cast %274 : vector<128xf32> to vector<1x1x128xf32>
    tpu.vector_store %arg5[%c0_109, %c11, %c0_110], %310 {strides = array<i32>} : memref<1x12x128xf32, #tpu.memory_space<vmem>>, vector<1x1x128xf32>,
    return
  }
  func.func @transform_0(%arg0: i32) -> (i32, i32, i32, i32) {
    %c0_i32 = arith.constant 0 : i32
    %c0_i32_0 = arith.constant 0 : i32
    %c0_i32_1 = arith.constant 0 : i32
    %c0_i32_2 = arith.constant 0 : i32
    return %c0_i32, %c0_i32_0, %c0_i32_1, %arg0 : i32, i32, i32, i32
  }
  func.func @transform_1(%arg0: i32) -> (i32, i32, i32, i32) {
    %c0_i32 = arith.constant 0 : i32
    %c0_i32_0 = arith.constant 0 : i32
    %c0_i32_1 = arith.constant 0 : i32
    %c0_i32_2 = arith.constant 0 : i32
    return %c0_i32, %c0_i32_0, %c0_i32_1, %arg0 : i32, i32, i32, i32
  }
  func.func @transform_2(%arg0: i32) -> (i32, i32, i32, i32) {
    %c0_i32 = arith.constant 0 : i32
    %c0_i32_0 = arith.constant 0 : i32
    %c0_i32_1 = arith.constant 0 : i32
    %c0_i32_2 = arith.constant 0 : i32
    return %c0_i32, %c0_i32_0, %c0_i32_1, %arg0 : i32, i32, i32, i32
  }
  func.func @transform_3(%arg0: i32) -> (i32, i32, i32, i32) {
    %c0_i32 = arith.constant 0 : i32
    %c0_i32_0 = arith.constant 0 : i32
    %c0_i32_1 = arith.constant 0 : i32
    %c0_i32_2 = arith.constant 0 : i32
    return %c0_i32, %c0_i32_0, %c0_i32_1, %arg0 : i32, i32, i32, i32
  }
  func.func @transform_4(%arg0: i32) -> (i32, i32, i32) {
    %c0_i32 = arith.constant 0 : i32
    %c0_i32_0 = arith.constant 0 : i32
    %c0_i32_1 = arith.constant 0 : i32
    return %arg0, %c0_i32, %c0_i32_0 : i32, i32, i32
  }
  func.func @transform_5(%arg0: i32) -> (i32, i32, i32) {
    %c0_i32 = arith.constant 0 : i32
    %c0_i32_0 = arith.constant 0 : i32
    %c0_i32_1 = arith.constant 0 : i32
    return %c0_i32, %c0_i32_0, %arg0 : i32, i32, i32
  }
}

</mosaic_0001>

<bundles_post_ra>
// kernel: sst_loss_forward.1
= control target key start
LH: loop header
LB: loop body
LE: loop exit
PB: predicated region body
PF: predicated region fallthrough
CT: control target
= control target key end

     0   :  { %v111_v0 = vlaneseq  ;;  %vm209_vm0 = vcmask 1040384   ;;  %s3596_s1 = inlined_call_operand.vmem [shape: s8[1,9,9,128], index: 1, kind: input, shape index: {}]   ;;  %s3597_s2 = inlined_call_operand.vmem [shape: f32[1,9,1,128], index: 2, kind: input, shape index: {}]   ;;  %s3598_s3 = inlined_call_operand.vmem [shape: f32[1,1,9,128], index: 3, kind: input, shape index: {}]   ;;  %s3599_s0 = inlined_call_operand.vmem [shape: f32[1,9,9,128], index: 0, kind: input, shape index: {}]   ;;  %s3600_s5 = inlined_call_operand.vmem [shape: s32[1,8,128], index: 5, kind: output, shape index: {1}]   ;;  %s3601_s4 = inlined_call_operand.vmem [shape: f32[1,12,128], index: 4, kind: output, shape index: {0}]  }
   0x1   :  { %v37_v1 = vld [vmem:[%s3596_s1] ss:$4 sps:$2 sm:$0xf]   ;;  %v38_v2 = vld [vmem:[%s3596_s1 + $0x2] sm:$0x1] }
   0x2   :  { %v1637_v3 = vshrl.u32 %v111_v0, 7  ;;  %v40_v4 = vld [vmem:[%s3596_s1 + $0x6] sm:$0x1]  ;;  %v41_v5 = vld [vmem:[%s3596_s1 + $0x8] ss:$4 sps:$2 sm:$0xf]   ;;  %v55_v9 = vunpack.c.0.s8 %v37_v1  ;;  %v56_v12 = vunpack.c.0.s8 %v38_v2  ;;  %v57_v15 = vunpack.c.1.s8 %v37_v1 }
   0x3   :  { %v42_v6 = vld [vmem:[%s3596_s1 + $0xa] sm:$0x1]  ;;  %v44_v7 = vld [vmem:[%s3596_s1 + $0xe] sm:$0x1]  ;;  %v46_v8 = vld [vmem:[%s3596_s1 + $0x12] sm:$0x1]  ;;  %v58_v16 = vunpack.c.0.s8 %v40_v4  ;;  %v59_v19 = vunpack.c.0.s8 %v41_v5  ;;  %v61_v21 = vunpack.c.1.s8 %v41_v5 }
   0x4   :  { %3778 = vst [vmem:[#allocation2_spill] sm:$0xff] %v1637_v3  ;;  %v45_v10 = vld [vmem:[%s3596_s1 + $0x10] ss:$4 sps:$2 sm:$0xf]   ;;  %v48_v11 = vld [vmem:[%s3596_s1 + $0x16] sm:$0x1]  ;;  %v60_v20 = vunpack.c.0.s8 %v42_v6  ;;  %v62_v22 = vunpack.c.0.s8 %v44_v7  ;;  %v64_v25 = vunpack.c.0.s8 %v46_v8  ;;  %v1675_v27 = vcvt.s32.f32 %v55_v9 }
   0x5   :  { %v49_v13 = vld [vmem:[%s3596_s1 + $0x18] ss:$4 sps:$2 sm:$0xf]   ;;  %v50_v14 = vld [vmem:[%s3596_s1 + $0x1a] sm:$0x1]  ;;  %v63_v24 = vunpack.c.0.s8 %v45_v10  ;;  %v65_v26 = vunpack.c.1.s8 %v45_v10  ;;  %v66_v28 = vunpack.c.0.s8 %v48_v11  ;;  %v1677_v31 = vcvt.s32.f32 %v56_v12  ;;  %v100_v56 = vld [vmem:[%s3598_s3] sm:$0xff] }
   0x6   :  { %v52_v17 = vld [vmem:[%s3596_s1 + $0x1e] sm:$0x1]  ;;  %v53_v18 = vld [vmem:[%s3596_s1 + $0x20] sm:$0x3]  ;;  %v54_v23 = vld [vmem:[%s3596_s1 + $0x22] sm:$0x1]  ;;  %v67_v29 = vunpack.c.0.s8 %v49_v13  ;;  %v68_v30 = vunpack.c.0.s8 %v50_v14  ;;  %v69_v32 = vunpack.c.1.s8 %v49_v13  ;;  %v1679_v35 = vcvt.s32.f32 %v57_v15 }
   0x7   :  { %3779 = vst [vmem:[#allocation3_spill] sm:$0xff] %v1675_v27  ;;  %3780 = vst [vmem:[#allocation4_spill] sm:$0xff] %v1677_v31  ;;  %v70_v33 = vunpack.c.0.s8 %v52_v17  ;;  %v71_v34 = vunpack.c.0.s8 %v53_v18  ;;  %v1591_v36 = vld [vmem:[%s3597_s2] ss:$0 sm:$0xff]  ;;  %v1592_v37 = vld [vmem:[%s3597_s2 + $0x1] ss:$0 sm:$0xff]  ;;  %v72_v38 = vunpack.c.0.s8 %v54_v23  ;;  %v1687_v39 = vcvt.s32.f32 %v58_v16 }
   0x8   :  { %3781 = vst [vmem:[#allocation5_spill] sm:$0xff] %v1679_v35  ;;  %v1689_v40 = vcvt.s32.f32 %v59_v19  ;;  %v1691_v41 = vcvt.s32.f32 %v60_v20  ;;  %v1593_v42 = vld [vmem:[%s3597_s2 + $0x2] ss:$0 sm:$0xff]  ;;  %v1594_v43 = vld [vmem:[%s3597_s2 + $0x3] ss:$0 sm:$0xff]  ;;  %v1699_v44 = vcvt.s32.f32 %v61_v21  ;;  %v1701_v45 = vcvt.s32.f32 %v62_v22  ;;  %v21_v0 = vld [vmem:[%s3599_s0 + $0x10] sm:$0xff] }
   0x9   :  { %3782 = vst [vmem:[#allocation6_spill] sm:$0xff] %v1687_v39  ;;  %v1703_v46 = vcvt.s32.f32 %v63_v24  ;;  %v1705_v47 = vcvt.s32.f32 %v64_v25  ;;  %v1595_v48 = vld [vmem:[%s3597_s2 + $0x4] ss:$0 sm:$0xff]  ;;  %v1596_v49 = vld [vmem:[%s3597_s2 + $0x5] ss:$0 sm:$0xff]  ;;  %v1713_v50 = vcvt.s32.f32 %v65_v26  ;;  %v1715_v51 = vcvt.s32.f32 %v66_v28  ;;  %v25_v14 = vld [vmem:[%s3599_s0 + $0x30] sm:$0xff] }
   0xa   :  { %3783 = vst [vmem:[#allocation7_spill] sm:$0xff] %v1689_v40  ;;  %3784 = vst [vmem:[#allocation8_spill] sm:$0xff] %v1691_v41  ;;  %v1597_v52 = vld [vmem:[%s3597_s2 + $0x6] ss:$0 sm:$0xff]  ;;  %v1598_v53 = vld [vmem:[%s3597_s2 + $0x7] ss:$0 sm:$0xff]  ;;  %v1723_v54 = vcvt.s32.f32 %v67_v29  ;;  %v1725_v55 = vcvt.s32.f32 %v68_v30  ;;  %v1733_v58 = vcvt.s32.f32 %v69_v32  ;;  %v1735_v59 = vcvt.s32.f32 %v70_v33 }
   0xb   :  { %3785 = vst [vmem:[#allocation9_spill] sm:$0xff] %v1699_v44  ;;  %3786 = vst [vmem:[#allocation10_spill] sm:$0xff] %v1701_v45  ;;  %v101_v57 = vld [vmem:[%s3598_s3 + $0x8] sm:$0x1]  ;;  %v19_v60 = vld [vmem:[%s3599_s0] sm:$0xff]  ;;  %v1740_v61 = vcvt.s32.f32 %v71_v34  ;;  %v1742_v62 = vcvt.s32.f32 %v72_v38  ;;  %v156_v2 = vmul.f32 %v1591_v36, %v100_v56  ;;  %v158_v5 = vmul.f32 %v1592_v37, %v100_v56 }
   0xc   :  { %3787 = vst [vmem:[#allocation11_spill] sm:$0xff] %v1703_v46  ;;  %3788 = vst [vmem:[#allocation12_spill] sm:$0xff] %v1705_v47  ;;  %v20_v63 = vld [vmem:[%s3599_s0 + $0x8] sm:$0x1]  ;;  %v22_v1 = vld [vmem:[%s3599_s0 + $0x18] sm:$0x1]  ;;  %v157_v4 = vmul.f32 %v1591_v36, %v101_v57  ;;  %v159_v6 = vmul.f32 %v1592_v37, %v101_v57  ;;  %v160_v10 = vmul.f32 %v1593_v42, %v100_v56 }
   0xd   :  { %3789 = vst [vmem:[#allocation13_spill] sm:$0xff] %v1713_v50  ;;  %3790 = vst [vmem:[#allocation14_spill] sm:$0xff] %v1715_v51  ;;  %v23_v7 = vld [vmem:[%s3599_s0 + $0x20] sm:$0xff]  ;;  %v24_v8 = vld [vmem:[%s3599_s0 + $0x28] sm:$0x1]  ;;  %v161_v11 = vmul.f32 %v1593_v42, %v101_v57  ;;  %v162_v12 = vmul.f32 %v1594_v43, %v100_v56  ;;  %v1762_v13 = vmul.f32 %v1594_v43, %v101_v57 }
   0xe   :  { %3791 = vst [vmem:[#allocation15_spill] sm:$0xff] %v1723_v54  ;;  %3792 = vst [vmem:[#allocation16_spill] sm:$0xff] %v1725_v55  ;;  %v1462_v9 = vld [vmem:[%s3597_s2 + $0x8] ss:$0 sm:$0xff]  ;;  %v26_v15 = vld [vmem:[%s3599_s0 + $0x38] sm:$0x1]  ;;  %v1773_v17 = vmul.f32 %v1595_v48, %v100_v56  ;;  %v1775_v18 = vmul.f32 %v1595_v48, %v101_v57  ;;  %v1777_v19 = vmul.f32 %v1596_v49, %v100_v56 }
   0xf   :  { %3793 = vst [vmem:[#allocation17_spill] sm:$0xff] %v1733_v58  ;;  %3794 = vst [vmem:[#allocation18_spill] sm:$0xff] %v1735_v59  ;;  %v27_v16 = vld [vmem:[%s3599_s0 + $0x40] sm:$0xff]  ;;  %v1779_v20 = vmul.f32 %v1596_v49, %v101_v57  ;;  %v28_v21 = vld [vmem:[%s3599_s0 + $0x48] sm:$0x1]  ;;  %v1790_v24 = vmul.f32 %v1597_v52, %v100_v56  ;;  %v1792_v25 = vmul.f32 %v1597_v52, %v101_v57 }
  0x10   :  { %3795 = vst [vmem:[#allocation19_spill] sm:$0xff] %v1740_v61  ;;  %3796 = vst [vmem:[#allocation20_spill] sm:$0xff] %v1742_v62  ;;  %v29_v22 = vld [vmem:[%s3599_s0 + $0x50] sm:$0xff]  ;;  %v30_v23 = vld [vmem:[%s3599_s0 + $0x58] sm:$0x1]  ;;  %v1794_v26 = vmul.f32 %v1598_v53, %v100_v56  ;;  %v1796_v28 = vmul.f32 %v1598_v53, %v101_v57  ;;  %v1807_v33 = vmul.f32 %v1462_v9, %v100_v56 }
  0x11   :  { %3797 = vst [vmem:[#allocation21_spill] sm:$0xff] %v1777_v19  ;;  %3798 = vst [vmem:[#allocation22_spill] sm:$0xff] %v1779_v20  ;;  %v31_v29 = vld [vmem:[%s3599_s0 + $0x60] sm:$0xff]  ;;  %v32_v30 = vld [vmem:[%s3599_s0 + $0x68] sm:$0x1]  ;;  %v173_v34 = vmul.f32 %v1462_v9, %v101_v57  ;;  %v1809_v36 = vmul.f32 %v156_v2, %v19_v60  ;;  %v1811_v37 = vmul.f32 %v157_v4, %v20_v63 }
  0x12   :  { %3799 = vst [vmem:[#allocation23_spill] sm:$0xff] %v1790_v24  ;;  %3800 = vst [vmem:[#allocation24_spill] sm:$0xff] %v1792_v25  ;;  %v33_v32 = vld [vmem:[%s3599_s0 + $0x70] sm:$0xff]  ;;  %v34_v38 = vld [vmem:[%s3599_s0 + $0x78] sm:$0x1]  ;;  %v1822_v48 = vmul.f32 %v158_v5, %v21_v0  ;;  %v1824_v49 = vmul.f32 %v159_v6, %v22_v1  ;;  %v1826_v52 = vmul.f32 %v160_v10, %v23_v7 }
  0x13   :  { %3801 = vst [vmem:[#allocation25_spill] sm:$0xff] %v1794_v26  ;;  %3802 = vst [vmem:[#allocation26_spill] sm:$0xff] %v1796_v28  ;;  %v35_v42 = vld [vmem:[%s3599_s0 + $0x80] sm:$0xff]  ;;  %v36_v43 = vld [vmem:[%s3599_s0 + $0x88] sm:$0x1]  ;;  %v1828_v53 = vmul.f32 %v161_v11, %v24_v8  ;;  %v1830_v56 = vmul.f32 %v162_v12, %v25_v14  ;;  %v1833_v57 = vmul.f32 %v1762_v13, %v26_v15 }
  0x14   :  { %3803 = vst [vmem:[#allocation27_spill] sm:$0xff] %v1807_v33  ;;  %v1836_v60 = vmul.f32 %v1773_v17, %v27_v16  ;;  %v1839_v63 = vmul.f32 %v1775_v18, %v28_v21  ;;  %v1842_v0 = vmul.f32 %v1777_v19, %v29_v22  ;;  %v1845_v1 = vmul.f32 %v1779_v20, %v30_v23 }
  0x15   :  { %v1848_v7 = vmul.f32 %v1790_v24, %v31_v29  ;;  %v1851_v8 = vmul.f32 %v1792_v25, %v32_v30  ;;  %v1854_v9 = vmul.f32 %v1794_v26, %v33_v32  ;;  %v1857_v14 = vmul.f32 %v1796_v28, %v34_v38 }
  0x16   :  { %v1860_v15 = vmul.f32 %v1807_v33, %v35_v42  ;;  %v1862_v16 = vmul.f32 %v173_v34, %v36_v43  ;;  %v1865_v21 = vmul.f32 %v156_v2, %v1675_v27  ;;  %v1868_v22 = vmul.f32 %v157_v4, %v1677_v31 }
  0x17   :  { %v1871_v23 = vmul.f32 %v158_v5, %v1679_v35  ;;  %v1874_v29 = vmul.f32 %v159_v6, %v1687_v39  ;;  %v1877_v30 = vmul.f32 %v160_v10, %v1689_v40  ;;  %v1880_v32 = vmul.f32 %v161_v11, %v1691_v41 }
  0x18   :  { %3804 = vst [vmem:[#allocation28_spill] sm:$0xff] %v1860_v15  ;;  %3805 = vst [vmem:[#allocation29_spill] sm:$0xff] %v1865_v21  ;;  %v1883_v34 = vmul.f32 %v162_v12, %v1699_v44  ;;  %v1887_v2 = vsel %vm209_vm0, %v1811_v37, -inf  ;;  %v1893_v5 = vsel %vm209_vm0, %v1824_v49, -inf  ;;  %v1897_v6 = vsel %vm209_vm0, %v1828_v53, -inf }
  0x19   :  { %3806 = vst [vmem:[#allocation30_spill] sm:$0xff] %v1868_v22  ;;  %3807 = vst [vmem:[#allocation31_spill] sm:$0xff] %v1871_v23  ;;  %v211_v4 = vmax.f32 %v1809_v36, %v1887_v2  ;;  %v1901_v10 = vsel %vm209_vm0, %v1833_v57, -inf  ;;  %v219_v11 = vmax.f32 %v1822_v48, %v1893_v5  ;;  %v227_v12 = vmax.f32 %v1826_v52, %v1897_v6 }
  0x1a   :  { %3808 = vst [vmem:[#allocation32_spill] sm:$0xff] %v1874_v29  ;;  %3809 = vst [vmem:[#allocation33_spill] sm:$0xff] %v1877_v30  ;;  %v235_v38 = vmax.f32 %v1830_v56, %v1901_v10  ;;  %v1911_v42 = vsel %vm209_vm0, %v1839_v63, -inf  ;;  %v1917_v44 = vsel %vm209_vm0, %v1845_v1, -inf  ;;  %v1921_v41 = vsel %vm209_vm0, %v1851_v8, -inf }
  0x1b   :  { %3810 = vst [vmem:[#allocation34_spill] sm:$0xff] %v1880_v32  ;;  %3811 = vst [vmem:[#allocation35_spill] sm:$0xff] %v1883_v34  ;;  %v212_v43 = vrot.slane %v211_v4, 4  ;;  %v243_v62 = vmax.f32 %v1836_v60, %v1911_v42  ;;  %v220_v39 = vrot.slane %v219_v11, 4  ;;  %v228_v40 = vrot.slane %v227_v12, 4 }
  0x1c   :  { %3812 = vst [vmem:[#allocation36_spill] sm:$0xff] %v1921_v41  ;;  %v236_v31 = vrot.slane %v235_v38, 4  ;;  %v251_v35 = vmax.f32 %v1842_v0, %v1917_v44  ;;  %v259_v61 = vmax.f32 %v1848_v7, %v1921_v41  ;;  %v1929_v34 = vsel %vm209_vm0, %v1857_v14, -inf }
  0x1d   :  { %v213_v27 = vmax.f32 %v211_v4, %v212_v43  ;;  %v244_v33 = vrot.slane %v243_v62, 4  ;;  %3813 = vst [vmem:[#allocation37_spill] sm:$0xff] %v1929_v34  ;;  %v221_v3 = vmax.f32 %v219_v11, %v220_v39  ;;  %v229_v28 = vmax.f32 %v227_v12, %v228_v40 }
  0x1e   :  { %v237_v59 = vmax.f32 %v235_v38, %v236_v31  ;;  %v252_v26 = vrot.slane %v251_v35, 4  ;;  %v260_v55 = vrot.slane %v259_v61, 4  ;;  %v267_v30 = vmax.f32 %v1854_v9, %v1929_v34 }
  0x1f   :  { %v214_v58 = vrot.slane %v213_v27, 2  ;;  %v245_v25 = vmax.f32 %v243_v62, %v244_v33  ;;  %v222_v24 = vrot.slane %v221_v3, 2  ;;  %v230_v4 = vrot.slane %v229_v28, 2 }
  0x20   :  { %v238_v43 = vrot.slane %v237_v59, 2  ;;  %v253_v54 = vmax.f32 %v251_v35, %v252_v26  ;;  %v261_v19 = vmax.f32 %v259_v61, %v260_v55  ;;  %v268_v50 = vrot.slane %v267_v30, 4 }
  0x21   :  { %v215_v20 = vmax.f32 %v213_v27, %v214_v58  ;;  %v246_v51 = vrot.slane %v245_v25, 2  ;;  %v223_v32 = vmax.f32 %v221_v3, %v222_v24  ;;  %v231_v15 = vmax.f32 %v229_v28, %v230_v4 }
  0x22   :  { %v239_v39 = vmax.f32 %v237_v59, %v238_v43  ;;  %v254_v40 = vrot.slane %v253_v54, 2  ;;  %v262_v12 = vrot.slane %v261_v19, 2  ;;  %v269_v62 = vmax.f32 %v267_v30, %v268_v50 }
  0x23   :  { %v216_v31 = vrot.slane %v215_v20, 1  ;;  %v247_v11 = vmax.f32 %v245_v25, %v246_v51  ;;  %v224_v33 = vrot.slane %v223_v32, 1  ;;  %v232_v38 = vrot.slane %v231_v15, 1 }
  0x24   :  { %v240_v23 = vrot.slane %v239_v39, 1  ;;  %v255_v21 = vmax.f32 %v253_v54, %v254_v40  ;;  %v263_v29 = vmax.f32 %v261_v19, %v262_v12  ;;  %v270_v35 = vrot.slane %v269_v62, 2 }
  0x25   :  { %v217_v34 = vmax.f32 %v215_v20, %v216_v31  ;;  %v248_v41 = vrot.slane %v247_v11, 1  ;;  %v225_v27 = vmax.f32 %v223_v32, %v224_v33  ;;  %v233_v58 = vmax.f32 %v231_v15, %v232_v38 }
  0x26   :  { %v241_v55 = vmax.f32 %v239_v39, %v240_v23  ;;  %v256_v61 = vrot.slane %v255_v21, 1  ;;  %v1935_v3 = vmul.f32 %v1762_v13, %v1701_v45  ;;  %v264_v51 = vrot.slane %v263_v29, 1 }
  0x27   :  { %v249_v59 = vmax.f32 %v247_v11, %v248_v41  ;;  %v271_v24 = vmax.f32 %v269_v62, %v270_v35  ;;  %v1938_v25 = vsub.f32 %v1809_v36, %v217_v34  ;;  %v1941_v54 = vsub.f32 %v1811_v37, %v217_v34 }
  0x28   :  { %3814 = vst [vmem:[#allocation38_spill] sm:$0xff] %v1935_v3  ;;  %v257_v50 = vmax.f32 %v255_v21, %v256_v61  ;;  %v1944_v19 = vsub.f32 %v1822_v48, %v225_v27  ;;  %v1948_v20 = vmul.f32 %v1773_v17, %v1703_v46  ;;  %v265_v26 = vmax.f32 %v263_v29, %v264_v51  ;;  %v3828_v46 = vld [vmem:[#allocation28_spill] sm:$0xff] }
  0x29   :  { %v272_v13 = vrot.slane %v271_v24, 1  ;;  %v1951_v41 = vsub.f32 %v1824_v49, %v225_v27  ;;  %v1955_v28 = vmul.f32 %v1775_v18, %v1705_v47  ;;  %v1958_v15 = vsub.f32 %v1826_v52, %v233_v58 }
  0x2a   :  { %3815 = vst [vmem:[#allocation39_spill] sm:$0xff] %v1948_v20  ;;  %v1961_v21 = vsub.f32 %v1828_v53, %v233_v58  ;;  %v1964_v23 = vsub.f32 %v1830_v56, %v241_v55  ;;  %v1967_v29 = vsub.f32 %v1833_v57, %v241_v55  ;;  %v1970_v30 = vsub.f32 %v1836_v60, %v249_v59 }
  0x2b   :  { %3816 = vst [vmem:[#allocation40_spill] sm:$0xff] %v1955_v28  ;;  %v273_v17 = vmax.f32 %v271_v24, %v272_v13  ;;  %v1973_v32 = vsub.f32 %v1839_v63, %v249_v59  ;;  %v1976_v18 = vsub.f32 %v1842_v0, %v257_v50  ;;  %v290_v34 = vmul.f32 1.442695, %v1938_v25 }
  0x2c   :  { %v292_v4 = vmul.f32 1.442695, %v1941_v54  ;;  %v294_v43 = vmul.f32 1.442695, %v1944_v19  ;;  %v1982_v39 = vsub.f32 %v1845_v1, %v257_v50  ;;  %v1985_v40 = vsub.f32 %v1848_v7, %v265_v26 }
  0x2d   :  { %v1988_v31 = vsub.f32 %v1851_v8, %v265_v26  ;;  %v296_v11 = vmul.f32 1.442695, %v1951_v41  ;;  %v1992_v12 = vsub.f32 %v1854_v9, %v273_v17  ;;  %v1995_v62 = vsub.f32 %v1857_v14, %v273_v17 }
  0x2e   :  { %3817 = vst [vmem:[#allocation41_spill] sm:$0xff] %v1985_v40  ;;  %1474 = vpow2.f32 %v290_v34  ;;  %v298_v33 = vmul.f32 1.442695, %v1958_v15  ;;  %v300_v38 = vmul.f32 1.442695, %v1961_v21  ;;  %v466_v24 = vmax.f32 %v1809_v36, %v1826_v52 }
  0x2f   :  { %3818 = vst [vmem:[#allocation42_spill] sm:$0xff] %v1988_v31  ;;  %3819 = vst [vmem:[#allocation43_spill] sm:$0xff] %v1992_v12  ;;  %1476 = vpow2.f32 %v292_v4  ;;  %v302_v35 = vmul.f32 1.442695, %v1964_v23  ;;  %v304_v27 = vmul.f32 1.442695, %v1967_v29  ;;  %v467_v50 = vmax.f32 %v1822_v48, %v1830_v56 }
  0x30   :  { %3820 = vst [vmem:[#allocation44_spill] sm:$0xff] %v1995_v62  ;;  %1478 = vpow2.f32 %v294_v43  ;;  %v306_v58 = vmul.f32 1.442695, %v1970_v30  ;;  %v308_v55 = vmul.f32 1.442695, %v1973_v32  ;;  %v474_v26 = vmax.f32 %v1887_v2, %v1897_v6  ;;  %v3821_v6 = vld [vmem:[#allocation32_spill] sm:$0xff] }
  0x31   :  { %v310_v61 = vmul.f32 1.442695, %v1976_v18  ;;  %1480 = vpow2.f32 %v296_v11  ;;  %v312_v59 = vmul.f32 1.442695, %v1982_v39  ;;  %v314_v51 = vmul.f32 1.442695, %v1985_v40 }
  0x32   :  { %1482 = vpow2.f32 %v298_v33  ;;  %v475_v13 = vmax.f32 %v1893_v5, %v1901_v10  ;;  %v316_v17 = vmul.f32 1.442695, %v1988_v31  ;;  %v468_v34 = vmax.f32 %v466_v24, %v1836_v60  ;;  %v3822_v24 = vld [vmem:[#allocation36_spill] sm:$0xff] }
  0x33   :  { %1484 = vpow2.f32 %v300_v38  ;;  %v480_v4 = vsel %vm209_vm0, %v1862_v16, -inf  ;;  %v469_v43 = vmax.f32 %v467_v50, %v1842_v0  ;;  %v476_v11 = vmax.f32 %v474_v26, %v1911_v42  ;;  %v3823_v42 = vld [vmem:[#allocation37_spill] sm:$0xff] }
  0x34   :  { %1486 = vpow2.f32 %v302_v35  ;;  %v477_v33 = vmax.f32 %v475_v13, %v1917_v44  ;;  %v470_v2 = vmax.f32 %v468_v34, %v1848_v7  ;;  %v701_v5 = vsel %vm209_vm0, %v1868_v22, -inf  ;;  %v3824_v44 = vld [vmem:[#allocation29_spill] sm:$0xff]  ;;  %v3826_v13 = vld [vmem:[#allocation31_spill] sm:$0xff] }
  0x35   :  { %1488 = vpow2.f32 %v304_v27  ;;  %v709_v10 = vsel %vm209_vm0, %v3821_v6, -inf  ;;  %v318_v38 = vmul.f32 1.442695, %v1992_v12  ;;  %v471_v35 = vmax.f32 %v469_v43, %v1854_v9  ;;  %v3829_v6 = vld [vmem:[#allocation34_spill] sm:$0xff] }
  0x36   :  { %1490 = vpow2.f32 %v306_v58  ;;  %v478_v50 = vmax.f32 %v476_v11, %v3822_v24  ;;  %v479_v26 = vmax.f32 %v477_v33, %v3823_v42  ;;  %v2031_v27 = vmax.f32 %v3824_v44, %v701_v5  ;;  %v3831_v11 = vld [vmem:[#allocation21_spill] sm:$0xff]  ;;  %v3833_v5 = vld [vmem:[#allocation14_spill] sm:$0xff] }
  0x37   :  { %1492 = vpow2.f32 %v308_v55  ;;  %v2034_v34 = vmax.f32 %v3826_v13, %v709_v10  ;;  %v472_v58 = vmax.f32 %v470_v2, %v3828_v46  ;;  %v717_v43 = vsel %vm209_vm0, %v3829_v6, -inf  ;;  %v3830_v55 = vld [vmem:[#allocation13_spill] sm:$0xff]  ;;  %v3834_v24 = vld [vmem:[#allocation22_spill] sm:$0xff]  ;;  %v3836_v2 = vld [vmem:[#allocation15_spill] sm:$0xff] }
  0x38   :  { %3825 = vst [vmem:[#allocation36_spill] sm:$0xff] %v2031_v27  ;;  %v2036_v47 = vpop.eup %1474  ;;  %1494 = vpow2.f32 %v310_v61  ;;  %v481_v45 = vmax.f32 %v478_v50, %v480_v4  ;;  %v2045_v33 = vmul.f32 %v3831_v11, %v3830_v55  ;;  %v2049_v42 = vmul.f32 %v3834_v24, %v3833_v5  ;;  %v3837_v4 = vld [vmem:[#allocation23_spill] sm:$0xff]  ;;  %v3839_v13 = vld [vmem:[#allocation33_spill] sm:$0xff]  ;;  %v3841_v24 = vld [vmem:[#allocation16_spill] sm:$0xff] }
  0x39   :  { %3827 = vst [vmem:[#allocation37_spill] sm:$0xff] %v2034_v34  ;;  %v2041_v22 = vpop.eup %1476  ;;  %1496 = vpow2.f32 %v312_v59  ;;  %v320_v10 = vmul.f32 1.442695, %v1995_v62  ;;  %v2056_v50 = vmul.f32 %v3837_v4, %v3836_v2  ;;  %v2061_v11 = vmax.f32 %v3839_v13, %v717_v43  ;;  %v3842_v5 = vld [vmem:[#allocation24_spill] sm:$0xff]  ;;  %v3844_v44 = vld [vmem:[#allocation17_spill] sm:$0xff] }
  0x3a   :  { %3832 = vst [vmem:[#allocation28_spill] sm:$0xff] %v2045_v33  ;;  %3835 = vst [vmem:[#allocation21_spill] sm:$0xff] %v2049_v42  ;;  %v2052_v61 = vpop.eup %1478  ;;  %1498 = vpow2.f32 %v314_v51  ;;  %v322_v6 = vsel %vm209_vm0, %v2041_v22, 0.0  ;;  %v2067_v59 = vmul.f32 %v3842_v5, %v3841_v24  ;;  %v3845_v33 = vld [vmem:[#allocation25_spill] sm:$0xff]  ;;  %v2078_v2 = vmax.f32 %v472_v58, %v471_v35  ;;  %v3849_v5 = vld [vmem:[#allocation18_spill] sm:$0xff] }
  0x3b   :  { %3838 = vst [vmem:[#allocation22_spill] sm:$0xff] %v2056_v50  ;;  %3840 = vst [vmem:[#allocation23_spill] sm:$0xff] %v2061_v11  ;;  %v2063_v55 = vpop.eup %1480  ;;  %v2071_v20 = vmul.f32 %v3845_v33, %v3844_v44  ;;  %1500 = vpow2.f32 %v316_v17  ;;  %v323_v4 = vadd.f32 %v2036_v47, %v322_v6  ;;  %v2080_v13 = vmax.f32 %v481_v45, %v479_v26  ;;  %v3850_v24 = vld [vmem:[#allocation26_spill] sm:$0xff] }
  0x3c   :  { %3843 = vst [vmem:[#allocation24_spill] sm:$0xff] %v2067_v59  ;;  %v2074_v51 = vpop.eup %1482  ;;  %1502 = vpow2.f32 %v318_v38  ;;  %v330_v43 = vsel %vm209_vm0, %v2063_v55, 0.0  ;;  %v2086_v59 = vmul.f32 %v3850_v24, %v3849_v5  ;;  %v3853_v44 = vld [vmem:[#allocation2_spill] sm:$0xff]  ;;  %v2099_v26 = vsel %vm209_vm0, %v1935_v3, -inf }
  0x3d   :  { %3846 = vst [vmem:[#allocation25_spill] sm:$0xff] %v2071_v20  ;;  %3847 = vst [vmem:[#allocation45_spill] sm:$0xff] %v2074_v51  ;;  %v2082_v50 = vpop.eup %1484  ;;  %1504 = vpow2.f32 %v320_v10  ;;  %v324_v17 = vrot.slane %v323_v4, 4  ;;  %v331_v6 = vadd.f32 %v2052_v61, %v330_v43  ;;  %v2094_v35 = vadd.s32 8, %v3853_v44 }
  0x3e   :  { %3848 = vst [vmem:[#allocation46_spill] sm:$0xff] %v2082_v50  ;;  %3851 = vst [vmem:[#allocation26_spill] sm:$0xff] %v2086_v59  ;;  %v2089_v33 = vpop.eup %1486  ;;  %v338_v38 = vsel %vm209_vm0, %v2082_v50, 0.0  ;;  %v2111_v45 = vsub.f32 %v1809_v36, %v2078_v2  ;;  %v2138_v28 = vsub.f32 %v1828_v53, %v2080_v13  ;;  %v2153_v53 = vsub.f32 %v1833_v57, %v2080_v13 }
  0x3f   :  { %3852 = vst [vmem:[#allocation47_spill] sm:$0xff] %v2089_v33  ;;  %3854 = vst [vmem:[#allocation48_spill] sm:$0xff] %v2094_v35  ;;  %v2101_v58 = vpop.eup %1488  ;;  %v325_v10 = vadd.f32 %v324_v17, %v323_v4  ;;  %v332_v24 = vrot.slane %v331_v6, 4  ;;  %v339_v43 = vadd.f32 %v2074_v51, %v338_v38  ;;  %v2115_v35 = vsub.f32 %v1811_v37, %v2080_v13 }
  0x40   :  { %3855 = vst [vmem:[#allocation49_spill] sm:$0xff] %v2099_v26  ;;  %3856 = vst [vmem:[#allocation50_spill] sm:$0xff] %v2101_v58  ;;  %v2105_v20 = vpop.eup %1490  ;;  %v346_v44 = vsel %vm209_vm0, %v2101_v58, 0.0  ;;  %v2119_v4 = vsub.f32 %v1822_v48, %v2078_v2  ;;  %v2130_v37 = vsub.f32 %v1824_v49, %v2080_v13  ;;  %v2134_v48 = vsub.f32 %v1826_v52, %v2078_v2 }
  0x41   :  { %3857 = vst [vmem:[#allocation51_spill] sm:$0xff] %v2105_v20  ;;  %3858 = vst [vmem:[#allocation52_spill] sm:$0xff] %v2111_v45  ;;  %v2121_v17 = vpop.eup %1492  ;;  %v326_v38 = vrot.slane %v325_v10, 2  ;;  %v333_v5 = vadd.f32 %v332_v24, %v331_v6  ;;  %v340_v3 = vrot.slane %v339_v43, 4  ;;  %v347_v59 = vadd.f32 %v2089_v33, %v346_v44 }
  0x42   :  { %3859 = vst [vmem:[#allocation53_spill] sm:$0xff] %v2115_v35  ;;  %3860 = vst [vmem:[#allocation54_spill] sm:$0xff] %v2119_v4  ;;  %v2124_v42 = vpop.eup %1494  ;;  %v354_v36 = vsel %vm209_vm0, %v2121_v17, 0.0  ;;  %v2149_v52 = vsub.f32 %v1830_v56, %v2078_v2  ;;  %v2164_v56 = vsub.f32 %v1836_v60, %v2078_v2 }
  0x43   :  { %3861 = vst [vmem:[#allocation55_spill] sm:$0xff] %v2121_v17  ;;  %3862 = vst [vmem:[#allocation56_spill] sm:$0xff] %v2124_v42  ;;  %v2140_v6 = vpop.eup %1496  ;;  %v327_v44 = vadd.f32 %v326_v38, %v325_v10  ;;  %v334_v24 = vrot.slane %v333_v5, 2  ;;  %v341_v26 = vadd.f32 %v340_v3, %v339_v43  ;;  %v348_v11 = vrot.slane %v347_v59, 4 }
  0x44   :  { %3863 = vst [vmem:[#allocation57_spill] sm:$0xff] %v2130_v37  ;;  %3864 = vst [vmem:[#allocation58_spill] sm:$0xff] %v2138_v28  ;;  %v2142_v34 = vpop.eup %1498  ;;  %v355_v17 = vadd.f32 %v2105_v20, %v354_v36  ;;  %v362_v49 = vsel %vm209_vm0, %v2140_v6, 0.0 }
  0x45   :  { %3865 = vst [vmem:[#allocation59_spill] sm:$0xff] %v2140_v6  ;;  %3866 = vst [vmem:[#allocation60_spill] sm:$0xff] %v2142_v34  ;;  %v2155_v27 = vpop.eup %1500  ;;  %v328_v10 = vrot.slane %v327_v44, 1  ;;  %v335_v3 = vadd.f32 %v334_v24, %v333_v5  ;;  %v342_v43 = vrot.slane %v341_v26, 2  ;;  %v349_v38 = vadd.f32 %v348_v11, %v347_v59 }
  0x46   :  { %3867 = vst [vmem:[#allocation61_spill] sm:$0xff] %v2149_v52  ;;  %3868 = vst [vmem:[#allocation62_spill] sm:$0xff] %v2153_v53  ;;  %v2157_v62 = vpop.eup %1502  ;;  %v356_v36 = vrot.slane %v355_v17, 4  ;;  %v363_v20 = vadd.f32 %v2124_v42, %v362_v49  ;;  %v370_v6 = vsel %vm209_vm0, %v2155_v27, 0.0 }
  0x47   :  { %3869 = vst [vmem:[#allocation63_spill] sm:$0xff] %v2155_v27  ;;  %3870 = vst [vmem:[#allocation64_spill] sm:$0xff] %v2164_v56  ;;  %v2166_v57 = vpop.eup %1504  ;;  %v329_v12 = vadd.f32 %v328_v10, %v327_v44  ;;  %v336_v31 = vrot.slane %v335_v3, 1  ;;  %v343_v40 = vadd.f32 %v342_v43, %v341_v26  ;;  %v350_v5 = vrot.slane %v349_v38, 2 }
  0x48   :  { %v357_v24 = vadd.f32 %v356_v36, %v355_v17  ;;  %v364_v11 = vrot.slane %v363_v20, 4  ;;  %v371_v59 = vadd.f32 %v2142_v34, %v370_v6  ;;  %v378_v49 = vsel %vm209_vm0, %v2166_v57, 0.0 }
  0x49   :  { %v337_v42 = vadd.f32 %v336_v31, %v335_v3  ;;  %v344_v58 = vrot.slane %v343_v40, 1  ;;  %v351_v27 = vadd.f32 %v350_v5, %v349_v38  ;;  %v379_v33 = vadd.f32 %v2157_v62, %v378_v49 }
  0x4a   :  { %v358_v60 = vrot.slane %v357_v24, 2  ;;  %v365_v50 = vadd.f32 %v364_v11, %v363_v20  ;;  %v372_v51 = vrot.slane %v371_v59, 4  ;;  %1506 = vrcp.f32 %v329_v12 }
  0x4b   :  { %v345_v44 = vadd.f32 %v344_v58, %v343_v40  ;;  %v352_v10 = vrot.slane %v351_v27, 1  ;;  %v380_v26 = vrot.slane %v379_v33, 4  ;;  %1508 = vrcp.f32 %v337_v42 }
  0x4c   :  { %v359_v17 = vadd.f32 %v358_v60, %v357_v24  ;;  %v366_v43 = vrot.slane %v365_v50, 2  ;;  %v373_v36 = vadd.f32 %v372_v51, %v371_v59  ;;  %1510 = vlog2.f32 %v329_v12 }
  0x4d   :  { %v353_v6 = vadd.f32 %v352_v10, %v351_v27  ;;  %v381_v34 = vadd.f32 %v380_v26, %v379_v33  ;;  %1512 = vrcp.f32 %v345_v44  ;;  %v2174_v31 = vsub.f32 %v1839_v63, %v2080_v13 }
  0x4e   :  { %v360_v3 = vrot.slane %v359_v17, 1  ;;  %v367_v38 = vadd.f32 %v366_v43, %v365_v50  ;;  %v374_v20 = vrot.slane %v373_v36, 2  ;;  %1514 = vlog2.f32 %v337_v42 }
  0x4f   :  { %3871 = vst [vmem:[#allocation65_spill] sm:$0xff] %v2174_v31  ;;  %v382_v5 = vrot.slane %v381_v34, 2  ;;  %1516 = vrcp.f32 %v353_v6  ;;  %v2178_v40 = vsub.f32 %v1842_v0, %v2078_v2  ;;  %v2182_v51 = vsub.f32 %v1845_v1, %v2080_v13 }
  0x50   :  { %v361_v27 = vadd.f32 %v360_v3, %v359_v17  ;;  %v368_v33 = vrot.slane %v367_v38, 1  ;;  %v375_v58 = vadd.f32 %v374_v20, %v373_v36  ;;  %1518 = vlog2.f32 %v345_v44 }
  0x51   :  { %3872 = vst [vmem:[#allocation66_spill] sm:$0xff] %v2178_v40  ;;  %3873 = vst [vmem:[#allocation67_spill] sm:$0xff] %v2182_v51  ;;  %v383_v63 = vadd.f32 %v382_v5, %v381_v34  ;;  %1520 = vlog2.f32 %v353_v6  ;;  %v2186_v50 = vsub.f32 %v1848_v7, %v2078_v2  ;;  %v2190_v24 = vsub.f32 %v1851_v8, %v2080_v13 }
  0x52   :  { %v2192_v0 = vadd.f32 %v368_v33, %v367_v38  ;;  %v376_v11 = vrot.slane %v375_v58, 1  ;;  %1522 = vrcp.f32 %v361_v27  ;;  %v2196_v1 = vsub.f32 %v1854_v9, %v2078_v2 }
  0x53   :  { %3874 = vst [vmem:[#allocation68_spill] sm:$0xff] %v2186_v50  ;;  %3875 = vst [vmem:[#allocation69_spill] sm:$0xff] %v2190_v24  ;;  %v384_v59 = vrot.slane %v383_v63, 1  ;;  %1524 = vlog2.f32 %v361_v27  ;;  %v2200_v34 = vsub.f32 %v1857_v14, %v2080_v13  ;;  %v2204_v7 = vsub.f32 %v3828_v46, %v2078_v2 }
  0x54   :  { %v1507_v8 = vpop.eup %1506  ;;  %v2206_v49 = vadd.f32 %v376_v11, %v375_v58  ;;  %1526 = vrcp.f32 %v2192_v0  ;;  %v2212_v9 = vmul.f32 1.442695, %v2111_v45  ;;  %v2218_v46 = vmul.f32 1.442695, %v2115_v35 }
  0x55   :  { %3876 = vst [vmem:[#allocation70_spill] sm:$0xff] %v2204_v7  ;;  %v1509_v10 = vpop.eup %1508  ;;  %v2214_v26 = vadd.f32 %v384_v59, %v383_v63  ;;  %v394_v14 = vmul.f32 %v1507_v8, %v329_v12  ;;  %1528 = vlog2.f32 %v2192_v0  ;;  %v2222_v43 = vmul.f32 1.442695, %v2119_v4 }
  0x56   :  { %v1511_v2 = vpop.eup %1510  ;;  %1530 = vrcp.f32 %v2206_v49  ;;  %v395_v17 = vmul.f32 %v1509_v10, %v337_v42  ;;  %v2225_v36 = vmul.f32 1.442695, %v2130_v37  ;;  %v2229_v12 = vmul.f32 1.442695, %v2134_v48 }
  0x57   :  { %v1513_v3 = vpop.eup %1512  ;;  %1532 = vrcp.f32 %v2214_v26  ;;  %v435_v38 = vmul.f32 0.6931472, %v1511_v2  ;;  %v2232_v20 = vmul.f32 1.442695, %v2138_v28  ;;  %v402_v58 = vsub.f32 2.0, %v394_v14 }
  0x58   :  { %v1515_v5 = vpop.eup %1514  ;;  %v396_v33 = vmul.f32 %v1513_v3, %v345_v44  ;;  %1534 = vlog2.f32 %v2206_v49  ;;  %v2236_v42 = vmul.f32 1.442695, %v2149_v52  ;;  %v2243_v2 = vmul.f32 1.442695, %v2153_v53 }
  0x59   :  { %v1517_v63 = vpop.eup %1516  ;;  %v437_v11 = vmul.f32 0.6931472, %v1515_v5  ;;  %1536 = vlog2.f32 %v2214_v26  ;;  %v2240_v59 = vsub.f32 %v1938_v25, %v435_v38  ;;  %v403_v35 = vsub.f32 2.0, %v395_v17 }
  0x5a   :  { %v1519_v60 = vpop.eup %1518  ;;  %v397_v37 = vmul.f32 %v1517_v63, %v353_v6  ;;  %v2246_v44 = vsub.f32 %v1941_v54, %v435_v38  ;;  %v2249_v14 = vmul.f32 1.442695, %v2164_v56  ;;  %v2255_v25 = vmul.f32 1.442695, %v2174_v31 }
  0x5b   :  { %3877 = vst [vmem:[#allocation71_spill] sm:$0xff] %v2240_v59  ;;  %v1521_v4 = vpop.eup %1520  ;;  %v439_v45 = vmul.f32 0.6931472, %v1519_v60  ;;  %v2252_v5 = vsub.f32 %v1944_v19, %v437_v11  ;;  %v2258_v59 = vmul.f32 1.442695, %v2178_v40  ;;  %v404_v6 = vsub.f32 2.0, %v396_v33 }
  0x5c   :  { %3878 = vst [vmem:[#allocation72_spill] sm:$0xff] %v2246_v44  ;;  %v1523_v53 = vpop.eup %1522  ;;  %v405_v17 = vsub.f32 2.0, %v397_v37  ;;  %v410_v28 = vmul.f32 %v1507_v8, %v402_v58  ;;  %v2261_v54 = vmul.f32 1.442695, %v2182_v51  ;;  %v441_v56 = vmul.f32 0.6931472, %v1521_v4 }
  0x5d   :  { %3879 = vst [vmem:[#allocation73_spill] sm:$0xff] %v2252_v5  ;;  %v1525_v38 = vpop.eup %1524  ;;  %v398_v44 = vmul.f32 %v1523_v53, %v361_v27  ;;  %v2264_v60 = vsub.f32 %v1951_v41, %v437_v11  ;;  %v2267_v19 = vsub.f32 %v1958_v15, %v439_v45  ;;  %v411_v31 = vmul.f32 %v1509_v10, %v403_v35 }
  0x5e   :  { %v1527_v5 = vpop.eup %1526  ;;  %v443_v40 = vmul.f32 0.6931472, %v1525_v38  ;;  %v2270_v52 = vmul.f32 1.442695, %v2186_v50  ;;  %v2273_v37 = vmul.f32 1.442695, %v2190_v24  ;;  %v2277_v4 = vsub.f32 %v1961_v21, %v439_v45 }
  0x5f   :  { %3880 = vst [vmem:[#allocation74_spill] sm:$0xff] %v2264_v60  ;;  %3881 = vst [vmem:[#allocation75_spill] sm:$0xff] %v2267_v19  ;;  %v1529_v8 = vpop.eup %1528  ;;  %v399_v33 = vmul.f32 %v1527_v5, %v2192_v0  ;;  %v406_v27 = vsub.f32 2.0, %v398_v44  ;;  %v2280_v41 = vsub.f32 %v1964_v23, %v441_v56  ;;  %v2285_v35 = vmul.f32 %v2036_v47, %v410_v28  ;;  %v3929_v60 = vld [vmem:[#allocation30_spill] sm:$0xff] }
  0x60   :  { %3882 = vst [vmem:[#allocation76_spill] sm:$0xff] %v2277_v4  ;;  %v2282_v15 = vpop.eup %1530  ;;  %v445_v10 = vmul.f32 0.6931472, %v1529_v8  ;;  %v2288_v58 = vsub.f32 %v1967_v29, %v441_v56  ;;  %v2291_v11 = vmul.f32 1.442695, %v2196_v1  ;;  %v412_v44 = vmul.f32 %v1513_v3, %v404_v6  ;;  %v3895_v6 = vld [vmem:[#allocation46_spill] sm:$0xff] }
  0x61   :  { %3883 = vst [vmem:[#allocation77_spill] sm:$0xff] %v2280_v41  ;;  %3884 = vst [vmem:[#allocation78_spill] sm:$0xff] %v2285_v35  ;;  %v2293_v0 = vpop.eup %1532  ;;  %v413_v21 = vmul.f32 %v1517_v63, %v405_v17  ;;  %v2296_v45 = vmul.f32 %v2041_v22, %v410_v28  ;;  %v2299_v23 = vsub.f32 %v1970_v30, %v443_v40  ;;  %v407_v28 = vsub.f32 2.0, %v399_v33  ;;  %v3897_v17 = vld [vmem:[#allocation47_spill] sm:$0xff]  ;;  %v3934_v50 = vld [vmem:[#allocation34_spill] sm:$0xff] }
  0x62   :  { %3885 = vst [vmem:[#allocation79_spill] sm:$0xff] %v2288_v58  ;;  %v1535_v38 = vpop.eup %1534  ;;  %v2302_v47 = vmul.f32 %v2052_v61, %v411_v31  ;;  %v2305_v29 = vsub.f32 %v1973_v32, %v443_v40  ;;  %v2308_v56 = vsub.f32 %v1976_v18, %v445_v10  ;;  %v2311_v8 = vsub.f32 %v1982_v39, %v445_v10  ;;  %v3893_v39 = vld [vmem:[#allocation45_spill] sm:$0xff] }
  0x63   :  { %3886 = vst [vmem:[#allocation80_spill] sm:$0xff] %v2296_v45  ;;  %3887 = vst [vmem:[#allocation81_spill] sm:$0xff] %v2299_v23  ;;  %v1537_v3 = vpop.eup %1536  ;;  %v2315_v22 = vmul.f32 %v2282_v15, %v2206_v49  ;;  %v2317_v30 = vmul.f32 %v1523_v53, %v406_v27  ;;  %v2320_v61 = vmul.f32 %v2063_v55, %v411_v31  ;;  %v447_v18 = vmul.f32 0.6931472, %v1535_v38  ;;  %v3899_v55 = vld [vmem:[#allocation50_spill] sm:$0xff]  ;;  %v3926_v58 = vld [vmem:[#allocation29_spill] sm:$0xff] }
  0x64   :  { %3888 = vst [vmem:[#allocation82_spill] sm:$0xff] %v2302_v47  ;;  %3889 = vst [vmem:[#allocation83_spill] sm:$0xff] %v2305_v29  ;;  %v2324_v32 = vmul.f32 %v2293_v0, %v2214_v26  ;;  %v449_v40 = vmul.f32 0.6931472, %v1537_v3  ;;  %1538 = vpow2.f32 %v2212_v9  ;;  %v2328_v63 = vmul.f32 %v3893_v39, %v412_v44  ;;  %v3901_v26 = vld [vmem:[#allocation41_spill] sm:$0xff]  ;;  %v3903_v27 = vld [vmem:[#allocation42_spill] sm:$0xff] }
  0x65   :  { %3890 = vst [vmem:[#allocation84_spill] sm:$0xff] %v2308_v56  ;;  %3891 = vst [vmem:[#allocation85_spill] sm:$0xff] %v2311_v8  ;;  %v2331_v49 = vmul.f32 %v3895_v6, %v412_v44  ;;  %v2334_v53 = vmul.f32 %v3897_v17, %v413_v21  ;;  %1540 = vpow2.f32 %v2218_v46  ;;  %v2338_v31 = vmul.f32 %v3899_v55, %v413_v21  ;;  %v3905_v9 = vld [vmem:[#allocation43_spill] sm:$0xff]  ;;  %v3907_v39 = vld [vmem:[#allocation44_spill] sm:$0xff] }
  0x66   :  { %3892 = vst [vmem:[#allocation86_spill] sm:$0xff] %v2320_v61  ;;  %3894 = vst [vmem:[#allocation45_spill] sm:$0xff] %v2328_v63  ;;  %v2341_v33 = vsub.f32 %v3901_v26, %v447_v18  ;;  %v2344_v10 = vsub.f32 %v3903_v27, %v447_v18  ;;  %v2347_v38 = vsub.f32 %v3905_v9, %v449_v40  ;;  %1542 = vpow2.f32 %v2222_v43  ;;  %v3909_v21 = vld [vmem:[#allocation51_spill] sm:$0xff]  ;;  %v3912_v55 = vld [vmem:[#allocation36_spill] sm:$0xff] }
  0x67   :  { %3896 = vst [vmem:[#allocation46_spill] sm:$0xff] %v2331_v49  ;;  %3898 = vst [vmem:[#allocation47_spill] sm:$0xff] %v2334_v53  ;;  %v2350_v3 = vmul.f32 %v1527_v5, %v407_v28  ;;  %v2353_v6 = vsub.f32 %v3907_v39, %v449_v40  ;;  %v2359_v17 = vmul.f32 %v3909_v21, %v2317_v30  ;;  %1544 = vpow2.f32 %v2225_v36  ;;  %v3914_v27 = vld [vmem:[#allocation37_spill] sm:$0xff]  ;;  %v3916_v39 = vld [vmem:[#allocation23_spill] sm:$0xff] }
  0x68   :  { %3900 = vst [vmem:[#allocation50_spill] sm:$0xff] %v2338_v31  ;;  %3902 = vst [vmem:[#allocation41_spill] sm:$0xff] %v2341_v33  ;;  %v531_v18 = vmul.f32 1.442695, %v2200_v34  ;;  %1546 = vpow2.f32 %v2229_v12  ;;  %v533_v5 = vmul.f32 1.442695, %v2204_v7  ;;  %v3911_v28 = vsub.f32 %v1862_v16, %v2080_v13 }
  0x69   :  { %3904 = vst [vmem:[#allocation42_spill] sm:$0xff] %v2344_v10  ;;  %3906 = vst [vmem:[#allocation43_spill] sm:$0xff] %v2347_v38  ;;  %v3913_v43 = vrot.slane %v3912_v55, 4  ;;  %1548 = vpow2.f32 %v2232_v20  ;;  %v3915_v9 = vrot.slane %v3914_v27, 4  ;;  %v719_v21 = vrot.slane %v3916_v39, 4  ;;  %v3917_v46 = vld [vmem:[#allocation49_spill] sm:$0xff] }
  0x6a   :  { %3908 = vst [vmem:[#allocation44_spill] sm:$0xff] %v2353_v6  ;;  %3910 = vst [vmem:[#allocation51_spill] sm:$0xff] %v2359_v17  ;;  %v535_v40 = vmul.f32 1.442695, %v3911_v28  ;;  %v3918_v12 = vld [vmem:[#allocation35_spill] sm:$0xff]  ;;  %1550 = vpow2.f32 %v2236_v42  ;;  %v3919_v16 = vld [vmem:[#allocation40_spill] sm:$0xff] }
  0x6b   :  { %v704_v26 = vmax.f32 %v3912_v55, %v3913_v43  ;;  %v712_v36 = vmax.f32 %v3914_v27, %v3915_v9  ;;  %v726_v44 = vmax.f32 %v3918_v12, %v3917_v46  ;;  %v733_v13 = vsel %vm209_vm0, %v3919_v16, -inf  ;;  %v3920_v28 = vld [vmem:[#allocation21_spill] sm:$0xff]  ;;  %v3921_v38 = vld [vmem:[#allocation39_spill] sm:$0xff]  ;;  %v3922_v17 = vld [vmem:[#allocation28_spill] sm:$0xff] }
  0x6c   :  { %v741_v55 = vsel %vm209_vm0, %v3920_v28, -inf  ;;  %1552 = vpow2.f32 %v2243_v2  ;;  %v720_v43 = vmax.f32 %v3916_v39, %v719_v21  ;;  %v734_v46 = vmax.f32 %v3921_v38, %v733_v13  ;;  %v3930_v53 = vld [vmem:[#allocation31_spill] sm:$0xff]  ;;  %v3933_v47 = vld [vmem:[#allocation33_spill] sm:$0xff] }
  0x6d   :  { %v705_v6 = vrot.slane %v704_v26, 2  ;;  %v713_v20 = vrot.slane %v712_v36, 2  ;;  %v727_v27 = vrot.slane %v726_v44, 4  ;;  %1554 = vpow2.f32 %v2249_v14 }
  0x6e   :  { %v742_v42 = vmax.f32 %v3922_v17, %v741_v55  ;;  %v2388_v31 = vpop.eup %1538  ;;  %1556 = vpow2.f32 %v2255_v25  ;;  %v721_v33 = vrot.slane %v720_v43, 2  ;;  %v735_v39 = vrot.slane %v734_v46, 4 }
  0x6f   :  { %v706_v9 = vmax.f32 %v704_v26, %v705_v6  ;;  %v714_v10 = vmax.f32 %v712_v36, %v713_v20  ;;  %v728_v8 = vmax.f32 %v726_v44, %v727_v27  ;;  %v2391_v56 = vpop.eup %1540  ;;  %1558 = vpow2.f32 %v2258_v59 }
  0x70   :  { %v743_v21 = vrot.slane %v742_v42, 4  ;;  %1560 = vpow2.f32 %v2261_v54  ;;  %v545_v14 = vsel %vm209_vm0, %v2391_v56, 0.0  ;;  %v722_v26 = vmax.f32 %v720_v43, %v721_v33  ;;  %v2397_v13 = vpop.eup %1542 }
  0x71   :  { %v707_v2 = vrot.slane %v706_v9, 1  ;;  %v715_v6 = vrot.slane %v714_v10, 1  ;;  %1562 = vpow2.f32 %v2270_v52  ;;  %v729_v44 = vrot.slane %v728_v8, 2  ;;  %v2402_v55 = vpop.eup %1544 }
  0x72   :  { %v736_v36 = vmax.f32 %v734_v46, %v735_v39  ;;  %1564 = vpow2.f32 %v2273_v37  ;;  %v537_v59 = vadd.f32 %v2397_v13, %v2388_v31  ;;  %v723_v20 = vrot.slane %v722_v26, 1  ;;  %v2409_v27 = vpop.eup %1546 }
  0x73   :  { %v2400_v25 = vmax.f32 %v706_v9, %v707_v2  ;;  %v2407_v54 = vmax.f32 %v714_v10, %v715_v6  ;;  %1566 = vpow2.f32 %v2291_v11  ;;  %v546_v52 = vsel %vm209_vm0, %v2402_v55, 0.0  ;;  %v2414_v9 = vpop.eup %1548 }
  0x74   :  { %v730_v33 = vmax.f32 %v728_v8, %v729_v44  ;;  %v737_v43 = vrot.slane %v736_v36, 2  ;;  %1568 = vpow2.f32 %v531_v18  ;;  %v538_v37 = vadd.f32 %v2409_v27, %v537_v59  ;;  %v2419_v10 = vpop.eup %1550  ;;  %v3923_v59 = vld [vmem:[#allocation24_spill] sm:$0xff] }
  0x75   :  { %v547_v46 = vadd.f32 %v546_v52, %v545_v14  ;;  %v2417_v2 = vmax.f32 %v722_v26, %v723_v20  ;;  %1570 = vpow2.f32 %v533_v5  ;;  %v548_v39 = vsel %vm209_vm0, %v2414_v9, 0.0 }
  0x76   :  { %v731_v11 = vrot.slane %v730_v33, 1  ;;  %v738_v6 = vmax.f32 %v736_v36, %v737_v43  ;;  %v2423_v29 = vpop.eup %1552  ;;  %1572 = vpow2.f32 %v535_v40  ;;  %v539_v8 = vadd.f32 %v2419_v10, %v538_v37  ;;  %v3924_v37 = vld [vmem:[#allocation22_spill] sm:$0xff] }
  0x77   :  { %v549_v44 = vadd.f32 %v548_v39, %v547_v46  ;;  %v744_v18 = vmax.f32 %v742_v42, %v743_v21  ;;  %v2426_v23 = vpop.eup %1554  ;;  %v550_v14 = vsel %vm209_vm0, %v2423_v29, 0.0  ;;  %v749_v20 = vsel %vm209_vm0, %v3923_v59, -inf }
  0x78   :  { %v2430_v26 = vmax.f32 %v730_v33, %v731_v11  ;;  %v739_v5 = vrot.slane %v738_v6, 1  ;;  %v2434_v52 = vpop.eup %1556  ;;  %v540_v36 = vadd.f32 %v2426_v23, %v539_v8  ;;  %v750_v46 = vmax.f32 %v3924_v37, %v749_v20  ;;  %v3925_v33 = vld [vmem:[#allocation26_spill] sm:$0xff] }
  0x79   :  { %v551_v40 = vadd.f32 %v550_v14, %v549_v44  ;;  %v745_v43 = vrot.slane %v744_v18, 2  ;;  %v2438_v42 = vpop.eup %1558  ;;  %v552_v21 = vsel %vm209_vm0, %v2434_v52, 0.0  ;;  %v757_v11 = vsel %vm209_vm0, %v3925_v33, -inf }
  0x7a   :  { %v2442_v39 = vmax.f32 %v738_v6, %v739_v5  ;;  %vm765_vm1 = vcmp.eq.f32.partialorder %v3926_v58, %v2400_v25  ;;  %v2448_v41 = vpop.eup %1560  ;;  %v541_v8 = vadd.f32 %v2438_v42, %v540_v36  ;;  %v751_v20 = vrot.slane %v750_v46, 4  ;;  %v3928_v6 = vld [vmem:[#allocation25_spill] sm:$0xff] }
  0x7b   :  { %v553_v44 = vadd.f32 %v552_v21, %v551_v40  ;;  %v746_v14 = vmax.f32 %v744_v18, %v745_v43  ;;  %v2451_v4 = vpop.eup %1562  ;;  %v554_v19 = vsel %vm209_vm0, %v2448_v41, 0.0  ;;  %v758_v5 = vmax.f32 %v3928_v6, %v757_v11  ;;  %v3932_v11 = vld [vmem:[#allocation32_spill] sm:$0xff] }
  0x7c   :  { %3927 = vst [vmem:[#allocation36_spill] sm:$0xff] %v2451_v4  ;;  %vm766_vm2 = vcmp.eq.f32.partialorder %v3929_v60, %v2400_v25  ;;  %vm767_vm3 = vcmp.eq.f32.partialorder %v3930_v53, %v2407_v54  ;;  %v2460_v49 = vpop.eup %1564  ;;  %v542_v36 = vadd.f32 %v2451_v4, %v541_v8  ;;  %v752_v43 = vmax.f32 %v750_v46, %v751_v20 }
  0x7d   :  { %v555_v40 = vadd.f32 %v554_v19, %v553_v44  ;;  %v747_v18 = vrot.slane %v746_v14, 1  ;;  %v2463_v21 = vpop.eup %1566  ;;  %v556_v63 = vsel %vm209_vm0, %v2460_v49, 0.0  ;;  %v759_v61 = vrot.slane %v758_v5, 4 }
  0x7e   :  { %3931 = vst [vmem:[#allocation37_spill] sm:$0xff] %v2463_v21  ;;  %vm768_vm4 = vcmp.eq.f32.partialorder %v3932_v11, %v2407_v54  ;;  %vm769_vm5 = vcmp.eq.f32.partialorder %v3933_v47, %v2417_v2  ;;  %v2471_v45 = vpop.eup %1568  ;;  %v543_v35 = vadd.f32 %v2463_v21, %v542_v36  ;;  %v753_v46 = vrot.slane %v752_v43, 2 }
  0x7f   :  { %v557_v8 = vadd.f32 %v556_v63, %v555_v40  ;;  %v2474_v19 = vmax.f32 %v746_v14, %v747_v18  ;;  %v2476_v44 = vpop.eup %1570  ;;  %v558_v20 = vsel %vm209_vm0, %v2471_v45, 0.0  ;;  %v760_v24 = vmax.f32 %v758_v5, %v759_v61  ;;  %v3935_v14 = vld [vmem:[#allocation38_spill] sm:$0xff] }
  0x80   :  { %vm770_vm6 = vcmp.eq.f32.partialorder %v3934_v50, %v2417_v2  ;;  %vm771_vm7 = vcmp.eq.f32.partialorder %v3918_v12, %v2430_v26  ;;  %v1573_v51 = vpop.eup %1572  ;;  %v544_v4 = vadd.f32 %v2476_v44, %v543_v35  ;;  %v754_v63 = vmax.f32 %v752_v43, %v753_v46  ;;  %v3944_v2 = vld [vmem:[#allocation63_spill] sm:$0xff] }
  0x81   :  { %v559_v36 = vadd.f32 %v558_v20, %v557_v8  ;;  %vm772_vm8 = vcmp.eq.f32.partialorder %v3935_v14, %v2430_v26  ;;  %v560_v40 = vsel %vm209_vm0, %v1573_v51, 0.0  ;;  %v761_v18 = vrot.slane %v760_v24, 2  ;;  %v3937_v51 = vld [vmem:[#allocation55_spill] sm:$0xff]  ;;  %v3938_v20 = vld [vmem:[#allocation56_spill] sm:$0xff] }
  0x82   :  { %vm773_vm9 = vcmp.eq.f32.partialorder %v3921_v38, %v2442_v39  ;;  %vm774_vm10 = vcmp.eq.f32.partialorder %v3919_v16, %v2442_v39  ;;  %1574 = vrcp.f32 %v544_v4  ;;  %v755_v5 = vrot.slane %v754_v63, 1 }
  0x83   :  { %v561_v61 = vadd.f32 %v560_v40, %v559_v36  ;;  %vm775_vm11 = vcmp.eq.f32.partialorder %v3922_v17, %v2474_v19  ;;  %v3936_v35 = vsub.f32 2.0, %v2315_v22  ;;  %1576 = vlog2.f32 %v544_v4 }
  0x84   :  { %v762_v8 = vmax.f32 %v760_v24, %v761_v18  ;;  %vm776_vm12 = vcmp.eq.f32.partialorder %v3920_v28, %v2474_v19  ;;  %v2501_v46 = vmul.f32 %v3937_v51, %v2317_v30  ;;  %v2505_v36 = vmul.f32 %v3938_v20, %v2350_v3  ;;  %v3941_v30 = vld [vmem:[#allocation48_spill] sm:$0xff] }
  0x85   :  { %v416_v43 = vmul.f32 %v2282_v15, %v3936_v35  ;;  %1578 = vrcp.f32 %v561_v61  ;;  %v756_v40 = vmax.f32 %v754_v63, %v755_v5  ;;  %v3939_v21 = vsub.f32 2.0, %v2324_v32  ;;  %v3940_v15 = vld [vmem:[#allocation59_spill] sm:$0xff]  ;;  %v3942_v32 = vld [vmem:[#allocation60_spill] sm:$0xff]  ;;  %v3943_v63 = vld [vmem:[#allocation2_spill] sm:$0xff] }
  0x86   :  { %v2512_v24 = vmul.f32 %v3940_v15, %v2350_v3  ;;  %1580 = vlog2.f32 %v561_v61  ;;  %v763_v18 = vrot.slane %v762_v8, 1  ;;  %v782_v35 = vsel %vm766_vm2, %v3941_v30, 1073741824 }
  0x87   :  { %v417_v22 = vmul.f32 %v2293_v0, %v3939_v21  ;;  %vm777_vm13 = vcmp.eq.f32.partialorder %v3924_v37, %v756_v40  ;;  %vm778_vm14 = vcmp.eq.f32.partialorder %v3923_v59, %v756_v40  ;;  %v784_v0 = vsel %vm768_vm4, %v3941_v30, 1073741824  ;;  %v3957_v37 = vld [vmem:[#allocation62_spill] sm:$0xff]  ;;  %v3959_v40 = vld [vmem:[#allocation52_spill] sm:$0xff] }
  0x88   :  { %v2525_v21 = vmul.f32 %v3942_v32, %v416_v43  ;;  %v764_v3 = vmax.f32 %v762_v8, %v763_v18  ;;  %v781_v5 = vsel %vm765_vm1, %v3943_v63, 1073741824  ;;  %v783_v51 = vsel %vm767_vm3, %v3943_v63, 1073741824 }
  0x89   :  { %v785_v20 = vsel %vm769_vm5, %v3943_v63, 1073741824  ;;  %v786_v8 = vsel %vm770_vm6, %v3941_v30, 1073741824  ;;  %v787_v25 = vsel %vm771_vm7, %v3943_v63, 1073741824  ;;  %v788_v54 = vsel %vm772_vm8, %v3941_v30, 1073741824 }
  0x8a   :  { %vm779_vm15 = vcmp.eq.f32.partialorder %v3928_v6, %v764_v3  ;;  %vm780_vm1 = vcmp.eq.f32.partialorder %v3925_v33, %v764_v3  ;;  %v797_v15 = vsel %vm209_vm0, %v782_v35, 2147483647  ;;  %v809_v18 = vsel %vm209_vm0, %v784_v0, 2147483647 }
  0x8b   :  { %v2556_v32 = vmul.f32 %v3944_v2, %v416_v43  ;;  %v2559_v50 = vmul.f32 %v2157_v62, %v417_v22  ;;  %vm798_vm2 = vcmp.lt.s32.totalorder %v781_v5, %v797_v15  ;;  %vm810_vm3 = vcmp.lt.s32.totalorder %v783_v51, %v809_v18 }
  0x8c   :  { %v799_v11 = vsel %vm798_vm2, %v781_v5, %v797_v15  ;;  %v811_v60 = vsel %vm810_vm3, %v783_v51, %v809_v18  ;;  %v821_v26 = vsel %vm209_vm0, %v786_v8, 2147483647  ;;  %v833_v14 = vsel %vm209_vm0, %v788_v54, 2147483647  ;;  %v1575_v12 = vpop.eup %1574 }
  0x8d   :  { %v800_v47 = vrot.slane %v799_v11, 4  ;;  %v812_v53 = vrot.slane %v811_v60, 4  ;;  %vm822_vm4 = vcmp.lt.s32.totalorder %v785_v20, %v821_v26  ;;  %vm834_vm5 = vcmp.lt.s32.totalorder %v787_v25, %v833_v14  ;;  %v1577_v35 = vpop.eup %1576 }
  0x8e   :  { %v2564_v43 = vmul.f32 %v2166_v57, %v417_v22  ;;  %v564_v0 = vmul.f32 %v1575_v12, %v544_v4  ;;  %v2566_v62 = vsel %vm822_vm4, %v785_v20, %v821_v26  ;;  %v2568_v2 = vsel %vm834_vm5, %v787_v25, %v833_v14 }
  0x8f   :  { %v1579_v5 = vpop.eup %1578  ;;  %v2570_v51 = vmul.f32 0.6931472, %v1577_v35  ;;  %v2576_v8 = vsel %vm773_vm9, %v3943_v63, 1073741824  ;;  %v790_v57 = vsel %vm774_vm10, %v3941_v30, 1073741824  ;;  %v2586_v4 = vsel %vm775_vm11, %v3943_v63, 1073741824  ;;  %v3952_v35 = vld [vmem:[#allocation61_spill] sm:$0xff] }
  0x90   :  { %v1581_v14 = vpop.eup %1580  ;;  %v565_v22 = vmul.f32 %v1579_v5, %v561_v61  ;;  %v566_v20 = vsub.f32 2.0, %v564_v0  ;;  %v2592_v25 = vsel %vm776_vm12, %v3941_v30, 1073741824  ;;  %v2597_v39 = vsel %vm777_vm13, %v3943_v63, 1073741824 }
  0x91   :  { %3945 = vst [vmem:[#allocation23_spill] sm:$0xff] %v2570_v51  ;;  %3946 = vst [vmem:[#allocation49_spill] sm:$0xff] %v2597_v39  ;;  %v2599_v54 = vmul.f32 0.6931472, %v1581_v14  ;;  %v2603_v15 = vsub.f32 %v2134_v48, %v2570_v51  ;;  %vm2605_vm6 = vcmp.lt.s32.totalorder %v799_v11, %v800_v47  ;;  %vm2609_vm7 = vcmp.lt.s32.totalorder %v811_v60, %v812_v53  ;;  %v3954_v14 = vld [vmem:[#allocation64_spill] sm:$0xff]  ;;  %v3956_v48 = vld [vmem:[#allocation58_spill] sm:$0xff] }
  0x92   :  { %v567_v19 = vsub.f32 2.0, %v565_v22  ;;  %v568_v26 = vmul.f32 %v1575_v12, %v566_v20  ;;  %v2615_v0 = vsub.f32 %v3952_v35, %v2570_v51  ;;  %v2619_v28 = vsub.f32 %v3954_v14, %v2570_v51 }
  0x93   :  { %3947 = vst [vmem:[#allocation55_spill] sm:$0xff] %v2603_v15  ;;  %v596_v16 = vsub.f32 %v3956_v48, %v2599_v54  ;;  %v598_v17 = vsub.f32 %v3957_v37, %v2599_v54  ;;  %v2628_v38 = vsel %vm778_vm14, %v3941_v30, 1073741824  ;;  %v2633_v12 = vsel %vm779_vm15, %v3943_v63, 1073741824  ;;  %v3961_v48 = vld [vmem:[#allocation54_spill] sm:$0xff] }
  0x94   :  { %3953 = vst [vmem:[#allocation56_spill] sm:$0xff] %v2615_v0  ;;  %3955 = vst [vmem:[#allocation59_spill] sm:$0xff] %v2619_v28  ;;  %v569_v22 = vmul.f32 %v1579_v5, %v567_v19  ;;  %v2638_v20 = vsel %vm780_vm1, %v3941_v30, 1073741824  ;;  %v2642_v37 = vsel %vm209_vm0, %v790_v57, 2147483647  ;;  %v2646_v14 = vsub.f32 %v3959_v40, %v2570_v51  ;;  %v3963_v40 = vld [vmem:[#allocation53_spill] sm:$0xff] }
  0x95   :  { %3958 = vst [vmem:[#allocation60_spill] sm:$0xff] %v2633_v12  ;;  %v2650_v59 = vsub.f32 %v3961_v48, %v2570_v51  ;;  %v2654_v5 = vsel %vm2605_vm6, %v799_v11, %v800_v47  ;;  %v2658_v3 = vsel %vm2609_vm7, %v811_v60, %v812_v53  ;;  %v2661_v19 = vmul.f32 %v2388_v31, %v568_v26  ;;  %v3964_v48 = vld [vmem:[#allocation57_spill] sm:$0xff]  ;;  %v3976_v63 = vld [vmem:[#allocation78_spill] sm:$0xff]  ;;  %v3978_v12 = vld [vmem:[#allocation80_spill] sm:$0xff] }
  0x96   :  { %3960 = vst [vmem:[#allocation63_spill] sm:$0xff] %v2646_v14  ;;  %v2664_v57 = vmul.f32 %v2397_v13, %v568_v26  ;;  %v592_v35 = vsub.f32 %v3963_v40, %v2599_v54  ;;  %v594_v33 = vsub.f32 %v3964_v48, %v2599_v54  ;;  %v571_v61 = vmul.f32 %v2391_v56, %v569_v22  ;;  %v3967_v40 = vld [vmem:[#allocation36_spill] sm:$0xff] }
  0x97   :  { %3962 = vst [vmem:[#allocation61_spill] sm:$0xff] %v2650_v59  ;;  %v573_v47 = vmul.f32 %v2402_v55, %v569_v22  ;;  %v2673_v11 = vmul.f32 %v2409_v27, %v568_v26  ;;  %v2676_v60 = vmul.f32 %v2419_v10, %v568_v26  ;;  %v575_v53 = vmul.f32 %v2414_v9, %v569_v22 }
  0x98   :  { %v2680_v31 = vmul.f32 %v2426_v23, %v568_v26  ;;  %v2683_v13 = vmul.f32 %v2438_v42, %v568_v26  ;;  %v2686_v18 = vmul.f32 %v2476_v44, %v568_v26  ;;  %v577_v56 = vmul.f32 %v2423_v29, %v569_v22  ;;  %v3973_v44 = vld [vmem:[#allocation68_spill] sm:$0xff] }
  0x99   :  { %v579_v55 = vmul.f32 %v2434_v52, %v569_v22  ;;  %v581_v27 = vmul.f32 %v2448_v41, %v569_v22  ;;  %v2693_v10 = vsub.f32 %v2196_v1, %v2570_v51  ;;  %v583_v9 = vmul.f32 %v2460_v49, %v569_v22  ;;  %v3968_v52 = vld [vmem:[#allocation37_spill] sm:$0xff]  ;;  %v3970_v49 = vld [vmem:[#allocation66_spill] sm:$0xff] }
  0x9a   :  { %3965 = vst [vmem:[#allocation64_spill] sm:$0xff] %v2686_v18  ;;  %v585_v23 = vmul.f32 %v2471_v45, %v569_v22  ;;  %v606_v42 = vsub.f32 %v2200_v34, %v2599_v54  ;;  %v2702_v29 = vmul.f32 %v3967_v40, %v568_v26  ;;  %v2705_v48 = vmul.f32 %v3968_v52, %v568_v26  ;;  %v3969_v1 = vld [vmem:[#allocation65_spill] sm:$0xff]  ;;  %v3972_v34 = vld [vmem:[#allocation67_spill] sm:$0xff] }
  0x9b   :  { %3966 = vst [vmem:[#allocation58_spill] sm:$0xff] %v2693_v10  ;;  %v622_v41 = vmul.f32 0.0, %v571_v61  ;;  %v624_v18 = vmul.f32 0.0, %v573_v47  ;;  %v600_v6 = vsub.f32 %v3969_v1, %v2599_v54  ;;  %v2711_v45 = vsub.f32 %v3970_v49, %v2570_v51  ;;  %v3975_v26 = vld [vmem:[#allocation69_spill] sm:$0xff] }
  0x9c   :  { %v602_v22 = vsub.f32 %v3972_v34, %v2599_v54  ;;  %v626_v58 = vmul.f32 0.0, %v575_v53  ;;  %v2717_v40 = vsub.f32 %v3973_v44, %v2570_v51  ;;  %v604_v52 = vsub.f32 %v3975_v26, %v2599_v54  ;;  %v3979_v53 = vld [vmem:[#allocation82_spill] sm:$0xff]  ;;  %v3983_v54 = vld [vmem:[#allocation45_spill] sm:$0xff] }
  0x9d   :  { %3971 = vst [vmem:[#allocation62_spill] sm:$0xff] %v2711_v45  ;;  %v628_v61 = vmul.f32 0.0, %v577_v56  ;;  %v630_v47 = vmul.f32 0.0, %v579_v55  ;;  %v632_v7 = vmul.f32 0.0, %v581_v27  ;;  %v634_v30 = vmul.f32 0.0, %v583_v9  ;;  %v3981_v44 = vld [vmem:[#allocation86_spill] sm:$0xff] }
  0x9e   :  { %3974 = vst [vmem:[#allocation52_spill] sm:$0xff] %v2717_v40  ;;  %v636_v1 = vmul.f32 0.0, %v585_v23  ;;  %v2723_v49 = vmax.f32 %v3976_v63, %v2661_v19  ;;  %v2726_v39 = vmax.f32 %v3978_v12, %v622_v41  ;;  %v2730_v34 = vmax.f32 %v3979_v53, %v2664_v57  ;;  %v3985_v55 = vld [vmem:[#allocation46_spill] sm:$0xff]  ;;  %v3987_v9 = vld [vmem:[#allocation47_spill] sm:$0xff] }
  0x9f   :  { %v2733_v51 = vmax.f32 %v3981_v44, %v624_v18  ;;  %v2737_v56 = vmax.f32 %v3983_v54, %v2673_v11  ;;  %v2740_v27 = vmax.f32 %v3985_v55, %v626_v58  ;;  %v2744_v23 = vmax.f32 %v3987_v9, %v2676_v60 }
  0xa0   :  { %3977 = vst [vmem:[#allocation54_spill] sm:$0xff] %v2723_v49  ;;  %3980 = vst [vmem:[#allocation53_spill] sm:$0xff] %v2730_v34  ;;  %v2746_v12 = vadd.f32 -1e+30, %v592_v35  ;;  %v2748_v41 = vadd.f32 -1e+30, %v594_v33  ;;  %v2802_v15 = vmax.f32 %v2501_v46, %v630_v47  ;;  %v2816_v0 = vmax.f32 %v2556_v32, %v634_v30 }
  0xa1   :  { %3982 = vst [vmem:[#allocation57_spill] sm:$0xff] %v2733_v51  ;;  %3984 = vst [vmem:[#allocation36_spill] sm:$0xff] %v2737_v56  ;;  %v2750_v26 = vadd.f32 -1e+30, %v596_v16  ;;  %v2752_v34 = vadd.f32 -1e+30, %v598_v17  ;;  %v2820_v45 = vmax.f32 %v2559_v50, %v2705_v48  ;;  %v2823_v46 = vmax.f32 %v2564_v43, %v636_v1 }
  0xa2   :  { %3986 = vst [vmem:[#allocation37_spill] sm:$0xff] %v2740_v27  ;;  %3988 = vst [vmem:[#allocation65_spill] sm:$0xff] %v2744_v23  ;;  %v2754_v18 = vadd.f32 -1e+30, %v600_v6  ;;  %v2758_v51 = vadd.f32 -1e+30, %v602_v22  ;;  %v685_v47 = vsub.f32 %v2661_v19, %v3976_v63  ;;  %v688_v30 = vsub.f32 %v2676_v60, %v3987_v9 }
  0xa3   :  { %3989 = vst [vmem:[#allocation66_spill] sm:$0xff] %v2746_v12  ;;  %3990 = vst [vmem:[#allocation67_spill] sm:$0xff] %v2748_v41  ;;  %v2760_v58 = vadd.f32 -1e+30, %v604_v52  ;;  %v2762_v55 = vadd.f32 -1e+30, %v606_v42  ;;  %vm846_vm9 = vcmp.lt.s32.totalorder %v2576_v8, %v2642_v37 }
  0xa4   :  { %3991 = vst [vmem:[#allocation68_spill] sm:$0xff] %v2750_v26  ;;  %3992 = vst [vmem:[#allocation69_spill] sm:$0xff] %v2752_v34  ;;  %v4011_v52 = vld [vmem:[#allocation50_spill] sm:$0xff]  ;;  %v4012_v12 = vld [vmem:[#allocation51_spill] sm:$0xff]  ;;  %v2806_v26 = vmax.f32 %v2505_v36, %v2683_v13  ;;  %v4015_v32 = vrot.slane %v2566_v62, 4  ;;  %v815_v9 = vrot.slane %v2658_v3, 2  ;;  %v847_v40 = vsel %vm846_vm9, %v2576_v8, %v2642_v37 }
  0xa5   :  { %3993 = vst [vmem:[#allocation78_spill] sm:$0xff] %v2754_v18  ;;  %3995 = vst [vmem:[#allocation80_spill] sm:$0xff] %v2758_v51  ;;  %v2791_v44 = vmax.f32 %v4011_v52, %v628_v61  ;;  %v2795_v34 = vmax.f32 %v4012_v12, %v2680_v31  ;;  %v2809_v61 = vmax.f32 %v2512_v24, %v632_v7  ;;  %v803_v18 = vrot.slane %v2654_v5, 2 }
  0xa6   :  { %3996 = vst [vmem:[#allocation82_spill] sm:$0xff] %v2760_v58  ;;  %3997 = vst [vmem:[#allocation86_spill] sm:$0xff] %v2762_v55  ;;  %v2813_v52 = vmax.f32 %v2525_v21, %v2702_v29  ;;  %v686_v7 = vsub.f32 %v2664_v57, %v3979_v53  ;;  %v687_v24 = vsub.f32 %v2673_v11, %v3983_v54  ;;  %v4016_v53 = vmov %v4015_v32 }
  0xa7   :  { %vm825_vm8 = vcmp.lt.s32.totalorder %v2566_v62, %v4015_v32  ;;  %v689_v43 = vsub.f32 %v2680_v31, %v4012_v12  ;;  %v836_v32 = vrot.slane %v2568_v2, 4  ;;  %v857_v12 = vsel %vm209_vm0, %v2592_v25, 2147483647 }
  0xa8   :  { %v826_v54 = vsel %vm825_vm8, %v2566_v62, %v4016_v53  ;;  %v869_v63 = vsel %vm209_vm0, %v2628_v38, 2147483647  ;;  %v881_v1 = vsel %vm209_vm0, %v2638_v20, 2147483647  ;;  %vm804_vm10 = vcmp.lt.s32.totalorder %v2654_v5, %v803_v18  ;;  %v4018_v62 = vld [vmem:[#allocation49_spill] sm:$0xff] }
  0xa9   :  { %v827_v55 = vrot.slane %v826_v54, 2  ;;  %vm816_vm11 = vcmp.lt.s32.totalorder %v2658_v3, %v815_v9  ;;  %vm837_vm13 = vcmp.lt.s32.totalorder %v2568_v2, %v836_v32  ;;  %v805_v53 = vsel %vm804_vm10, %v2654_v5, %v803_v18  ;;  %v4019_v5 = vld [vmem:[#allocation60_spill] sm:$0xff]  ;;  %v4029_v59 = vld [vmem:[#allocation57_spill] sm:$0xff] }
  0xaa   :  { %v2863_v25 = vsel %vm816_vm11, %v2658_v3, %v815_v9  ;;  %v838_v38 = vsel %vm837_vm13, %v2568_v2, %v836_v32  ;;  %v2866_v58 = vand.u32 2147483647, %v685_v47  ;;  %v806_v20 = vrot.slane %v805_v53, 1  ;;  %v4030_v22 = vld [vmem:[#allocation37_spill] sm:$0xff] }
  0xab   :  { %vm828_vm12 = vcmp.lt.s32.totalorder %v826_v54, %v827_v55  ;;  %v839_v10 = vrot.slane %v838_v38, 2  ;;  %vm858_vm14 = vcmp.lt.s32.totalorder %v2586_v4, %v857_v12  ;;  %vm870_vm15 = vcmp.lt.s32.totalorder %v4018_v62, %v869_v63 }
  0xac   :  { %4017 = vst [vmem:[#allocation45_spill] sm:$0xff] %v2866_v58  ;;  %v829_v51 = vsel %vm828_vm12, %v826_v54, %v827_v55  ;;  %vm882_vm1 = vcmp.lt.s32.totalorder %v4019_v5, %v881_v1  ;;  %v2876_v3 = vand.u32 2147483647, %v686_v7  ;;  %v2878_v2 = vand.u32 2147483647, %v687_v24 }
  0xad   :  { %v818_v18 = vrot.slane %v2863_v25, 1  ;;  %vm840_vm2 = vcmp.lt.s32.totalorder %v838_v38, %v839_v10  ;;  %v2881_v55 = vand.u32 2147483647, %v688_v30  ;;  %v2883_v47 = vand.u32 2147483647, %v689_v43 }
  0xae   :  { %4020 = vst [vmem:[#allocation46_spill] sm:$0xff] %v2876_v3  ;;  %4021 = vst [vmem:[#allocation47_spill] sm:$0xff] %v2878_v2  ;;  %vm2885_vm3 = vcmp.lt.s32.totalorder %v805_v53, %v806_v20  ;;  %v830_v8 = vrot.slane %v829_v51, 1  ;;  %v841_v37 = vsel %vm840_vm2, %v838_v38, %v839_v10  ;;  %v848_v9 = vrot.slane %v847_v40, 4  ;;  %v4028_v10 = vld [vmem:[#allocation54_spill] sm:$0xff] }
  0xaf   :  { %4022 = vst [vmem:[#allocation50_spill] sm:$0xff] %v2881_v55  ;;  %4023 = vst [vmem:[#allocation51_spill] sm:$0xff] %v2883_v47  ;;  %v859_v32 = vsel %vm858_vm14, %v2586_v4, %v857_v12  ;;  %v871_v7 = vsel %vm870_vm15, %v4018_v62, %v869_v63  ;;  %v883_v3 = vsel %vm882_vm1, %v4019_v5, %v881_v1  ;;  %v893_v30 = vsel %vm209_vm0, %v2726_v39, -inf }
  0xb0   :  { %v860_v24 = vrot.slane %v859_v32, 4  ;;  %v872_v2 = vrot.slane %v871_v7, 4  ;;  %vm2895_vm4 = vcmp.lt.s32.totalorder %v2863_v25, %v818_v18  ;;  %vm849_vm5 = vcmp.lt.s32.totalorder %v847_v40, %v848_v9 }
  0xb1   :  { %v884_v47 = vrot.slane %v883_v3, 4  ;;  %v894_v38 = vmax.f32 %v4028_v10, %v893_v30  ;;  %v842_v55 = vrot.slane %v841_v37, 1  ;;  %v850_v4 = vsel %vm849_vm5, %v847_v40, %v848_v9 }
  0xb2   :  { %vm861_vm6 = vcmp.lt.s32.totalorder %v859_v32, %v860_v24  ;;  %vm873_vm7 = vcmp.lt.s32.totalorder %v871_v7, %v872_v2  ;;  %v851_v63 = vrot.slane %v850_v4, 2  ;;  %v901_v14 = vsel %vm209_vm0, %v4029_v59, -inf }
  0xb3   :  { %v862_v12 = vsel %vm861_vm6, %v859_v32, %v860_v24  ;;  %v874_v62 = vsel %vm873_vm7, %v871_v7, %v872_v2  ;;  %vm885_vm8 = vcmp.lt.s32.totalorder %v883_v3, %v884_v47  ;;  %v895_v28 = vrot.slane %v894_v38, 4  ;;  %v4032_v24 = vld [vmem:[#allocation53_spill] sm:$0xff] }
  0xb4   :  { %v863_v1 = vrot.slane %v862_v12, 2  ;;  %v875_v5 = vrot.slane %v874_v62, 2  ;;  %v886_v58 = vsel %vm885_vm8, %v883_v3, %v884_v47  ;;  %vm852_vm9 = vcmp.lt.s32.totalorder %v850_v4, %v851_v63 }
  0xb5   :  { %v887_v41 = vrot.slane %v886_v58, 2  ;;  %v909_v30 = vsel %vm209_vm0, %v4030_v22, -inf  ;;  %v853_v49 = vsel %vm852_vm9, %v850_v4, %v851_v63  ;;  %v896_v40 = vmax.f32 %v894_v38, %v895_v28  ;;  %v4033_v63 = vld [vmem:[#allocation36_spill] sm:$0xff] }
  0xb6   :  { %vm864_vm10 = vcmp.lt.s32.totalorder %v862_v12, %v863_v1  ;;  %vm876_vm11 = vcmp.lt.s32.totalorder %v874_v62, %v875_v5  ;;  %vm831_vm12 = vcmp.lt.s32.totalorder %v829_v51, %v830_v8  ;;  %vm843_vm13 = vcmp.lt.s32.totalorder %v841_v37, %v842_v55 }
  0xb7   :  { %v854_v2 = vrot.slane %v853_v49, 1  ;;  %vm888_vm14 = vcmp.lt.s32.totalorder %v886_v58, %v887_v41  ;;  %v2904_v9 = vsel %vm864_vm10, %v862_v12, %v863_v1  ;;  %v2906_v3 = vsel %vm876_vm11, %v874_v62, %v875_v5 }
  0xb8   :  { %v2908_v47 = vsel %vm888_vm14, %v886_v58, %v887_v41  ;;  %v897_v32 = vrot.slane %v896_v40, 2  ;;  %v2912_v7 = vsel %vm2885_vm3, %v805_v53, %v806_v20  ;;  %v902_v4 = vmax.f32 %v4032_v24, %v901_v14 }
  0xb9   :  { %4031 = vst [vmem:[#allocation49_spill] sm:$0xff] %v2912_v7  ;;  %vm855_vm15 = vcmp.lt.s32.totalorder %v853_v49, %v854_v2  ;;  %v910_v28 = vmax.f32 %v4033_v63, %v909_v30  ;;  %v2919_v38 = vsel %vm2895_vm4, %v2863_v25, %v818_v18  ;;  %v2921_v12 = vsel %vm831_vm12, %v829_v51, %v830_v8  ;;  %v4038_v51 = vld [vmem:[#allocation65_spill] sm:$0xff] }
  0xba   :  { %4034 = vst [vmem:[#allocation60_spill] sm:$0xff] %v2919_v38  ;;  %4035 = vst [vmem:[#allocation54_spill] sm:$0xff] %v2921_v12  ;;  %v2923_v62 = vsel %vm843_vm13, %v841_v37, %v842_v55  ;;  %v898_v41 = vmax.f32 %v896_v40, %v897_v32  ;;  %v903_v54 = vrot.slane %v902_v4, 4  ;;  %v2928_v14 = vsel %vm855_vm15, %v853_v49, %v854_v2 }
  0xbb   :  { %4036 = vst [vmem:[#allocation57_spill] sm:$0xff] %v2923_v62  ;;  %4037 = vst [vmem:[#allocation37_spill] sm:$0xff] %v2928_v14  ;;  %v911_v5 = vrot.slane %v910_v28, 4  ;;  %v917_v25 = vsel %vm209_vm0, %v2791_v44, -inf  ;;  %v925_v55 = vsel %vm209_vm0, %v2802_v15, -inf  ;;  %v933_v37 = vsel %vm209_vm0, %v2809_v61, -inf }
  0xbc   :  { %v899_v1 = vrot.slane %v898_v41, 1  ;;  %v904_v18 = vmax.f32 %v902_v4, %v903_v54  ;;  %v918_v8 = vmax.f32 %v4038_v51, %v917_v25  ;;  %v926_v40 = vmax.f32 %v2795_v34, %v925_v55 }
  0xbd   :  { %v912_v30 = vmax.f32 %v910_v28, %v911_v5  ;;  %v934_v49 = vmax.f32 %v2806_v26, %v933_v37  ;;  %v941_v20 = vsel %vm209_vm0, %v2816_v0, -inf  ;;  %v949_v4 = vsel %vm209_vm0, %v2823_v46, -inf }
  0xbe   :  { %v900_v43 = vmax.f32 %v898_v41, %v899_v1  ;;  %v905_v2 = vrot.slane %v904_v18, 2  ;;  %v919_v32 = vrot.slane %v918_v8, 4  ;;  %v927_v25 = vrot.slane %v926_v40, 4 }
  0xbf   :  { %v913_v54 = vrot.slane %v912_v30, 2  ;;  %v935_v53 = vrot.slane %v934_v49, 4  ;;  %v942_v58 = vmax.f32 %v2813_v52, %v941_v20  ;;  %v950_v28 = vmax.f32 %v2820_v45, %v949_v4 }
  0xc0   :  { %v906_v27 = vmax.f32 %v904_v18, %v905_v2  ;;  %v920_v41 = vmax.f32 %v918_v8, %v919_v32  ;;  %vm957_vm1 = vcmp.eq.f32.partialorder %v4028_v10, %v900_v43  ;;  %v928_v5 = vmax.f32 %v926_v40, %v927_v25  ;;  %v4039_v2 = vld [vmem:[#allocation2_spill] sm:$0xff] }
  0xc1   :  { %v914_v1 = vmax.f32 %v912_v30, %v913_v54  ;;  %v936_v55 = vmax.f32 %v934_v49, %v935_v53  ;;  %v943_v37 = vrot.slane %v942_v58, 4  ;;  %v951_v42 = vrot.slane %v950_v28, 4 }
  0xc2   :  { %v907_v16 = vrot.slane %v906_v27, 1  ;;  %v921_v23 = vrot.slane %v920_v41, 2  ;;  %vm958_vm2 = vcmp.eq.f32.partialorder %v2726_v39, %v900_v43  ;;  %v929_v6 = vrot.slane %v928_v5, 2 }
  0xc3   :  { %v915_v56 = vrot.slane %v914_v1, 1  ;;  %v937_v17 = vrot.slane %v936_v55, 2  ;;  %v944_v33 = vmax.f32 %v942_v58, %v943_v37  ;;  %v952_v8 = vmax.f32 %v950_v28, %v951_v42 }
  0xc4   :  { %v908_v20 = vmax.f32 %v906_v27, %v907_v16  ;;  %v922_v18 = vmax.f32 %v920_v41, %v921_v23  ;;  %v973_v32 = vsel %vm957_vm1, %v4039_v2, 1073741824  ;;  %v930_v40 = vmax.f32 %v928_v5, %v929_v6  ;;  %v4040_v16 = vld [vmem:[#allocation48_spill] sm:$0xff] }
  0xc5   :  { %v916_v30 = vmax.f32 %v914_v1, %v915_v56  ;;  %v938_v53 = vmax.f32 %v936_v55, %v937_v17  ;;  %v945_v49 = vrot.slane %v944_v33, 2  ;;  %v953_v54 = vrot.slane %v952_v8, 2 }
  0xc6   :  { %v923_v4 = vrot.slane %v922_v18, 1  ;;  %vm959_vm3 = vcmp.eq.f32.partialorder %v4032_v24, %v908_v20  ;;  %vm960_vm4 = vcmp.eq.f32.partialorder %v4029_v59, %v908_v20  ;;  %v931_v25 = vrot.slane %v930_v40, 1 }
  0xc7   :  { %v939_v35 = vrot.slane %v938_v53, 1  ;;  %v946_v58 = vmax.f32 %v944_v33, %v945_v49  ;;  %vm961_vm5 = vcmp.eq.f32.partialorder %v4033_v63, %v916_v30  ;;  %v954_v23 = vmax.f32 %v952_v8, %v953_v54 }
  0xc8   :  { %v924_v27 = vmax.f32 %v922_v18, %v923_v4  ;;  %vm962_vm6 = vcmp.eq.f32.partialorder %v4030_v22, %v916_v30  ;;  %v974_v56 = vsel %vm958_vm2, %v4040_v16, 1073741824  ;;  %v932_v17 = vmax.f32 %v930_v40, %v931_v25 }
  0xc9   :  { %v940_v6 = vmax.f32 %v938_v53, %v939_v35  ;;  %v947_v42 = vrot.slane %v946_v58, 1  ;;  %v975_v10 = vsel %vm959_vm3, %v4039_v2, 1073741824  ;;  %v955_v24 = vrot.slane %v954_v23, 1 }
  0xca   :  { %vm963_vm7 = vcmp.eq.f32.partialorder %v4038_v51, %v924_v27  ;;  %vm964_vm8 = vcmp.eq.f32.partialorder %v2791_v44, %v924_v27  ;;  %v976_v33 = vsel %vm960_vm4, %v4040_v16, 1073741824  ;;  %vm965_vm9 = vcmp.eq.f32.partialorder %v2795_v34, %v932_v17 }
  0xcb   :  { %v948_v41 = vmax.f32 %v946_v58, %v947_v42  ;;  %vm966_vm10 = vcmp.eq.f32.partialorder %v2802_v15, %v932_v17  ;;  %vm967_vm11 = vcmp.eq.f32.partialorder %v2806_v26, %v940_v6  ;;  %v956_v39 = vmax.f32 %v954_v23, %v955_v24 }
  0xcc   :  { %vm968_vm12 = vcmp.eq.f32.partialorder %v2809_v61, %v940_v6  ;;  %v977_v35 = vsel %vm961_vm5, %v4039_v2, 1073741824  ;;  %v978_v44 = vsel %vm962_vm6, %v4040_v16, 1073741824  ;;  %v979_v59 = vsel %vm963_vm7, %v4039_v2, 1073741824 }
  0xcd   :  { %vm969_vm13 = vcmp.eq.f32.partialorder %v2813_v52, %v948_v41  ;;  %vm970_vm14 = vcmp.eq.f32.partialorder %v2816_v0, %v948_v41  ;;  %v980_v15 = vsel %vm964_vm8, %v4040_v16, 1073741824  ;;  %vm971_vm15 = vcmp.eq.f32.partialorder %v2820_v45, %v956_v39 }
  0xce   :  { %vm972_vm1 = vcmp.eq.f32.partialorder %v2823_v46, %v956_v39  ;;  %v981_v34 = vsel %vm965_vm9, %v4039_v2, 1073741824  ;;  %v982_v26 = vsel %vm966_vm10, %v4040_v16, 1073741824  ;;  %v983_v61 = vsel %vm967_vm11, %v4039_v2, 1073741824 }
  0xcf   :  { %v984_v22 = vsel %vm968_vm12, %v4040_v16, 1073741824  ;;  %v2984_v52 = vsel %vm969_vm13, %v4039_v2, 1073741824  ;;  %v2987_v0 = vsel %vm970_vm14, %v4040_v16, 1073741824  ;;  %v2990_v63 = vsel %vm971_vm15, %v4039_v2, 1073741824 }
  0xd0   :  { %v2993_v45 = vsel %vm972_vm1, %v4040_v16, 1073741824  ;;  %v989_v46 = vsel %vm209_vm0, %v974_v56, 2147483647  ;;  %v1001_v51 = vsel %vm209_vm0, %v976_v33, 2147483647  ;;  %v4041_v56 = vrot.slane %v2904_v9, 1 }
  0xd1   :  { %vm990_vm2 = vcmp.lt.s32.totalorder %v973_v32, %v989_v46  ;;  %vm1002_vm3 = vcmp.lt.s32.totalorder %v975_v10, %v1001_v51  ;;  %v1013_v43 = vsel %vm209_vm0, %v978_v44, 2147483647  ;;  %v1025_v28 = vsel %vm209_vm0, %v980_v15, 2147483647 }
  0xd2   :  { %v991_v1 = vsel %vm990_vm2, %v973_v32, %v989_v46  ;;  %v1003_v5 = vsel %vm1002_vm3, %v975_v10, %v1001_v51  ;;  %vm1014_vm4 = vcmp.lt.s32.totalorder %v977_v35, %v1013_v43  ;;  %vm1026_vm5 = vcmp.lt.s32.totalorder %v979_v59, %v1025_v28 }
  0xd3   :  { %v992_v55 = vrot.slane %v991_v1, 4  ;;  %v1004_v37 = vrot.slane %v1003_v5, 4  ;;  %v1015_v20 = vsel %vm1014_vm4, %v977_v35, %v1013_v43  ;;  %v1027_v18 = vsel %vm1026_vm5, %v979_v59, %v1025_v28 }
  0xd4   :  { %v1016_v8 = vrot.slane %v1015_v20, 4  ;;  %v1028_v2 = vrot.slane %v1027_v18, 4  ;;  %v1037_v30 = vsel %vm209_vm0, %v982_v26, 2147483647  ;;  %v1049_v40 = vsel %vm209_vm0, %v984_v22, 2147483647 }
  0xd5   :  { %vm993_vm6 = vcmp.lt.s32.totalorder %v991_v1, %v992_v55  ;;  %vm1005_vm7 = vcmp.lt.s32.totalorder %v1003_v5, %v1004_v37  ;;  %vm1038_vm8 = vcmp.lt.s32.totalorder %v981_v34, %v1037_v30  ;;  %vm1050_vm9 = vcmp.lt.s32.totalorder %v983_v61, %v1049_v40 }
  0xd6   :  { %v994_v53 = vsel %vm993_vm6, %v991_v1, %v992_v55  ;;  %v1006_v49 = vsel %vm1005_vm7, %v1003_v5, %v1004_v37  ;;  %vm1017_vm10 = vcmp.lt.s32.totalorder %v1015_v20, %v1016_v8  ;;  %vm1029_vm11 = vcmp.lt.s32.totalorder %v1027_v18, %v1028_v2 }
  0xd7   :  { %v995_v32 = vrot.slane %v994_v53, 2  ;;  %v1007_v4 = vrot.slane %v1006_v49, 2  ;;  %v1018_v54 = vsel %vm1017_vm10, %v1015_v20, %v1016_v8  ;;  %v1030_v25 = vsel %vm1029_vm11, %v1027_v18, %v1028_v2 }
  0xd8   :  { %v1019_v58 = vrot.slane %v1018_v54, 2  ;;  %v1031_v27 = vrot.slane %v1030_v25, 2  ;;  %v1039_v23 = vsel %vm1038_vm8, %v981_v34, %v1037_v30  ;;  %v1051_v16 = vsel %vm1050_vm9, %v983_v61, %v1049_v40 }
  0xd9   :  { %vm3004_vm12 = vcmp.lt.s32.totalorder %v2904_v9, %v4041_v56  ;;  %vm996_vm13 = vcmp.lt.s32.totalorder %v994_v53, %v995_v32  ;;  %vm1008_vm14 = vcmp.lt.s32.totalorder %v1006_v49, %v1007_v4  ;;  %v1040_v6 = vrot.slane %v1039_v23, 4 }
  0xda   :  { %v1052_v42 = vrot.slane %v1051_v16, 4  ;;  %v997_v10 = vsel %vm996_vm13, %v994_v53, %v995_v32  ;;  %v1009_v24 = vsel %vm1008_vm14, %v1006_v49, %v1007_v4  ;;  %vm1020_vm15 = vcmp.lt.s32.totalorder %v1018_v54, %v1019_v58 }
  0xdb   :  { %vm1032_vm1 = vcmp.lt.s32.totalorder %v1030_v25, %v1031_v27  ;;  %v998_v33 = vrot.slane %v997_v10, 1  ;;  %v1010_v41 = vrot.slane %v1009_v24, 1  ;;  %v1021_v39 = vsel %vm1020_vm15, %v1018_v54, %v1019_v58  ;;  %v4055_v54 = vld [vmem:[#allocation19_spill] sm:$0xff] }
  0xdc   :  { %v1033_v35 = vsel %vm1032_vm1, %v1030_v25, %v1031_v27  ;;  %v1022_v44 = vrot.slane %v1021_v39, 1  ;;  %vm1041_vm2 = vcmp.lt.s32.totalorder %v1039_v23, %v1040_v6  ;;  %vm1053_vm3 = vcmp.lt.s32.totalorder %v1051_v16, %v1052_v42  ;;  %v4056_v25 = vld [vmem:[#allocation27_spill] sm:$0xff] }
  0xdd   :  { %v1034_v59 = vrot.slane %v1033_v35, 1  ;;  %vm999_vm4 = vcmp.lt.s32.totalorder %v997_v10, %v998_v33  ;;  %vm1011_vm5 = vcmp.lt.s32.totalorder %v1009_v24, %v1010_v41  ;;  %v1042_v15 = vsel %vm1041_vm2, %v1039_v23, %v1040_v6 }
  0xde   :  { %v1054_v34 = vsel %vm1053_vm3, %v1051_v16, %v1052_v42  ;;  %v3008_v26 = vsel %vm999_vm4, %v997_v10, %v998_v33  ;;  %v3010_v61 = vsel %vm1011_vm5, %v1009_v24, %v1010_v41  ;;  %vm1023_vm6 = vcmp.lt.s32.totalorder %v1021_v39, %v1022_v44  ;;  %v4066_v33 = vld [vmem:[#allocation29_spill] sm:$0xff]  ;;  %v4067_v41 = vld [vmem:[#allocation31_spill] sm:$0xff] }
  0xdf   :  { %4044 = vst [vmem:[#allocation53_spill] sm:$0xff] %v3008_v26  ;;  %4045 = vst [vmem:[#allocation36_spill] sm:$0xff] %v3010_v61  ;;  %vm1035_vm7 = vcmp.lt.s32.totalorder %v1033_v35, %v1034_v59  ;;  %v3012_v22 = vsel %vm1023_vm6, %v1021_v39, %v1022_v44  ;;  %v1043_v51 = vrot.slane %v1042_v15, 2  ;;  %v1055_v43 = vrot.slane %v1054_v34, 2 }
  0xe0   :  { %4046 = vst [vmem:[#allocation65_spill] sm:$0xff] %v3012_v22  ;;  %v3014_v46 = vsel %vm1035_vm7, %v1033_v35, %v1034_v59  ;;  %1158 = vst [vmem:[%s3600_s5] sm:$0x1] %v3008_v26  ;;  %v1061_v28 = vsel %vm209_vm0, %v2987_v0, 2147483647  ;;  %v1073_v1 = vsel %vm209_vm0, %v2993_v45, 2147483647  ;;  %vm1085_vm8 = vcmp.eq.s32.totalorder %v3008_v26, %v2912_v7 }
  0xe1   :  { %4047 = vst [vmem:[#allocation2_spill] sm:$0xff] %v3014_v46  ;;  %1159 = vst [vmem:[%s3600_s5 + $0x1] sm:$0x1] %v3010_v61  ;;  %vm1086_vm9 = vcmp.eq.s32.totalorder %v3010_v61, %v2919_v38  ;;  %vm1044_vm10 = vcmp.lt.s32.totalorder %v1042_v15, %v1043_v51  ;;  %vm1056_vm11 = vcmp.lt.s32.totalorder %v1054_v34, %v1055_v43  ;;  %v4048_v2 = vmov %v4041_v56 }
  0xe2   :  { %1160 = vst [vmem:[%s3600_s5 + $0x2] sm:$0x1] %v3012_v22  ;;  %1161 = vst [vmem:[%s3600_s5 + $0x3] sm:$0x1] %v3014_v46  ;;  %vm1062_vm13 = vcmp.lt.s32.totalorder %v2984_v52, %v1061_v28  ;;  %vm1074_vm14 = vcmp.lt.s32.totalorder %v2990_v63, %v1073_v1  ;;  %v1045_v0 = vsel %vm1044_vm10, %v1042_v15, %v1043_v51  ;;  %v4050_v40 = vrot.slane %v2906_v3, 1 }
  0xe3   :  { %v1057_v45 = vsel %vm1056_vm11, %v1054_v34, %v1055_v43  ;;  %v1063_v5 = vsel %vm1062_vm13, %v2984_v52, %v1061_v28  ;;  %v1075_v55 = vsel %vm1074_vm14, %v2990_v63, %v1073_v1  ;;  %v1046_v37 = vrot.slane %v1045_v0, 1  ;;  %v4070_v34 = vld [vmem:[#allocation33_spill] sm:$0xff] }
  0xe4   :  { %v1058_v20 = vrot.slane %v1057_v45, 1  ;;  %v1064_v18 = vrot.slane %v1063_v5, 4  ;;  %v1076_v8 = vrot.slane %v1075_v55, 4  ;;  %v3049_v30 = vsel %vm3004_vm12, %v2904_v9, %v4048_v2 }
  0xe5   :  { %4049 = vst [vmem:[#allocation48_spill] sm:$0xff] %v3049_v30  ;;  %vm3054_vm15 = vcmp.lt.s32.totalorder %v2906_v3, %v4050_v40  ;;  %vm1087_vm1 = vcmp.eq.s32.totalorder %v3012_v22, %v2921_v12  ;;  %vm1088_vm2 = vcmp.eq.s32.totalorder %v3014_v46, %v2923_v62  ;;  %vm1047_vm3 = vcmp.lt.s32.totalorder %v1045_v0, %v1046_v37  ;;  %v4105_v62 = vld [vmem:[#allocation44_spill] sm:$0xff] }
  0xe6   :  { %vm1059_vm4 = vcmp.lt.s32.totalorder %v1057_v45, %v1058_v20  ;;  %vm1065_vm5 = vcmp.lt.s32.totalorder %v1063_v5, %v1064_v18  ;;  %vm1077_vm6 = vcmp.lt.s32.totalorder %v1075_v55, %v1076_v8  ;;  %v3062_v52 = vsel %vm1047_vm3, %v1045_v0, %v1046_v37  ;;  %v4074_v37 = vld [vmem:[#allocation39_spill] sm:$0xff] }
  0xe7   :  { %4053 = vst [vmem:[#allocation87_spill] sm:$0xff] %v3062_v52  ;;  %v3064_v9 = vsel %vm1059_vm4, %v1057_v45, %v1058_v20  ;;  %v1066_v63 = vsel %vm1065_vm5, %v1063_v5, %v1064_v18  ;;  %v1078_v49 = vsel %vm1077_vm6, %v1075_v55, %v1076_v8  ;;  %vm1089_vm12 = vcmp.eq.s32.totalorder %v3062_v52, %v2928_v14  ;;  %v4073_v45 = vld [vmem:[#allocation35_spill] sm:$0xff] }
  0xe8   :  { %4054 = vst [vmem:[#allocation88_spill] sm:$0xff] %v3064_v9  ;;  %v1067_v32 = vrot.slane %v1066_v63, 2  ;;  %v1079_v4 = vrot.slane %v1078_v49, 2  ;;  %vm1090_vm7 = vcmp.eq.s32.totalorder %v3064_v9, %v3049_v30  ;;  %1162 = vst [vmem:[%s3600_s5 + $0x4] sm:$0x1] %v3062_v52  ;;  %v3080_v58 = vmul.f32 %v4056_v25, %v4055_v54  ;;  %v4103_v30 = vld [vmem:[#allocation42_spill] sm:$0xff] }
  0xe9   :  { %1163 = vst [vmem:[%s3600_s5 + $0x5] sm:$0x1] %v3064_v9  ;;  %v4057_v27 = vsub.f32 %v2683_v13, %v2505_v36  ;;  %v4059_v16 = vsub.f32 %v2702_v29, %v2525_v21  ;;  %v4061_v17 = vsub.f32 %v2705_v48, %v2559_v50  ;;  %v4063_v42 = vmov %v4050_v40  ;;  %v4104_v14 = vld [vmem:[#allocation43_spill] sm:$0xff] }
  0xea   :  { %v3102_v10 = vsel %vm3054_vm15, %v2906_v3, %v4063_v42  ;;  %v4065_v36 = vrot.slane %v2908_v47, 1  ;;  %vm1068_vm11 = vcmp.lt.s32.totalorder %v1066_v63, %v1067_v32  ;;  %vm1080_vm13 = vcmp.lt.s32.totalorder %v1078_v49, %v1079_v4 }
  0xeb   :  { %v3085_v23 = vand.u32 2147483647, %v4057_v27  ;;  %v3090_v56 = vand.u32 2147483647, %v4059_v16  ;;  %v3095_v6 = vand.u32 2147483647, %v4061_v17  ;;  %v1069_v21 = vsel %vm1068_vm11, %v1066_v63, %v1067_v32 }
  0xec   :  { %4064 = vst [vmem:[#allocation91_spill] sm:$0xff] %v3102_v10  ;;  %vm891_vm10 = vcmp.lt.s32.totalorder %v2908_v47, %v4065_v36  ;;  %v1081_v24 = vsel %vm1080_vm13, %v1078_v49, %v1079_v4  ;;  %vm1109_vm14 = vcmp.gt.f32.partialorder %v4067_v41, %v4066_v33  ;;  %v1070_v50 = vrot.slane %v1069_v21, 1  ;;  %v4075_v63 = vld [vmem:[#allocation28_spill] sm:$0xff]  ;;  %v4076_v32 = vld [vmem:[#allocation30_spill] sm:$0xff] }
  0xed   :  { %4058 = vst [vmem:[#allocation27_spill] sm:$0xff] %v3085_v23  ;;  %4060 = vst [vmem:[#allocation89_spill] sm:$0xff] %v3090_v56  ;;  %v1082_v39 = vrot.slane %v1081_v24, 1  ;;  %v1110_v35 = vsel %vm1109_vm14, %v4067_v41, %v4066_v33  ;;  %v1599_v44 = vmov 0   ;;  %v4068_v3 = vmov %v4065_v36  ;;  %v4077_v16 = vld [vmem:[#allocation22_spill] sm:$0xff]  ;;  %v4078_v17 = vld [vmem:[#allocation32_spill] sm:$0xff] }
  0xee   :  { %4062 = vst [vmem:[#allocation90_spill] sm:$0xff] %v3095_v6  ;;  %v1111_v59 = vsel %vm1109_vm14, 1, %v1599_v44  ;;  %v3114_v15 = vsel %vm891_vm10, %v2908_v47, %v4068_v3  ;;  %vm1112_vm15 = vcmp.gt.f32.partialorder %v4070_v34, %v1110_v35  ;;  %vm1132_vm3 = vcmp.gt.f32.partialorder %v2664_v57, %v2661_v19  ;;  %v4115_v23 = vld [vmem:[#allocation70_spill] sm:$0xff] }
  0xef   :  { %4069 = vst [vmem:[#allocation29_spill] sm:$0xff] %v3114_v15  ;;  %v1166_v51 = vadd.f32 %v4067_v41, %v4066_v33  ;;  %vm1071_vm4 = vcmp.lt.s32.totalorder %v1069_v21, %v1070_v50  ;;  %vm1083_vm5 = vcmp.lt.s32.totalorder %v1081_v24, %v1082_v39  ;;  %v1113_v43 = vsel %vm1112_vm15, %v4070_v34, %v1110_v35 }
  0xf0   :  { %v1114_v28 = vsel %vm1112_vm15, 2, %v1111_v59  ;;  %v3122_v1 = vsel %vm1071_vm4, %v1069_v21, %v1070_v50  ;;  %v3124_v0 = vsel %vm1083_vm5, %v1081_v24, %v1082_v39  ;;  %vm1115_vm6 = vcmp.gt.f32.partialorder %v4073_v45, %v1113_v43  ;;  %v4079_v39 = vld [vmem:[#allocation25_spill] sm:$0xff] }
  0xf1   :  { %4071 = vst [vmem:[#allocation31_spill] sm:$0xff] %v3122_v1  ;;  %4072 = vst [vmem:[#allocation33_spill] sm:$0xff] %v3124_v0  ;;  %v1133_v47 = vsel %vm1132_vm3, %v2664_v57, %v2661_v19  ;;  %v1116_v5 = vsel %vm1115_vm6, %v4073_v45, %v1113_v43  ;;  %v1117_v55 = vsel %vm1115_vm6, 3, %v1114_v28  ;;  %v1134_v20 = vsel %vm1132_vm3, 1, %v1599_v44  ;;  %v4080_v43 = vld [vmem:[#allocation34_spill] sm:$0xff] }
  0xf2   :  { %1164 = vst [vmem:[%s3600_s5 + $0x6] sm:$0x1] %v3122_v1  ;;  %1165 = vst [vmem:[%s3600_s5 + $0x7] sm:$0x1] %v3124_v0  ;;  %vm1118_vm13 = vcmp.gt.f32.partialorder %v4074_v37, %v1116_v5  ;;  %vm1135_vm14 = vcmp.gt.f32.partialorder %v2673_v11, %v1133_v47  ;;  %v1167_v18 = vadd.f32 %v1166_v51, %v4070_v34  ;;  %v1173_v19 = vsel %vm209_vm0, %v4076_v32, 0.0  ;;  %v4101_v0 = vld [vmem:[#allocation85_spill] sm:$0xff] }
  0xf3   :  { %v1119_v8 = vsel %vm1118_vm13, %v4074_v37, %v1116_v5  ;;  %v1120_v2 = vsel %vm1118_vm13, 4, %v1117_v55  ;;  %v1136_v40 = vsel %vm1135_vm14, %v2673_v11, %v1133_v47  ;;  %v1137_v53 = vsel %vm1135_vm14, 2, %v1134_v20 }
  0xf4   :  { %vm1121_vm15 = vcmp.gt.f32.partialorder %v4075_v63, %v1119_v8  ;;  %vm1138_vm4 = vcmp.gt.f32.partialorder %v2676_v60, %v1136_v40  ;;  %v1168_v49 = vadd.f32 %v1167_v18, %v4073_v45  ;;  %v1174_v42 = vsel %vm209_vm0, %v4078_v17, 0.0  ;;  %v4083_v18 = vld [vmem:[#allocation38_spill] sm:$0xff] }
  0xf5   :  { %v1122_v57 = vsel %vm1121_vm15, %v4075_v63, %v1119_v8  ;;  %v1123_v4 = vsel %vm1121_vm15, 5, %v1120_v2  ;;  %v1139_v25 = vsel %vm1138_vm4, %v2676_v60, %v1136_v40  ;;  %v1140_v27 = vsel %vm1138_vm4, 3, %v1137_v53  ;;  %v4084_v2 = vld [vmem:[#allocation40_spill] sm:$0xff] }
  0xf6   :  { %vm1124_vm3 = vcmp.gt.f32.partialorder %v4077_v16, %v1122_v57  ;;  %vm1141_vm5 = vcmp.gt.f32.partialorder %v2680_v31, %v1139_v25  ;;  %v1169_v11 = vadd.f32 %v1168_v49, %v4074_v37  ;;  %v1175_v35 = vadd.f32 %v1174_v42, %v1173_v19 }
  0xf7   :  { %v1125_v36 = vsel %vm1124_vm3, %v4077_v16, %v1122_v57  ;;  %v1126_v21 = vsel %vm1124_vm3, 6, %v1123_v4  ;;  %v1142_v24 = vsel %vm1141_vm5, %v2680_v31, %v1139_v25  ;;  %v1143_v50 = vsel %vm1141_vm5, 4, %v1140_v27  ;;  %v4085_v57 = vld [vmem:[#allocation21_spill] sm:$0xff]  ;;  %v4086_v4 = vld [vmem:[#allocation64_spill] sm:$0xff] }
  0xf8   :  { %vm1127_vm6 = vcmp.gt.f32.partialorder %v4079_v39, %v1125_v36  ;;  %vm1144_vm13 = vcmp.gt.f32.partialorder %v2683_v13, %v1142_v24  ;;  %v1170_v60 = vadd.f32 %v1169_v11, %v4075_v63  ;;  %v1176_v28 = vsel %vm209_vm0, %v4080_v43, 0.0  ;;  %v4087_v25 = vld [vmem:[#allocation24_spill] sm:$0xff]  ;;  %v4088_v11 = vld [vmem:[#allocation26_spill] sm:$0xff] }
  0xf9   :  { %v1128_v44 = vsel %vm1127_vm6, %v4079_v39, %v1125_v36  ;;  %v1129_v59 = vsel %vm1127_vm6, 7, %v1126_v21  ;;  %v1145_v3 = vsel %vm1144_vm13, %v2683_v13, %v1142_v24  ;;  %v1146_v51 = vsel %vm1144_vm13, 5, %v1143_v50  ;;  %v4089_v36 = vld [vmem:[#allocation71_spill] sm:$0xff] }
  0xfa   :  { %vm1130_vm14 = vcmp.gt.f32.partialorder %v3080_v58, %v1128_v44  ;;  %vm1147_vm15 = vcmp.gt.f32.partialorder %v2702_v29, %v1145_v3  ;;  %v1171_v31 = vadd.f32 %v1170_v60, %v4077_v16  ;;  %v1177_v20 = vadd.f32 %v1176_v28, %v1175_v35  ;;  %v4092_v35 = vld [vmem:[#allocation73_spill] sm:$0xff]  ;;  %v4095_v28 = vld [vmem:[#allocation76_spill] sm:$0xff] }
  0xfb   :  { %v3177_v47 = vsel %vm1130_vm14, 8, %v1129_v59  ;;  %v1148_v5 = vsel %vm1147_vm15, %v2702_v29, %v1145_v3  ;;  %v1149_v55 = vsel %vm1147_vm15, 6, %v1146_v51  ;;  %v1178_v8 = vsel %vm209_vm0, %v4083_v18, 0.0  ;;  %v4093_v59 = vld [vmem:[#allocation74_spill] sm:$0xff]  ;;  %v4094_v51 = vld [vmem:[#allocation75_spill] sm:$0xff] }
  0xfc   :  { %4081 = vst [vmem:[#allocation35_spill] sm:$0xff] %v3177_v47  ;;  %vm1150_vm4 = vcmp.gt.f32.partialorder %v2705_v48, %v1148_v5  ;;  %v3182_v13 = vadd.f32 %v1171_v31, %v4079_v39  ;;  %v1180_v40 = vsel %vm209_vm0, %v4084_v2, 0.0  ;;  %v1179_v19 = vadd.f32 %v1178_v8, %v1177_v20  ;;  %v4096_v20 = vld [vmem:[#allocation77_spill] sm:$0xff] }
  0xfd   :  { %v1151_v53 = vsel %vm1150_vm4, %v2705_v48, %v1148_v5  ;;  %v1152_v49 = vsel %vm1150_vm4, 7, %v1149_v55  ;;  %v1182_v29 = vsel %vm209_vm0, %v4085_v57, 0.0  ;;  %v1184_v27 = vsel %vm209_vm0, %v4087_v25, 0.0  ;;  %v4091_v48 = vld [vmem:[#allocation72_spill] sm:$0xff] }
  0xfe   :  { %4082 = vst [vmem:[#allocation39_spill] sm:$0xff] %v3182_v13  ;;  %vm1153_vm3 = vcmp.gt.f32.partialorder %v4086_v4, %v1151_v53  ;;  %v1186_v42 = vsel %vm209_vm0, %v4088_v11, 0.0  ;;  %v1188_v21 = vmul.f32 %v4089_v36, %v4066_v33  ;;  %v1181_v50 = vadd.f32 %v1180_v40, %v1179_v19  ;;  %v4097_v40 = vld [vmem:[#allocation79_spill] sm:$0xff] }
  0xff   :  { %v3198_v24 = vsel %vm1153_vm3, 8, %v1152_v49  ;;  %v1189_v60 = vmul.f32 %v4091_v48, %v4076_v32  ;;  %v1190_v44 = vmul.f32 %v4092_v35, %v4067_v41  ;;  %v1191_v3 = vmul.f32 %v4093_v59, %v4078_v17  ;;  %v4098_v49 = vld [vmem:[#allocation81_spill] sm:$0xff]  ;;  %v4099_v4 = vld [vmem:[#allocation83_spill] sm:$0xff] }
 0x100   :  { %4090 = vst [vmem:[#allocation28_spill] sm:$0xff] %v3198_v24  ;;  %v1192_v31 = vmul.f32 %v4094_v51, %v4070_v34  ;;  %v1193_v5 = vmul.f32 %v4095_v28, %v4080_v43  ;;  %v1183_v55 = vadd.f32 %v1182_v29, %v1181_v50  ;;  %v1194_v8 = vmul.f32 %v4096_v20, %v4073_v45  ;;  %v4100_v24 = vld [vmem:[#allocation84_spill] sm:$0xff]  ;;  %v4102_v29 = vld [vmem:[#allocation41_spill] sm:$0xff] }
 0x101   :  { %v1195_v53 = vmul.f32 %v4097_v40, %v4083_v18  ;;  %v1196_v19 = vmul.f32 %v4098_v49, %v4074_v37  ;;  %v1197_v47 = vmul.f32 %v4099_v4, %v4084_v2  ;;  %v1198_v15 = vmul.f32 %v4100_v24, %v4075_v63 }
 0x102   :  { %v1199_v10 = vmul.f32 %v4101_v0, %v4085_v57  ;;  %v1200_v50 = vmul.f32 %v4102_v29, %v4077_v16  ;;  %v1185_v1 = vadd.f32 %v1184_v27, %v1183_v55  ;;  %v1201_v9 = vmul.f32 %v4103_v30, %v4087_v25 }
 0x103   :  { %v1202_v52 = vmul.f32 %v4104_v14, %v4079_v39  ;;  %v1203_v46 = vmul.f32 %v4105_v62, %v4088_v11  ;;  %v1204_v54 = vadd.f32 %v1190_v44, %v1188_v21  ;;  %v1211_v12 = vsel %vm209_vm0, %v1189_v60, 0.0  ;;  %v4107_v60 = vld [vmem:[#allocation63_spill] sm:$0xff] }
 0x104   :  { %v1212_v22 = vsel %vm209_vm0, %v1191_v3, 0.0  ;;  %v1214_v38 = vsel %vm209_vm0, %v1193_v5, 0.0  ;;  %v3235_v61 = vadd.f32 %v1186_v42, %v1185_v1  ;;  %v1216_v27 = vsel %vm209_vm0, %v1195_v53, 0.0  ;;  %v4108_v5 = vld [vmem:[#allocation61_spill] sm:$0xff]  ;;  %v4116_v62 = vld [vmem:[#allocation23_spill] sm:$0xff] }
 0x105   :  { %v1213_v7 = vadd.f32 %v1212_v22, %v1211_v12  ;;  %v1218_v55 = vsel %vm209_vm0, %v1197_v47, 0.0  ;;  %v1205_v26 = vadd.f32 %v1204_v54, %v1192_v31  ;;  %v1220_v13 = vsel %vm209_vm0, %v1199_v10, 0.0  ;;  %v4109_v12 = vld [vmem:[#allocation55_spill] sm:$0xff]  ;;  %v4110_v47 = vld [vmem:[#allocation56_spill] sm:$0xff] }
 0x106   :  { %4106 = vst [vmem:[#allocation30_spill] sm:$0xff] %v3235_v61  ;;  %v1222_v6 = vsel %vm209_vm0, %v1201_v9, 0.0  ;;  %v1224_v21 = vsel %vm209_vm0, %v1203_v46, 0.0  ;;  %v1234_v3 = vmul.f32 %v4107_v60, %v4066_v33  ;;  %v1235_v1 = vmul.f32 %v4108_v5, %v4067_v41  ;;  %v4111_v10 = vld [vmem:[#allocation59_spill] sm:$0xff]  ;;  %v4112_v9 = vld [vmem:[#allocation62_spill] sm:$0xff] }
 0x107   :  { %v1215_v44 = vadd.f32 %v1214_v38, %v1213_v7  ;;  %v1236_v22 = vmul.f32 %v4109_v12, %v4070_v34  ;;  %v1206_v42 = vadd.f32 %v1205_v26, %v1194_v8  ;;  %v1237_v54 = vmul.f32 %v4110_v47, %v4073_v45  ;;  %v4113_v38 = vld [vmem:[#allocation52_spill] sm:$0xff]  ;;  %v4114_v61 = vld [vmem:[#allocation58_spill] sm:$0xff] }
 0x108   :  { %v1238_v31 = vmul.f32 %v4111_v10, %v4074_v37  ;;  %v1239_v46 = vmul.f32 %v4112_v9, %v4075_v63  ;;  %v1240_v53 = vmul.f32 %v4113_v38, %v4077_v16  ;;  %v1241_v56 = vmul.f32 %v4114_v61, %v4079_v39 }
 0x109   :  { %v1217_v7 = vadd.f32 %v1216_v27, %v1215_v44  ;;  %v4117_v26 = vsub.f32 %v4115_v23, %v4116_v62  ;;  %v1207_v11 = vadd.f32 %v1206_v42, %v1196_v19  ;;  %v1243_v14 = vadd.f32 %v1235_v1, %v1234_v3  ;;  %v4119_v27 = vld [vmem:[#allocation66_spill] sm:$0xff]  ;;  %v4122_v62 = vld [vmem:[#allocation67_spill] sm:$0xff]  ;;  %v4137_v42 = vld [vmem:[#allocation52_spill] sm:$0xff] }
 0x10a   :  { %v4118_v30 = vmax.f32 %v4089_v36, %v4107_v60  ;;  %v4120_v44 = vmax.f32 %v4091_v48, %v4119_v27  ;;  %v4121_v61 = vmax.f32 %v4092_v35, %v4108_v5  ;;  %v4123_v23 = vmax.f32 %v4093_v59, %v4122_v62  ;;  %v4144_v27 = vld [vmem:[#allocation43_spill] sm:$0xff] }
 0x10b   :  { %v1242_v8 = vmul.f32 %v4117_v26, %v3080_v58  ;;  %v1219_v29 = vadd.f32 %v1218_v55, %v1217_v7  ;;  %v1208_v60 = vadd.f32 %v1207_v11, %v1198_v15  ;;  %v1244_v3 = vadd.f32 %v1243_v14, %v1236_v22  ;;  %v4131_v11 = vld [vmem:[#allocation78_spill] sm:$0xff]  ;;  %v4143_v26 = vld [vmem:[#allocation25_spill] sm:$0xff] }
 0x10c   :  { %v1257_v25 = vmul.f32 %v4118_v30, %v4066_v33  ;;  %v1258_v38 = vmul.f32 %v4120_v44, %v4076_v32  ;;  %v1259_v39 = vmul.f32 %v4121_v61, %v4067_v41  ;;  %v1260_v19 = vmul.f32 %v4123_v23, %v4078_v17  ;;  %v4125_v32 = vld [vmem:[#allocation68_spill] sm:$0xff]  ;;  %v4128_v17 = vld [vmem:[#allocation69_spill] sm:$0xff] }
 0x10d   :  { %v4124_v30 = vmax.f32 %v4094_v51, %v4109_v12  ;;  %v4126_v48 = vmax.f32 %v4095_v28, %v4125_v32  ;;  %v4127_v61 = vmax.f32 %v4096_v20, %v4110_v47  ;;  %v1221_v5 = vadd.f32 %v1220_v13, %v1219_v29 }
 0x10e   :  { %v4129_v59 = vmax.f32 %v4097_v40, %v4128_v17  ;;  %v4130_v14 = vmax.f32 %v4098_v49, %v4111_v10  ;;  %v1209_v28 = vadd.f32 %v1208_v60, %v1200_v50  ;;  %v1245_v12 = vadd.f32 %v1244_v3, %v1237_v54  ;;  %v4136_v49 = vld [vmem:[#allocation41_spill] sm:$0xff]  ;;  %v4141_v50 = vld [vmem:[#allocation82_spill] sm:$0xff] }
 0x10f   :  { %v1261_v36 = vmul.f32 %v4124_v30, %v4070_v34  ;;  %v1262_v55 = vmul.f32 %v4126_v48, %v4080_v43  ;;  %v1263_v35 = vmul.f32 %v4127_v61, %v4073_v45  ;;  %v4132_v43 = vmax.f32 %v4099_v4, %v4131_v11  ;;  %v4139_v4 = vld [vmem:[#allocation24_spill] sm:$0xff] }
 0x110   :  { %v1264_v1 = vmul.f32 %v4129_v59, %v4083_v18  ;;  %v1265_v15 = vmul.f32 %v4130_v14, %v4074_v37  ;;  %v4133_v13 = vmax.f32 %v4100_v24, %v4112_v9  ;;  %v4134_v18 = vld [vmem:[#allocation80_spill] sm:$0xff]  ;;  %v1223_v22 = vadd.f32 %v1222_v6, %v1221_v5  ;;  %v4145_v24 = vld [vmem:[#allocation58_spill] sm:$0xff] }
 0x111   :  { %v1266_v51 = vmul.f32 %v4132_v43, %v4084_v2  ;;  %v4135_v40 = vmax.f32 %v4101_v0, %v4134_v18  ;;  %v4138_v47 = vmax.f32 %v4136_v49, %v4137_v42  ;;  %v4140_v2 = vld [vmem:[#allocation42_spill] sm:$0xff]  ;;  %v4146_v9 = vmax.f32 %v4144_v27, %v4145_v24  ;;  %v4156_v42 = vld [vmem:[#allocation27_spill] sm:$0xff]  ;;  %v4160_v27 = vld [vmem:[#allocation5_spill] sm:$0xff] }
 0x112   :  { %v1267_v20 = vmul.f32 %v4133_v13, %v4075_v63  ;;  %v4142_v54 = vmax.f32 %v4140_v2, %v4141_v50  ;;  %v1210_v62 = vadd.f32 %v1209_v28, %v1202_v52  ;;  %v1246_v23 = vadd.f32 %v1245_v12, %v1238_v31  ;;  %v4147_v0 = vld [vmem:[#allocation26_spill] sm:$0xff]  ;;  %v4153_v12 = vld [vmem:[#allocation47_spill] sm:$0xff]  ;;  %v4161_v24 = vld [vmem:[#allocation4_spill] sm:$0xff] }
 0x113   :  { %v1268_v29 = vmul.f32 %v4135_v40, %v4085_v57  ;;  %v1269_v10 = vmul.f32 %v4138_v47, %v4077_v16  ;;  %v1271_v44 = vmul.f32 %v4146_v9, %v4143_v26  ;;  %v4148_v57 = vld [vmem:[#allocation44_spill] sm:$0xff]  ;;  %v4149_v6 = vld [vmem:[#allocation86_spill] sm:$0xff]  ;;  %v1273_v3 = vadd.f32 %v1259_v39, %v1257_v25 }
 0x114   :  { %v1270_v7 = vmul.f32 %v4142_v54, %v4139_v4  ;;  %v4150_v30 = vmax.f32 %v4148_v57, %v4149_v6  ;;  %v1225_v32 = vadd.f32 %v1224_v21, %v1223_v22  ;;  %v1280_v48 = vsel %vm209_vm0, %v1258_v38, 0.0  ;;  %v4154_v22 = vld [vmem:[#allocation50_spill] sm:$0xff]  ;;  %v4164_v6 = vld [vmem:[#allocation8_spill] sm:$0xff] }
 0x115   :  { %v1281_v61 = vsel %vm209_vm0, %v1260_v19, 0.0  ;;  %v1283_v5 = vsel %vm209_vm0, %v1262_v55, 0.0  ;;  %v1247_v17 = vadd.f32 %v1246_v23, %v1239_v46  ;;  %v1274_v59 = vadd.f32 %v1273_v3, %v1261_v36  ;;  %v4151_v46 = vld [vmem:[#allocation45_spill] sm:$0xff]  ;;  %v4152_v55 = vld [vmem:[#allocation46_spill] sm:$0xff] }
 0x116   :  { %v1272_v60 = vmul.f32 %v4150_v30, %v4147_v0  ;;  %v1282_v14 = vadd.f32 %v1281_v61, %v1280_v48  ;;  %v1285_v11 = vsel %vm209_vm0, %v1264_v1, 0.0  ;;  %v1226_v52 = vsel %vm209_vm0, %v1225_v32, 0.0  ;;  %v3363_v48 = vld [vmem:[%s3597_s2] sm:$0x1]  ;;  %v4165_v61 = vld [vmem:[#allocation9_spill] sm:$0xff] }
 0x117   :  { %v1287_v31 = vsel %vm209_vm0, %v1266_v51, 0.0  ;;  %v1289_v43 = vsel %vm209_vm0, %v1268_v29, 0.0  ;;  %v1291_v39 = vsel %vm209_vm0, %v1270_v7, 0.0  ;;  %v1227_v25 = vadd.f32 %v1226_v52, %v1210_v62  ;;  %v4159_v7 = vld [vmem:[#allocation3_spill] sm:$0xff]  ;;  %v4166_v52 = vld [vmem:[#allocation10_spill] sm:$0xff] }
 0x118   :  { %v1248_v21 = vadd.f32 %v1247_v17, %v1240_v53  ;;  %v1275_v38 = vadd.f32 %v1274_v59, %v1263_v35  ;;  %v1284_v28 = vadd.f32 %v1283_v5, %v1282_v14  ;;  %v1293_v19 = vsel %vm209_vm0, %v1272_v60, 0.0  ;;  %v4155_v35 = vld [vmem:[#allocation51_spill] sm:$0xff]  ;;  %v3370_v59 = vld [vmem:[%s3597_s2 + $0x1] sm:$0x1] }
 0x119   :  { %v1303_v36 = vmul.f32 %v4151_v46, %v4066_v33  ;;  %v1304_v1 = vmul.f32 %v4152_v55, %v4067_v41  ;;  %v1305_v13 = vmul.f32 %v4153_v12, %v4070_v34  ;;  %v1228_v51 = vrot.slane %v1227_v25, 4  ;;  %v4157_v33 = vld [vmem:[#allocation89_spill] sm:$0xff]  ;;  %v4168_v55 = vld [vmem:[#allocation12_spill] sm:$0xff] }
 0x11a   :  { %v1249_v18 = vadd.f32 %v1248_v21, %v1241_v56  ;;  %v1276_v40 = vadd.f32 %v1275_v38, %v1265_v15  ;;  %v1286_v29 = vadd.f32 %v1285_v11, %v1284_v28  ;;  %v1306_v53 = vmul.f32 %v4154_v22, %v4073_v45  ;;  %v4158_v56 = vld [vmem:[#allocation90_spill] sm:$0xff] }
 0x11b   :  { %v1307_v49 = vmul.f32 %v4155_v35, %v4074_v37  ;;  %v1308_v47 = vmul.f32 %v4156_v42, %v4075_v63  ;;  %v1309_v4 = vmul.f32 %v4157_v33, %v4077_v16  ;;  %v1229_v41 = vadd.f32 %v1228_v51, %v1227_v25  ;;  %v4162_v16 = vld [vmem:[#allocation7_spill] sm:$0xff]  ;;  %v4169_v51 = vld [vmem:[#allocation13_spill] sm:$0xff]  ;;  %v4170_v22 = vld [vmem:[#allocation14_spill] sm:$0xff] }
 0x11c   :  { %v1250_v2 = vadd.f32 %v1249_v18, %v1242_v8  ;;  %v1277_v50 = vadd.f32 %v1276_v40, %v1267_v20  ;;  %v1288_v34 = vadd.f32 %v1287_v31, %v1286_v29  ;;  %v1310_v15 = vmul.f32 %v4158_v56, %v4143_v26  ;;  %v4163_v8 = vld [vmem:[#allocation6_spill] sm:$0xff]  ;;  %v4167_v25 = vld [vmem:[#allocation11_spill] sm:$0xff]  ;;  %v4171_v35 = vld [vmem:[#allocation16_spill] sm:$0xff] }
 0x11d   :  { %v1311_v54 = vadd.f32 %v1304_v1, %v1303_v36  ;;  %v1324_v45 = vadd.f32 %v4160_v27, %v4159_v7  ;;  %v1332_v37 = vsel %vm209_vm0, %v4161_v24, 0.0  ;;  %v1230_v9 = vrot.slane %v1229_v41, 2  ;;  %v3388_v1 = vld [vmem:[%s3597_s2 + $0x3] sm:$0x1]  ;;  %v4174_v7 = vld [vmem:[#allocation39_spill] sm:$0xff] }
 0x11e   :  { %v1251_v62 = vrot.slane %v1250_v2, 4  ;;  %v1278_v63 = vadd.f32 %v1277_v50, %v1269_v10  ;;  %v1290_v23 = vadd.f32 %v1289_v43, %v1288_v34  ;;  %v1333_v20 = vsel %vm209_vm0, %v4163_v8, 0.0  ;;  %v3378_v43 = vld [vmem:[%s3597_s2 + $0x2] sm:$0x1]  ;;  %v4173_v50 = vld [vmem:[#allocation15_spill] sm:$0xff] }
 0x11f   :  { %v1312_v0 = vadd.f32 %v1311_v54, %v1305_v13  ;;  %v1325_v57 = vadd.f32 %v1324_v45, %v4162_v16  ;;  %v1335_v26 = vsel %vm209_vm0, %v4164_v6, 0.0  ;;  %v1231_v30 = vadd.f32 %v1230_v9, %v1229_v41  ;;  %v4172_v42 = vld [vmem:[#allocation30_spill] sm:$0xff] }
 0x120   :  { %v1252_v60 = vadd.f32 %v1251_v62, %v1250_v2  ;;  %v1279_v3 = vadd.f32 %v1278_v63, %v1271_v44  ;;  %v1292_v32 = vadd.f32 %v1291_v39, %v1290_v23  ;;  %vm1093_vm6 = vcmp.gt.f32.partialorder %v3363_v48, 0.0  ;;  %v4175_v63 = vld [vmem:[#allocation18_spill] sm:$0xff] }
 0x121   :  { %v1313_v10 = vadd.f32 %v1312_v0, %v1306_v53  ;;  %v1326_v5 = vadd.f32 %v1325_v57, %v4165_v61  ;;  %v1334_v17 = vadd.f32 %v1333_v20, %v1332_v37  ;;  %vm1094_vm13 = vcmp.gt.f32.partialorder %v3370_v59, 0.0  ;;  %v3415_v37 = vld [vmem:[%s3597_s2 + $0x5] sm:$0x1]  ;;  %v3423_v0 = vld [vmem:[%s3597_s2 + $0x6] sm:$0x1]  ;;  %vm3438_vm11 = vmand %vm1085_vm8, %vm1093_vm6 }
 0x122   :  { %v1232_v44 = vrot.slane %v1231_v30, 1  ;;  %v1253_v14 = vrot.slane %v1252_v60, 2  ;;  %v1294_v11 = vadd.f32 %v1293_v19, %v1292_v32  ;;  %v1337_v31 = vsel %vm209_vm0, %v4166_v52, 0.0  ;;  %vm3453_vm5 = vmand %vm1086_vm9, %vm1094_vm13 }
 0x123   :  { %vm1095_vm14 = vcmp.gt.f32.partialorder %v3378_v43, 0.0  ;;  %v1314_v39 = vadd.f32 %v1313_v10, %v1307_v49  ;;  %v1327_v21 = vadd.f32 %v1326_v5, %v4167_v25  ;;  %v1336_v38 = vadd.f32 %v1335_v26, %v1334_v17 }
 0x124   :  { %v1233_v28 = vadd.f32 %v1232_v44, %v1231_v30  ;;  %v1254_v46 = vadd.f32 %v1253_v14, %v1252_v60  ;;  %v1295_v36 = vsel %vm209_vm0, %v1294_v11, 0.0  ;;  %v1339_v19 = vsel %vm209_vm0, %v4168_v55, 0.0  ;;  %v4177_v30 = vld [vmem:[#allocation20_spill] sm:$0xff]  ;;  %v3445_v44 = vld [vmem:[%s3597_s2 + $0x7] sm:$0x1]  ;;  %vm3462_vm8 = vmand %vm1087_vm1, %vm1095_vm14 }
 0x125   :  { %vm1096_vm15 = vcmp.gt.f32.partialorder %v3388_v1, 0.0  ;;  %v1296_v12 = vadd.f32 %v1295_v36, %v1279_v3  ;;  %v1315_v13 = vadd.f32 %v1314_v39, %v1308_v47  ;;  %v1328_v18 = vadd.f32 %v1327_v21, %v4169_v51  ;;  %v3404_v47 = vld [vmem:[%s3597_s2 + $0x4] sm:$0x1]  ;;  %v4210_v14 = vld [vmem:[#allocation29_spill] sm:$0xff] }
 0x126   :  { %v1338_v40 = vadd.f32 %v1337_v31, %v1336_v38  ;;  %v1255_v29 = vrot.slane %v1254_v46, 1  ;;  %v1341_v53 = vsel %vm209_vm0, %v4170_v22, 0.0  ;;  %v1343_v49 = vsel %vm209_vm0, %v4171_v35, 0.0  ;;  %1442 = vst [vmem:[%s3601_s4] sm:$0x1] %v1233_v28  ;;  %vm3474_vm9 = vmand %vm1088_vm2, %vm1096_vm15 }
 0x127   :  { %v1357_v33 = vsel %vm209_vm0, %v4172_v42, 0.0  ;;  %vm1097_vm4 = vcmp.gt.f32.partialorder %v3404_v47, 0.0  ;;  %v1297_v41 = vrot.slane %v1296_v12, 4  ;;  %v1316_v2 = vadd.f32 %v1315_v13, %v1309_v4 }
 0x128   :  { %v1329_v34 = vadd.f32 %v1328_v18, %v4173_v50  ;;  %v1340_v56 = vadd.f32 %v1339_v19, %v1338_v40  ;;  %v1256_v54 = vadd.f32 %v1255_v29, %v1254_v46  ;;  %v1358_v27 = vadd.f32 %v1357_v33, %v4174_v7  ;;  %v4190_v46 = vld [vmem:[#allocation19_spill] sm:$0xff]  ;;  %vm3488_vm1 = vmand %vm1089_vm12, %vm1097_vm4 }
 0x129   :  { %v1365_v45 = vadd.f32 %v4174_v7, %v3080_v58  ;;  %v1372_v24 = vrot.slane %v4174_v7, 4  ;;  %vm1098_vm3 = vcmp.gt.f32.partialorder %v3415_v37, 0.0  ;;  %v1298_v9 = vadd.f32 %v1297_v41, %v1296_v12  ;;  %v4176_v58 = vld [vmem:[#allocation17_spill] sm:$0xff] }
 0x12a   :  { %v1317_v4 = vadd.f32 %v1316_v2, %v1310_v15  ;;  %v1342_v62 = vadd.f32 %v1341_v53, %v1340_v56  ;;  %v1345_v23 = vsel %vm209_vm0, %v4175_v63, 0.0  ;;  %v1330_v16 = vadd.f32 %v1329_v34, %v4176_v58  ;;  %1443 = vst [vmem:[%s3601_s4 + $0x1] sm:$0x1] %v1256_v54  ;;  %vm3506_vm12 = vmand %vm1090_vm7, %vm1098_vm3 }
 0x12b   :  { %v1359_v57 = vrot.slane %v1358_v27, 4  ;;  %v1366_v8 = vrot.slane %v1365_v45, 4  ;;  %v1373_v20 = vadd.f32 %v1372_v24, %v4174_v7  ;;  %v1299_v15 = vrot.slane %v1298_v9, 2 }
 0x12c   :  { %v1318_v6 = vrot.slane %v1317_v4, 4  ;;  %v1344_v26 = vadd.f32 %v1343_v49, %v1342_v62  ;;  %v1347_v60 = vsel %vm209_vm0, %v4177_v30, 0.0  ;;  %vm1100_vm10 = vcmp.gt.f32.partialorder %v3445_v44, 0.0  ;;  %v1590_v62 = vld [vmem:[%s3598_s3] sm:$0xff]  ;;  %v4204_v30 = vld [vmem:[#allocation31_spill] sm:$0xff] }
 0x12d   :  { %v1360_v61 = vadd.f32 %v1359_v57, %v1358_v27  ;;  %v1367_v5 = vadd.f32 %v1366_v8, %v1365_v45  ;;  %v1374_v17 = vrot.slane %v1373_v20, 2  ;;  %v1300_v31 = vadd.f32 %v1299_v15, %v1298_v9 }
 0x12e   :  { %v1319_v39 = vadd.f32 %v1318_v6, %v1317_v4  ;;  %v1346_v25 = vadd.f32 %v1345_v23, %v1344_v26  ;;  %v1331_v36 = vadd.f32 %v1330_v16, %v4190_v46  ;;  %v1600_v40 = vmov 0.0  }
 0x12f   :  { %v1361_v55 = vrot.slane %v1360_v61, 2  ;;  %v1368_v19 = vrot.slane %v1367_v5, 2  ;;  %v1375_v12 = vadd.f32 %v1374_v17, %v1373_v20  ;;  %v1301_v13 = vrot.slane %v1300_v31, 1  ;;  %v4209_v17 = vld [vmem:[#allocation33_spill] sm:$0xff] }
 0x130   :  { %v1320_v51 = vrot.slane %v1319_v39, 2  ;;  %v1348_v18 = vadd.f32 %v1347_v60, %v1346_v25  ;;  %v1463_v29 = vsel %vm3438_vm11, 1.0, %v1600_v40  ;;  %v1464_v41 = vsel %vm3453_vm5, 1.0, %v1600_v40  ;;  %v4205_v60 = vld [vmem:[#allocation91_spill] sm:$0xff] }
 0x131   :  { %v1362_v49 = vadd.f32 %v1361_v55, %v1360_v61  ;;  %v1369_v42 = vadd.f32 %v1368_v19, %v1367_v5  ;;  %v1376_v33 = vrot.slane %v1375_v12, 1  ;;  %v1302_v2 = vadd.f32 %v1301_v13, %v1300_v31  ;;  %v4215_v25 = vld [vmem:[#allocation35_spill] sm:$0xff] }
 0x132   :  { %v1321_v50 = vadd.f32 %v1320_v51, %v1319_v39  ;;  %v1349_v34 = vsel %vm209_vm0, %v1348_v18, 0.0  ;;  %v1465_v56 = vsel %vm3462_vm8, 1.0, %v1600_v40  ;;  %vm1156_vm2 = vcmp.gt.f32.partialorder %v1590_v62, 0.0  ;;  %v4214_v39 = vld [vmem:[#allocation28_spill] sm:$0xff] }
 0x133   :  { %v1350_v45 = vadd.f32 %v1349_v34, %v1331_v36  ;;  %v1363_v24 = vrot.slane %v1362_v49, 1  ;;  %v1370_v9 = vrot.slane %v1369_v42, 1  ;;  %v1377_v4 = vadd.f32 %v1376_v33, %v1375_v12  ;;  %1444 = vst [vmem:[%s3601_s4 + $0x2] sm:$0x1] %v1302_v2 }
 0x134   :  { %v1322_v63 = vrot.slane %v1321_v50, 1  ;;  %v1466_v23 = vsel %vm3474_vm9, 1.0, %v1600_v40  ;;  %v1394_v58 = vsel %vm209_vm0, %v1463_v29, 0.0  ;;  %v1395_v26 = vsel %vm209_vm0, %v1464_v41, 0.0 }
 0x135   :  { %v1351_v20 = vrot.slane %v1350_v45, 4  ;;  %v1364_v15 = vadd.f32 %v1363_v24, %v1362_v49  ;;  %v1371_v6 = vadd.f32 %v1370_v9, %v1369_v42  ;;  %1449 = vst [vmem:[%s3601_s4 + $0x7] sm:$0x1] %v1377_v4  ;;  %vm4203_vm11 = vcmp.gt.f32.partialorder %v3423_v0, 0.0 }
 0x136   :  { %vm4206_vm5 = vcmp.eq.s32.totalorder %v4204_v30, %v4205_v60  ;;  %v1323_v32 = vadd.f32 %v1322_v63, %v1321_v50  ;;  %v1467_v10 = vsel %vm3488_vm1, 1.0, %v1600_v40  ;;  %v1396_v61 = vadd.f32 %v1395_v26, %v1394_v58 }
 0x137   :  { %vm3519_vm6 = vmand %vm4206_vm5, %vm4203_vm11  ;;  %v1397_v5 = vsel %vm209_vm0, %v1465_v56, 0.0  ;;  %vm4211_vm7 = vcmp.eq.s32.totalorder %v4209_v17, %v4210_v14  ;;  %v1352_v52 = vadd.f32 %v1351_v20, %v1350_v45  ;;  %v1399_v31 = vsel %vm209_vm0, %v1466_v23, 0.0  ;;  %1447 = vst [vmem:[%s3601_s4 + $0x5] sm:$0x1] %v1364_v15 }
 0x138   :  { %vm3531_vm13 = vmand %vm4211_vm7, %vm1100_vm10  ;;  %1448 = vst [vmem:[%s3601_s4 + $0x6] sm:$0x1] %v1371_v6  ;;  %vm4216_vm14 = vcmp.eq.s32.totalorder %v4214_v39, %v4215_v25  ;;  %v1468_v38 = vsel %vm3506_vm12, 1.0, %v1600_v40  ;;  %v1398_v28 = vadd.f32 %v1397_v5, %v1396_v61  ;;  %v1410_v46 = vsel %vm209_vm0, %v3363_v48, 0.0 }
 0x139   :  { %vm3546_vm15 = vmand %vm4216_vm14, %vm1156_vm2  ;;  %v1411_v36 = vsel %vm209_vm0, %v3370_v59, 0.0  ;;  %1445 = vst [vmem:[%s3601_s4 + $0x3] sm:$0x1] %v1323_v32  ;;  %v1353_v55 = vrot.slane %v1352_v52, 2  ;;  %v1401_v19 = vsel %vm209_vm0, %v1467_v10, 0.0  ;;  %v1413_v13 = vsel %vm209_vm0, %v3378_v43, 0.0 }
 0x13a   :  { %v1412_v12 = vadd.f32 %v1411_v36, %v1410_v46  ;;  %v1469_v51 = vsel %vm3519_vm6, 1.0, %v1600_v40  ;;  %v1470_v48 = vsel %vm3531_vm13, 1.0, %v1600_v40  ;;  %v1400_v18 = vadd.f32 %v1399_v31, %v1398_v28 }
 0x13b   :  { %v1415_v59 = vsel %vm209_vm0, %v3388_v1, 0.0  ;;  %v1354_v29 = vadd.f32 %v1353_v55, %v1352_v52  ;;  %v1403_v22 = vsel %vm209_vm0, %v1468_v38, 0.0  ;;  %v1471_v35 = vsel %vm3546_vm15, 1.0, %v1600_v40 }
 0x13c   :  { %v1414_v53 = vadd.f32 %v1413_v13, %v1412_v12  ;;  %v1402_v49 = vadd.f32 %v1401_v19, %v1400_v18  ;;  %v1417_v43 = vsel %vm209_vm0, %v3404_v47, 0.0  ;;  %v1429_v42 = vrot.slane %v1471_v35, 4 }
 0x13d   :  { %v1436_v33 = vrot.slane %v1590_v62, 4  ;;  %v1355_v41 = vrot.slane %v1354_v29, 1  ;;  %v1405_v2 = vsel %vm209_vm0, %v1469_v51, 0.0  ;;  %v1419_v1 = vsel %vm209_vm0, %v3415_v37, 0.0 }
 0x13e   :  { %v1416_v50 = vadd.f32 %v1415_v59, %v1414_v53  ;;  %v1404_v34 = vadd.f32 %v1403_v22, %v1402_v49  ;;  %v1430_v56 = vadd.f32 %v1471_v35, %v1429_v42  ;;  %v1407_v27 = vsel %vm209_vm0, %v1470_v48, 0.0 }
 0x13f   :  { %v1437_v54 = vadd.f32 %v1590_v62, %v1436_v33  ;;  %v1356_v7 = vadd.f32 %v1355_v41, %v1354_v29  ;;  %v1421_v47 = vsel %vm209_vm0, %v3423_v0, 0.0  ;;  %v1423_v37 = vsel %vm209_vm0, %v3445_v44, 0.0 }
 0x140   :  { %v1418_v40 = vadd.f32 %v1417_v43, %v1416_v50  ;;  %v1406_v45 = vadd.f32 %v1405_v2, %v1404_v34  ;;  %v1431_v24 = vrot.slane %v1430_v56, 2 }
 0x141   :  { %v1438_v9 = vrot.slane %v1437_v54, 2  ;;  %1446 = vst [vmem:[%s3601_s4 + $0x4] sm:$0x1] %v1356_v7 }
 0x142   :  { %v1420_v4 = vadd.f32 %v1419_v1, %v1418_v40  ;;  %v1408_v63 = vadd.f32 %v1407_v27, %v1406_v45  ;;  %v1432_v62 = vadd.f32 %v1431_v24, %v1430_v56 }
 0x143   :  { %v1439_v23 = vadd.f32 %v1438_v9, %v1437_v54 }
 0x144   :  { %v1422_v58 = vadd.f32 %v1421_v47, %v1420_v4  ;;  %v1433_v16 = vrot.slane %v1432_v62, 1  ;;  %1450 = vst [vmem:[%s3601_s4 + $0x8] sm:$0x1] %v1408_v63 }
 0x145   :  { %v1440_v57 = vrot.slane %v1439_v23, 1 }
 0x146   :  { %v1424_v0 = vadd.f32 %v1423_v37, %v1422_v58  ;;  %v1434_v8 = vadd.f32 %v1433_v16, %v1432_v62 }
 0x147   :  { %v1441_v20 = vadd.f32 %v1440_v57, %v1439_v23 }
 0x148   :  { %1451 = vst [vmem:[%s3601_s4 + $0x9] sm:$0x1] %v1424_v0  ;;  %1452 = vst [vmem:[%s3601_s4 + $0xa] sm:$0x1] %v1434_v8 }
 0x149   :  { %1453 = vst [vmem:[%s3601_s4 + $0xb] sm:$0x1] %v1441_v20 }

</bundles_post_ra>
